<compile_context>
chip_gen: v7x
topology: tpu7x:2x2x1
jax: 0.10.0
libtpu: 0.0.40
codegen_flags: <defaults>
</compile_context>

<pallas_src>
import functools

import jax
import jax.numpy as jnp
from jax.experimental import pallas as pl
from jax.experimental.pallas import tpu as pltpu


_VMEM_SPEC = pl.BlockSpec(memory_space=pltpu.MemorySpace.VMEM)


# ----------------------------------------------------------------------------
# Fused kernel: all LSTM layers + attention + FC head in one invocation.
# ----------------------------------------------------------------------------
def _fused_lstm_kernel(*refs, T, BP, B, H, num_layers):
    """refs = [x, dirmask, (wih,b,whh)*L, aw1,ab1,aw2,ab2, fw1..fb3,
               logits_out, attn_out, gxf_sc, gxb_sc, act_sc]

    x:        (T*BP, D)   time-major input, batch padded to BP sublanes
    dirmask:  (1, 8H)     1.0 on forward-direction gate columns, 0.0 on backward
    wih:      (D, 8H)     input weights, gate-major/direction-minor columns
    b:        (1, 8H)     b_ih + b_hh, same column layout
    whh:      (2H, 8H)    block-diagonal recurrent weights ([fwd|bwd] rows)
    """
    n_in = 2 + 3 * num_layers + 10
    in_refs = refs[:n_in]
    logits_ref, attn_ref = refs[n_in], refs[n_in + 1]
    gxf_sc, gxb_sc, act_sc = refs[n_in + 2], refs[n_in + 3], refs[n_in + 4]

    x_ref, mask_ref = in_refs[0], in_refs[1]
    layer_refs = [tuple(in_refs[2 + 3 * l: 5 + 3 * l]) for l in range(num_layers)]
    (aw1_ref, ab1_ref, aw2_ref, ab2_ref,
     fw1_ref, fb1_ref, fw2_ref, fb2_ref, fw3_ref, fb3_ref) = in_refs[2 + 3 * num_layers:]

    f32 = jnp.float32
    H2, H4, H6, H8 = 2 * H, 4 * H, 6 * H, 8 * H

    mask = mask_ref[...]          # (1, 8H)
    hmask = mask[:, 0:H2]         # (1, 2H): selects the fwd half of an [fwd|bwd] tile

    cur = x_ref[...]              # (T*BP, D) current layer input (a value)

    for (wih_ref, b_ref, whh_ref) in layer_refs:
        # ---- hoisted input projection (both directions, bias folded in) ----
        gx = jnp.dot(cur, wih_ref[...], preferred_element_type=f32) + b_ref[...]
        gxf_sc[...] = gx * mask            # forward-direction gate columns
        gxb_sc[...] = gx - gx * mask       # backward-direction gate columns
        whh = whh_ref[...]                 # (2H, 8H) block-diagonal

        h_cat = jnp.zeros((BP, H2), f32)   # [h_fwd | h_bwd]
        c_cat = jnp.zeros((BP, H2), f32)   # [c_fwd | c_bwd]
        hcat_steps = [None] * T

        # Fully unrolled time loop; both directions advance together.
        for s in range(T):
            tf = s               # forward-direction time index
            tb = T - 1 - s       # backward-direction time index
            gr = jnp.dot(h_cat, whh, preferred_element_type=f32)        # (BP, 8H)
            g_all = (gxf_sc[pl.ds(tf * BP, BP), :]
                     + gxb_sc[pl.ds(tb * BP, BP), :]
                     + gr)                                               # (BP, 8H)
            # gate columns: [i_f,i_b | f_f,f_b | o_f,o_b | g_f,g_b]
            sig = jax.nn.sigmoid(g_all[:, 0:H6])                         # i, f, o
            g_gate = jnp.tanh(g_all[:, H6:H8])                           # g (cell in)
            i_all = sig[:, 0:H2]
            f_all = sig[:, H2:H4]
            o_all = sig[:, H4:H6]
            c_cat = f_all * c_cat + i_all * g_gate
            h_cat = o_all * jnp.tanh(c_cat)
            hcat_steps[s] = h_cat

        # ---- assemble layer output once, time-major, [fwd | bwd] lanes -----
        # output[t] = fwd half from step s=t, bwd half from step s=T-1-t
        for t in range(T):
            out_t = (hcat_steps[t] * hmask
                     + hcat_steps[T - 1 - t] * (1.0 - hmask))            # (BP, 2H)
            act_sc[pl.ds(t * BP, BP), :] = out_t
        cur = act_sc[...]                                                # (T*BP, 2H)
        # dropout between LSTM layers: identity (eval mode)

    lo = cur                                                             # (T*BP, 2H)

    # ---- attention: scores, softmax over time, context ---------------------
    e = jnp.tanh(jnp.dot(lo, aw1_ref[...], preferred_element_type=f32)
                 + ab1_ref[...])                                         # (T*BP, H)
    s_all = (jnp.sum(e * aw2_ref[...], axis=1, keepdims=True)
             + ab2_ref[...])                                             # (T*BP, 1)

    s_list = [s_all[t * BP:(t + 1) * BP, :] for t in range(T)]           # (BP,1) each
    m = s_list[0]
    for t in range(1, T):
        m = jnp.maximum(m, s_list[t])
    p_list = [jnp.exp(s_list[t] - m) for t in range(T)]
    denom = p_list[0]
    for t in range(1, T):
        denom = denom + p_list[t]
    inv = 1.0 / denom                                                    # (BP, 1)

    ctx = jnp.zeros((BP, H2), f32)
    for t in range(T):
        w_t = p_list[t] * inv                                            # (BP, 1)
        ctx = ctx + w_t * lo[t * BP:(t + 1) * BP, :]
        attn_ref[:, t:t + 1] = w_t[0:B, :]

    # ---- fc head (BatchNorm folded into Linear; dropout = identity) --------
    h1 = jnp.maximum(jnp.dot(ctx, fw1_ref[...], preferred_element_type=f32)
                     + fb1_ref[...], 0.0)
    h2 = jnp.maximum(jnp.dot(h1, fw2_ref[...], preferred_element_type=f32)
                     + fb2_ref[...], 0.0)
    logits = (jnp.dot(h2, fw3_ref[...], preferred_element_type=f32)
              + fb3_ref[...])                                            # (BP, C)
    logits_ref[...] = logits[0:B, :]


def fused_forward(x2d, params, *, B, BP, T, H):
    lstm_flat = []
    for (wih, b, whh) in params["lstm"]:
        lstm_flat.extend([wih, b, whh])
    aw1, ab1, aw2, ab2 = params["attn"]
    fc = list(params["fc"])
    inputs = [x2d, params["dirmask"]] + lstm_flat + [aw1, ab1, aw2, ab2] + fc
    num_layers = len(params["lstm"])
    num_classes = fc[4].shape[1]
    kernel = functools.partial(_fused_lstm_kernel, T=T, BP=BP, B=B, H=H,
                               num_layers=num_layers)
    return pl.pallas_call(
        kernel,
        out_shape=(jax.ShapeDtypeStruct((B, num_classes), jnp.float32),
                   jax.ShapeDtypeStruct((B, T), jnp.float32)),
        in_specs=[_VMEM_SPEC] * len(inputs),
        out_specs=(_VMEM_SPEC, _VMEM_SPEC),
        scratch_shapes=[
            pltpu.VMEM((T * BP, 8 * H), jnp.float32),   # fwd-column gate inputs
            pltpu.VMEM((T * BP, 8 * H), jnp.float32),   # bwd-column gate inputs
            pltpu.VMEM((T * BP, 2 * H), jnp.float32),   # layer output slab
        ],
    )(*inputs)


# ----------------------------------------------------------------------------
# Parameter construction (deterministic) + full forward.
# ----------------------------------------------------------------------------
def _uniform(key, shape, k):
    return jax.random.uniform(key, shape, jnp.float32, -k, k)


def _lstm_layer_params(key, D, H):
    """Build one bidirectional layer in the kernel's fused layout."""
    k = 1.0 / jnp.sqrt(jnp.float32(H))
    dirs = []
    for _ in range(2):  # fwd, bwd
        key, k1, k2, k3, k4 = jax.random.split(key, 5)
        w_ih = _uniform(k1, (4 * H, D), k)               # PyTorch layout (4H, D)
        w_hh = _uniform(k2, (4 * H, H), k)
        b = _uniform(k3, (4 * H,), k) + _uniform(k4, (4 * H,), k)   # b_ih + b_hh
        dirs.append((jnp.split(w_ih, 4, axis=0),         # (i, f, g, o) blocks
                     jnp.split(w_hh, 4, axis=0),
                     jnp.split(b, 4)))
    (wi_f, wh_f, b_f), (wi_b, wh_b, b_b) = dirs

    # Column layout: gate-major / direction-minor, gate order (i, f, o, g).
    order = [0, 1, 3, 2]          # pick i, f, o, g out of PyTorch's (i, f, g, o)
    zH = jnp.zeros((H, H), jnp.float32)
    wih_cols, whh_cols, b_cols = [], [], []
    for g in order:
        wih_cols += [wi_f[g].T, wi_b[g].T]                               # (D, H)
        whh_cols += [jnp.concatenate([wh_f[g].T, zH], axis=0),           # (2H, H)
                     jnp.concatenate([zH, wh_b[g].T], axis=0)]
        b_cols += [b_f[g], b_b[g]]
    wih_both = jnp.concatenate(wih_cols, axis=1)                         # (D, 8H)
    whh_bd = jnp.concatenate(whh_cols, axis=1)                           # (2H, 8H)
    bias_both = jnp.concatenate(b_cols).reshape(1, 8 * H)                # (1, 8H)
    return key, (wih_both, bias_both, whh_bd)


def init_params(key, input_size, hidden_size, num_layers, num_classes):
    H = hidden_size
    params = {"lstm": []}
    for layer in range(num_layers):
        D = input_size if layer == 0 else 2 * H
        key, layer_p = _lstm_layer_params(key, D, H)
        params["lstm"].append(layer_p)

    # forward-direction column mask (shared by all layers)
    params["dirmask"] = jnp.tile(
        jnp.concatenate([jnp.ones((1, H), jnp.float32),
                         jnp.zeros((1, H), jnp.float32)], axis=1), (1, 4))  # (1, 8H)

    # attention: Linear(2H -> H), Tanh, Linear(H -> 1)
    key, k1, k2, k3, k4 = jax.random.split(key, 5)
    ka = 1.0 / jnp.sqrt(jnp.float32(2 * H))
    kb = 1.0 / jnp.sqrt(jnp.float32(H))
    params["attn"] = (
        _uniform(k1, (H, 2 * H), ka).T,                  # (2H, H)
        _uniform(k2, (H,), ka).reshape(1, H),            # (1, H)
        _uniform(k3, (1, H), kb),                        # row (1, H)
        _uniform(k4, (1,), kb).reshape(1, 1),            # (1, 1)
    )

    # fc head: Linear(2H->H)+BN+ReLU+Drop, Linear(H->H/2)+BN+ReLU+Drop, Linear(H/2->C)
    H2 = H // 2
    eps = 1e-5
    key, k1, k2, k3, k4, k5, k6 = jax.random.split(key, 7)
    w1 = _uniform(k1, (H, 2 * H), 1.0 / jnp.sqrt(jnp.float32(2 * H)))
    b1 = _uniform(k2, (H,), 1.0 / jnp.sqrt(jnp.float32(2 * H)))
    w2 = _uniform(k3, (H2, H), 1.0 / jnp.sqrt(jnp.float32(H)))
    b2 = _uniform(k4, (H2,), 1.0 / jnp.sqrt(jnp.float32(H)))
    w3 = _uniform(k5, (num_classes, H2), 1.0 / jnp.sqrt(jnp.float32(H2)))
    b3 = _uniform(k6, (num_classes,), 1.0 / jnp.sqrt(jnp.float32(H2)))

    # fold eval-mode BatchNorm (gamma=1, beta=0, running_mean=0, running_var=1)
    def fold_bn(w, b, gamma, beta, rmean, rvar):
        scale = gamma / jnp.sqrt(rvar + eps)
        return w * scale[:, None], (b - rmean) * scale + beta

    w1f, b1f = fold_bn(w1, b1, jnp.ones(H), jnp.zeros(H), jnp.zeros(H), jnp.ones(H))
    w2f, b2f = fold_bn(w2, b2, jnp.ones(H2), jnp.zeros(H2), jnp.zeros(H2), jnp.ones(H2))
    params["fc"] = (w1f.T, b1f.reshape(1, H),
                    w2f.T, b2f.reshape(1, H2),
                    w3.T, b3.reshape(1, num_classes))
    return params


def lstm_model_forward(x, params, hidden_size):
    """x: (B, T, input_size) -> (logits (B, num_classes), attn weights (B, T, 1))."""
    B, T, _ = x.shape
    H = hidden_size
    BP = max(8, ((B + 7) // 8) * 8)           # pad batch to the 8-sublane tile
    x_tm = jnp.transpose(x, (1, 0, 2))        # (T, B, D) time-major (tiny, input only)
    if BP != B:
        x_tm = jnp.pad(x_tm, ((0, 0), (0, BP - B), (0, 0)))
    x2d = x_tm.reshape(T * BP, -1)
    logits, attn_bt = fused_forward(x2d, params, B=B, BP=BP, T=T, H=H)
    return logits, attn_bt[:, :, None]        # (B, C), (B, T, 1)


if __name__ == "__main__":
    input_size = 16
    hidden_size = 32
    num_layers = 2
    num_classes = 2
    batch, seq = 2, 8

    key = jax.random.PRNGKey(0)
    key, pkey, xkey = jax.random.split(key, 3)
    params = init_params(pkey, input_size, hidden_size, num_layers, num_classes)
    x = jax.random.normal(xkey, (batch, seq, input_size), jnp.float32)

    fwd = jax.jit(functools.partial(lstm_model_forward, hidden_size=hidden_size))
    logits, attn = fwd(x, params)
    jax.block_until_ready((logits, attn))

    assert logits.shape == (batch, num_classes)
    assert attn.shape == (batch, seq, 1)
    print("KERNEL_OK")
</pallas_src>

<mosaic_0001>
module attributes {stable_mosaic.version = 11 : i64} {
  func.func @_fused_lstm_kernel(%arg0: memref<64x16xf32, #tpu.memory_space<vmem>>, %arg1: memref<1x256xf32, #tpu.memory_space<vmem>>, %arg2: memref<16x256xf32, #tpu.memory_space<vmem>>, %arg3: memref<1x256xf32, #tpu.memory_space<vmem>>, %arg4: memref<64x256xf32, #tpu.memory_space<vmem>>, %arg5: memref<64x256xf32, #tpu.memory_space<vmem>>, %arg6: memref<1x256xf32, #tpu.memory_space<vmem>>, %arg7: memref<64x256xf32, #tpu.memory_space<vmem>>, %arg8: memref<64x32xf32, #tpu.memory_space<vmem>>, %arg9: memref<1x32xf32, #tpu.memory_space<vmem>>, %arg10: memref<1x32xf32, #tpu.memory_space<vmem>>, %arg11: memref<1x1xf32, #tpu.memory_space<vmem>>, %arg12: memref<64x32xf32, #tpu.memory_space<vmem>>, %arg13: memref<1x32xf32, #tpu.memory_space<vmem>>, %arg14: memref<32x16xf32, #tpu.memory_space<vmem>>, %arg15: memref<1x16xf32, #tpu.memory_space<vmem>>, %arg16: memref<16x2xf32, #tpu.memory_space<vmem>>, %arg17: memref<1x2xf32, #tpu.memory_space<vmem>>, %arg18: memref<2x2xf32, #tpu.memory_space<vmem>>, %arg19: memref<2x8xf32, #tpu.memory_space<vmem>>, %arg20: memref<64x256xf32, #tpu.memory_space<vmem>>, %arg21: memref<64x256xf32, #tpu.memory_space<vmem>>, %arg22: memref<64x64xf32, #tpu.memory_space<vmem>>) attributes {dimension_semantics = [], scalar_prefetch = 0 : i64, scratch_operands = 3 : i64, tpu.core_type = #tpu.core_type<tc>} {
    %c0 = arith.constant 0 : index
    %c0_0 = arith.constant 0 : index
    %0 = vector.load %arg1[%c0, %c0_0] : memref<1x256xf32, #tpu.memory_space<vmem>>, vector<1x256xf32>
    %1 = vector.extract_strided_slice %0 {offsets = [0, 0], sizes = [1, 64], strides = [1, 1]} : vector<1x256xf32> to vector<1x64xf32>
    %c0_1 = arith.constant 0 : index
    %c0_2 = arith.constant 0 : index
    %2 = vector.load %arg0[%c0_1, %c0_2] : memref<64x16xf32, #tpu.memory_space<vmem>>, vector<64x16xf32>
    %c0_3 = arith.constant 0 : index
    %c0_4 = arith.constant 0 : index
    %3 = vector.load %arg2[%c0_3, %c0_4] : memref<16x256xf32, #tpu.memory_space<vmem>>, vector<16x256xf32>
    %cst = arith.constant dense<0.000000e+00> : vector<64x256xf32>
    %4 = tpu.matmul %2, %3, %cst {dimension_numbers = #tpu.dot_dimension_numbers<[1], [0], [0], [1], [0, 0, 1, 1], [], []>} : vector<64x16xf32>, vector<16x256xf32>, vector<64x256xf32> -> vector<64x256xf32>
    %c0_5 = arith.constant 0 : index
    %c0_6 = arith.constant 0 : index
    %5 = vector.load %arg3[%c0_5, %c0_6] : memref<1x256xf32, #tpu.memory_space<vmem>>, vector<1x256xf32>
    %6 = vector.broadcast %5 : vector<1x256xf32> to vector<64x256xf32>
    %7 = arith.addf %4, %6 : vector<64x256xf32>
    %8 = vector.broadcast %0 : vector<1x256xf32> to vector<64x256xf32>
    %9 = arith.mulf %7, %8 : vector<64x256xf32>
    %c0_7 = arith.constant 0 : index
    %c0_8 = arith.constant 0 : index
    %10 = vector.load %arg20[%c0_7, %c0_8] : memref<64x256xf32, #tpu.memory_space<vmem>>, vector<64x256xf32>
    tpu.vector_store %arg20[%c0_7, %c0_8], %9 {strides = array<i32>} : memref<64x256xf32, #tpu.memory_space<vmem>>, vector<64x256xf32>,
    %11 = vector.broadcast %0 : vector<1x256xf32> to vector<64x256xf32>
    %12 = arith.mulf %7, %11 : vector<64x256xf32>
    %13 = arith.subf %7, %12 : vector<64x256xf32>
    %c0_9 = arith.constant 0 : index
    %c0_10 = arith.constant 0 : index
    %14 = vector.load %arg21[%c0_9, %c0_10] : memref<64x256xf32, #tpu.memory_space<vmem>>, vector<64x256xf32>
    tpu.vector_store %arg21[%c0_9, %c0_10], %13 {strides = array<i32>} : memref<64x256xf32, #tpu.memory_space<vmem>>, vector<64x256xf32>,
    %c0_11 = arith.constant 0 : index
    %c0_12 = arith.constant 0 : index
    %15 = vector.load %arg4[%c0_11, %c0_12] : memref<64x256xf32, #tpu.memory_space<vmem>>, vector<64x256xf32>
    %cst_13 = arith.constant 0.000000e+00 : f32
    %16 = vector.broadcast %cst_13 : f32 to vector<8x64xf32>
    %cst_14 = arith.constant 0.000000e+00 : f32
    %17 = vector.broadcast %cst_14 : f32 to vector<8x64xf32>
    %cst_15 = arith.constant dense<0.000000e+00> : vector<8x256xf32>
    %18 = tpu.matmul %16, %15, %cst_15 {dimension_numbers = #tpu.dot_dimension_numbers<[1], [0], [0], [1], [0, 0, 1, 1], [], []>} : vector<8x64xf32>, vector<64x256xf32>, vector<8x256xf32> -> vector<8x256xf32>
    %c0_16 = arith.constant 0 : index
    %c0_17 = arith.constant 0 : index
    %19 = vector.load %arg20[%c0_16, %c0_17] : memref<64x256xf32, #tpu.memory_space<vmem>>, vector<8x256xf32>
    %c56 = arith.constant 56 : index
    %c0_18 = arith.constant 0 : index
    %20 = vector.load %arg21[%c56, %c0_18] : memref<64x256xf32, #tpu.memory_space<vmem>>, vector<8x256xf32>
    %21 = arith.addf %19, %20 : vector<8x256xf32>
    %22 = arith.addf %21, %18 : vector<8x256xf32>
    %23 = vector.extract_strided_slice %22 {offsets = [0, 0], sizes = [8, 192], strides = [1, 1]} : vector<8x256xf32> to vector<8x192xf32>
    %24 = arith.negf %23 : vector<8x192xf32>
    %25 = math.exp %24 : vector<8x192xf32>
    %cst_19 = arith.constant 1.000000e+00 : f32
    %26 = vector.broadcast %cst_19 : f32 to vector<8x192xf32>
    %27 = arith.addf %26, %25 : vector<8x192xf32>
    %28 = arith.divf %26, %27 : vector<8x192xf32>
    %29 = vector.extract_strided_slice %22 {offsets = [0, 192], sizes = [8, 64], strides = [1, 1]} : vector<8x256xf32> to vector<8x64xf32>
    %30 = math.tanh %29 : vector<8x64xf32>
    %31 = vector.extract_strided_slice %28 {offsets = [0, 0], sizes = [8, 64], strides = [1, 1]} : vector<8x192xf32> to vector<8x64xf32>
    %32 = vector.extract_strided_slice %28 {offsets = [0, 64], sizes = [8, 64], strides = [1, 1]} : vector<8x192xf32> to vector<8x64xf32>
    %33 = vector.extract_strided_slice %28 {offsets = [0, 128], sizes = [8, 64], strides = [1, 1]} : vector<8x192xf32> to vector<8x64xf32>
    %34 = arith.mulf %32, %17 : vector<8x64xf32>
    %35 = arith.mulf %31, %30 : vector<8x64xf32>
    %36 = arith.addf %34, %35 : vector<8x64xf32>
    %37 = math.tanh %36 : vector<8x64xf32>
    %38 = arith.mulf %33, %37 : vector<8x64xf32>
    %cst_20 = arith.constant dense<0.000000e+00> : vector<8x256xf32>
    %39 = tpu.matmul %38, %15, %cst_20 {dimension_numbers = #tpu.dot_dimension_numbers<[1], [0], [0], [1], [0, 0, 1, 1], [], []>} : vector<8x64xf32>, vector<64x256xf32>, vector<8x256xf32> -> vector<8x256xf32>
    %c8 = arith.constant 8 : index
    %c0_21 = arith.constant 0 : index
    %40 = vector.load %arg20[%c8, %c0_21] : memref<64x256xf32, #tpu.memory_space<vmem>>, vector<8x256xf32>
    %c48 = arith.constant 48 : index
    %c0_22 = arith.constant 0 : index
    %41 = vector.load %arg21[%c48, %c0_22] : memref<64x256xf32, #tpu.memory_space<vmem>>, vector<8x256xf32>
    %42 = arith.addf %40, %41 : vector<8x256xf32>
    %43 = arith.addf %42, %39 : vector<8x256xf32>
    %44 = vector.extract_strided_slice %43 {offsets = [0, 0], sizes = [8, 192], strides = [1, 1]} : vector<8x256xf32> to vector<8x192xf32>
    %45 = arith.negf %44 : vector<8x192xf32>
    %46 = math.exp %45 : vector<8x192xf32>
    %cst_23 = arith.constant 1.000000e+00 : f32
    %47 = vector.broadcast %cst_23 : f32 to vector<8x192xf32>
    %48 = arith.addf %47, %46 : vector<8x192xf32>
    %49 = arith.divf %47, %48 : vector<8x192xf32>
    %50 = vector.extract_strided_slice %43 {offsets = [0, 192], sizes = [8, 64], strides = [1, 1]} : vector<8x256xf32> to vector<8x64xf32>
    %51 = math.tanh %50 : vector<8x64xf32>
    %52 = vector.extract_strided_slice %49 {offsets = [0, 0], sizes = [8, 64], strides = [1, 1]} : vector<8x192xf32> to vector<8x64xf32>
    %53 = vector.extract_strided_slice %49 {offsets = [0, 64], sizes = [8, 64], strides = [1, 1]} : vector<8x192xf32> to vector<8x64xf32>
    %54 = vector.extract_strided_slice %49 {offsets = [0, 128], sizes = [8, 64], strides = [1, 1]} : vector<8x192xf32> to vector<8x64xf32>
    %55 = arith.mulf %53, %36 : vector<8x64xf32>
    %56 = arith.mulf %52, %51 : vector<8x64xf32>
    %57 = arith.addf %55, %56 : vector<8x64xf32>
    %58 = math.tanh %57 : vector<8x64xf32>
    %59 = arith.mulf %54, %58 : vector<8x64xf32>
    %cst_24 = arith.constant dense<0.000000e+00> : vector<8x256xf32>
    %60 = tpu.matmul %59, %15, %cst_24 {dimension_numbers = #tpu.dot_dimension_numbers<[1], [0], [0], [1], [0, 0, 1, 1], [], []>} : vector<8x64xf32>, vector<64x256xf32>, vector<8x256xf32> -> vector<8x256xf32>
    %c16 = arith.constant 16 : index
    %c0_25 = arith.constant 0 : index
    %61 = vector.load %arg20[%c16, %c0_25] : memref<64x256xf32, #tpu.memory_space<vmem>>, vector<8x256xf32>
    %c40 = arith.constant 40 : index
    %c0_26 = arith.constant 0 : index
    %62 = vector.load %arg21[%c40, %c0_26] : memref<64x256xf32, #tpu.memory_space<vmem>>, vector<8x256xf32>
    %63 = arith.addf %61, %62 : vector<8x256xf32>
    %64 = arith.addf %63, %60 : vector<8x256xf32>
    %65 = vector.extract_strided_slice %64 {offsets = [0, 0], sizes = [8, 192], strides = [1, 1]} : vector<8x256xf32> to vector<8x192xf32>
    %66 = arith.negf %65 : vector<8x192xf32>
    %67 = math.exp %66 : vector<8x192xf32>
    %cst_27 = arith.constant 1.000000e+00 : f32
    %68 = vector.broadcast %cst_27 : f32 to vector<8x192xf32>
    %69 = arith.addf %68, %67 : vector<8x192xf32>
    %70 = arith.divf %68, %69 : vector<8x192xf32>
    %71 = vector.extract_strided_slice %64 {offsets = [0, 192], sizes = [8, 64], strides = [1, 1]} : vector<8x256xf32> to vector<8x64xf32>
    %72 = math.tanh %71 : vector<8x64xf32>
    %73 = vector.extract_strided_slice %70 {offsets = [0, 0], sizes = [8, 64], strides = [1, 1]} : vector<8x192xf32> to vector<8x64xf32>
    %74 = vector.extract_strided_slice %70 {offsets = [0, 64], sizes = [8, 64], strides = [1, 1]} : vector<8x192xf32> to vector<8x64xf32>
    %75 = vector.extract_strided_slice %70 {offsets = [0, 128], sizes = [8, 64], strides = [1, 1]} : vector<8x192xf32> to vector<8x64xf32>
    %76 = arith.mulf %74, %57 : vector<8x64xf32>
    %77 = arith.mulf %73, %72 : vector<8x64xf32>
    %78 = arith.addf %76, %77 : vector<8x64xf32>
    %79 = math.tanh %78 : vector<8x64xf32>
    %80 = arith.mulf %75, %79 : vector<8x64xf32>
    %cst_28 = arith.constant dense<0.000000e+00> : vector<8x256xf32>
    %81 = tpu.matmul %80, %15, %cst_28 {dimension_numbers = #tpu.dot_dimension_numbers<[1], [0], [0], [1], [0, 0, 1, 1], [], []>} : vector<8x64xf32>, vector<64x256xf32>, vector<8x256xf32> -> vector<8x256xf32>
    %c24 = arith.constant 24 : index
    %c0_29 = arith.constant 0 : index
    %82 = vector.load %arg20[%c24, %c0_29] : memref<64x256xf32, #tpu.memory_space<vmem>>, vector<8x256xf32>
    %c32 = arith.constant 32 : index
    %c0_30 = arith.constant 0 : index
    %83 = vector.load %arg21[%c32, %c0_30] : memref<64x256xf32, #tpu.memory_space<vmem>>, vector<8x256xf32>
    %84 = arith.addf %82, %83 : vector<8x256xf32>
    %85 = arith.addf %84, %81 : vector<8x256xf32>
    %86 = vector.extract_strided_slice %85 {offsets = [0, 0], sizes = [8, 192], strides = [1, 1]} : vector<8x256xf32> to vector<8x192xf32>
    %87 = arith.negf %86 : vector<8x192xf32>
    %88 = math.exp %87 : vector<8x192xf32>
    %cst_31 = arith.constant 1.000000e+00 : f32
    %89 = vector.broadcast %cst_31 : f32 to vector<8x192xf32>
    %90 = arith.addf %89, %88 : vector<8x192xf32>
    %91 = arith.divf %89, %90 : vector<8x192xf32>
    %92 = vector.extract_strided_slice %85 {offsets = [0, 192], sizes = [8, 64], strides = [1, 1]} : vector<8x256xf32> to vector<8x64xf32>
    %93 = math.tanh %92 : vector<8x64xf32>
    %94 = vector.extract_strided_slice %91 {offsets = [0, 0], sizes = [8, 64], strides = [1, 1]} : vector<8x192xf32> to vector<8x64xf32>
    %95 = vector.extract_strided_slice %91 {offsets = [0, 64], sizes = [8, 64], strides = [1, 1]} : vector<8x192xf32> to vector<8x64xf32>
    %96 = vector.extract_strided_slice %91 {offsets = [0, 128], sizes = [8, 64], strides = [1, 1]} : vector<8x192xf32> to vector<8x64xf32>
    %97 = arith.mulf %95, %78 : vector<8x64xf32>
    %98 = arith.mulf %94, %93 : vector<8x64xf32>
    %99 = arith.addf %97, %98 : vector<8x64xf32>
    %100 = math.tanh %99 : vector<8x64xf32>
    %101 = arith.mulf %96, %100 : vector<8x64xf32>
    %cst_32 = arith.constant dense<0.000000e+00> : vector<8x256xf32>
    %102 = tpu.matmul %101, %15, %cst_32 {dimension_numbers = #tpu.dot_dimension_numbers<[1], [0], [0], [1], [0, 0, 1, 1], [], []>} : vector<8x64xf32>, vector<64x256xf32>, vector<8x256xf32> -> vector<8x256xf32>
    %c32_33 = arith.constant 32 : index
    %c0_34 = arith.constant 0 : index
    %103 = vector.load %arg20[%c32_33, %c0_34] : memref<64x256xf32, #tpu.memory_space<vmem>>, vector<8x256xf32>
    %c24_35 = arith.constant 24 : index
    %c0_36 = arith.constant 0 : index
    %104 = vector.load %arg21[%c24_35, %c0_36] : memref<64x256xf32, #tpu.memory_space<vmem>>, vector<8x256xf32>
    %105 = arith.addf %103, %104 : vector<8x256xf32>
    %106 = arith.addf %105, %102 : vector<8x256xf32>
    %107 = vector.extract_strided_slice %106 {offsets = [0, 0], sizes = [8, 192], strides = [1, 1]} : vector<8x256xf32> to vector<8x192xf32>
    %108 = arith.negf %107 : vector<8x192xf32>
    %109 = math.exp %108 : vector<8x192xf32>
    %cst_37 = arith.constant 1.000000e+00 : f32
    %110 = vector.broadcast %cst_37 : f32 to vector<8x192xf32>
    %111 = arith.addf %110, %109 : vector<8x192xf32>
    %112 = arith.divf %110, %111 : vector<8x192xf32>
    %113 = vector.extract_strided_slice %106 {offsets = [0, 192], sizes = [8, 64], strides = [1, 1]} : vector<8x256xf32> to vector<8x64xf32>
    %114 = math.tanh %113 : vector<8x64xf32>
    %115 = vector.extract_strided_slice %112 {offsets = [0, 0], sizes = [8, 64], strides = [1, 1]} : vector<8x192xf32> to vector<8x64xf32>
    %116 = vector.extract_strided_slice %112 {offsets = [0, 64], sizes = [8, 64], strides = [1, 1]} : vector<8x192xf32> to vector<8x64xf32>
    %117 = vector.extract_strided_slice %112 {offsets = [0, 128], sizes = [8, 64], strides = [1, 1]} : vector<8x192xf32> to vector<8x64xf32>
    %118 = arith.mulf %116, %99 : vector<8x64xf32>
    %119 = arith.mulf %115, %114 : vector<8x64xf32>
    %120 = arith.addf %118, %119 : vector<8x64xf32>
    %121 = math.tanh %120 : vector<8x64xf32>
    %122 = arith.mulf %117, %121 : vector<8x64xf32>
    %cst_38 = arith.constant dense<0.000000e+00> : vector<8x256xf32>
    %123 = tpu.matmul %122, %15, %cst_38 {dimension_numbers = #tpu.dot_dimension_numbers<[1], [0], [0], [1], [0, 0, 1, 1], [], []>} : vector<8x64xf32>, vector<64x256xf32>, vector<8x256xf32> -> vector<8x256xf32>
    %c40_39 = arith.constant 40 : index
    %c0_40 = arith.constant 0 : index
    %124 = vector.load %arg20[%c40_39, %c0_40] : memref<64x256xf32, #tpu.memory_space<vmem>>, vector<8x256xf32>
    %c16_41 = arith.constant 16 : index
    %c0_42 = arith.constant 0 : index
    %125 = vector.load %arg21[%c16_41, %c0_42] : memref<64x256xf32, #tpu.memory_space<vmem>>, vector<8x256xf32>
    %126 = arith.addf %124, %125 : vector<8x256xf32>
    %127 = arith.addf %126, %123 : vector<8x256xf32>
    %128 = vector.extract_strided_slice %127 {offsets = [0, 0], sizes = [8, 192], strides = [1, 1]} : vector<8x256xf32> to vector<8x192xf32>
    %129 = arith.negf %128 : vector<8x192xf32>
    %130 = math.exp %129 : vector<8x192xf32>
    %cst_43 = arith.constant 1.000000e+00 : f32
    %131 = vector.broadcast %cst_43 : f32 to vector<8x192xf32>
    %132 = arith.addf %131, %130 : vector<8x192xf32>
    %133 = arith.divf %131, %132 : vector<8x192xf32>
    %134 = vector.extract_strided_slice %127 {offsets = [0, 192], sizes = [8, 64], strides = [1, 1]} : vector<8x256xf32> to vector<8x64xf32>
    %135 = math.tanh %134 : vector<8x64xf32>
    %136 = vector.extract_strided_slice %133 {offsets = [0, 0], sizes = [8, 64], strides = [1, 1]} : vector<8x192xf32> to vector<8x64xf32>
    %137 = vector.extract_strided_slice %133 {offsets = [0, 64], sizes = [8, 64], strides = [1, 1]} : vector<8x192xf32> to vector<8x64xf32>
    %138 = vector.extract_strided_slice %133 {offsets = [0, 128], sizes = [8, 64], strides = [1, 1]} : vector<8x192xf32> to vector<8x64xf32>
    %139 = arith.mulf %137, %120 : vector<8x64xf32>
    %140 = arith.mulf %136, %135 : vector<8x64xf32>
    %141 = arith.addf %139, %140 : vector<8x64xf32>
    %142 = math.tanh %141 : vector<8x64xf32>
    %143 = arith.mulf %138, %142 : vector<8x64xf32>
    %cst_44 = arith.constant dense<0.000000e+00> : vector<8x256xf32>
    %144 = tpu.matmul %143, %15, %cst_44 {dimension_numbers = #tpu.dot_dimension_numbers<[1], [0], [0], [1], [0, 0, 1, 1], [], []>} : vector<8x64xf32>, vector<64x256xf32>, vector<8x256xf32> -> vector<8x256xf32>
    %c48_45 = arith.constant 48 : index
    %c0_46 = arith.constant 0 : index
    %145 = vector.load %arg20[%c48_45, %c0_46] : memref<64x256xf32, #tpu.memory_space<vmem>>, vector<8x256xf32>
    %c8_47 = arith.constant 8 : index
    %c0_48 = arith.constant 0 : index
    %146 = vector.load %arg21[%c8_47, %c0_48] : memref<64x256xf32, #tpu.memory_space<vmem>>, vector<8x256xf32>
    %147 = arith.addf %145, %146 : vector<8x256xf32>
    %148 = arith.addf %147, %144 : vector<8x256xf32>
    %149 = vector.extract_strided_slice %148 {offsets = [0, 0], sizes = [8, 192], strides = [1, 1]} : vector<8x256xf32> to vector<8x192xf32>
    %150 = arith.negf %149 : vector<8x192xf32>
    %151 = math.exp %150 : vector<8x192xf32>
    %cst_49 = arith.constant 1.000000e+00 : f32
    %152 = vector.broadcast %cst_49 : f32 to vector<8x192xf32>
    %153 = arith.addf %152, %151 : vector<8x192xf32>
    %154 = arith.divf %152, %153 : vector<8x192xf32>
    %155 = vector.extract_strided_slice %148 {offsets = [0, 192], sizes = [8, 64], strides = [1, 1]} : vector<8x256xf32> to vector<8x64xf32>
    %156 = math.tanh %155 : vector<8x64xf32>
    %157 = vector.extract_strided_slice %154 {offsets = [0, 0], sizes = [8, 64], strides = [1, 1]} : vector<8x192xf32> to vector<8x64xf32>
    %158 = vector.extract_strided_slice %154 {offsets = [0, 64], sizes = [8, 64], strides = [1, 1]} : vector<8x192xf32> to vector<8x64xf32>
    %159 = vector.extract_strided_slice %154 {offsets = [0, 128], sizes = [8, 64], strides = [1, 1]} : vector<8x192xf32> to vector<8x64xf32>
    %160 = arith.mulf %158, %141 : vector<8x64xf32>
    %161 = arith.mulf %157, %156 : vector<8x64xf32>
    %162 = arith.addf %160, %161 : vector<8x64xf32>
    %163 = math.tanh %162 : vector<8x64xf32>
    %164 = arith.mulf %159, %163 : vector<8x64xf32>
    %cst_50 = arith.constant dense<0.000000e+00> : vector<8x256xf32>
    %165 = tpu.matmul %164, %15, %cst_50 {dimension_numbers = #tpu.dot_dimension_numbers<[1], [0], [0], [1], [0, 0, 1, 1], [], []>} : vector<8x64xf32>, vector<64x256xf32>, vector<8x256xf32> -> vector<8x256xf32>
    %c56_51 = arith.constant 56 : index
    %c0_52 = arith.constant 0 : index
    %166 = vector.load %arg20[%c56_51, %c0_52] : memref<64x256xf32, #tpu.memory_space<vmem>>, vector<8x256xf32>
    %c0_53 = arith.constant 0 : index
    %c0_54 = arith.constant 0 : index
    %167 = vector.load %arg21[%c0_53, %c0_54] : memref<64x256xf32, #tpu.memory_space<vmem>>, vector<8x256xf32>
    %168 = arith.addf %166, %167 : vector<8x256xf32>
    %169 = arith.addf %168, %165 : vector<8x256xf32>
    %170 = vector.extract_strided_slice %169 {offsets = [0, 0], sizes = [8, 192], strides = [1, 1]} : vector<8x256xf32> to vector<8x192xf32>
    %171 = arith.negf %170 : vector<8x192xf32>
    %172 = math.exp %171 : vector<8x192xf32>
    %cst_55 = arith.constant 1.000000e+00 : f32
    %173 = vector.broadcast %cst_55 : f32 to vector<8x192xf32>
    %174 = arith.addf %173, %172 : vector<8x192xf32>
    %175 = arith.divf %173, %174 : vector<8x192xf32>
    %176 = vector.extract_strided_slice %169 {offsets = [0, 192], sizes = [8, 64], strides = [1, 1]} : vector<8x256xf32> to vector<8x64xf32>
    %177 = math.tanh %176 : vector<8x64xf32>
    %178 = vector.extract_strided_slice %175 {offsets = [0, 0], sizes = [8, 64], strides = [1, 1]} : vector<8x192xf32> to vector<8x64xf32>
    %179 = vector.extract_strided_slice %175 {offsets = [0, 64], sizes = [8, 64], strides = [1, 1]} : vector<8x192xf32> to vector<8x64xf32>
    %180 = vector.extract_strided_slice %175 {offsets = [0, 128], sizes = [8, 64], strides = [1, 1]} : vector<8x192xf32> to vector<8x64xf32>
    %181 = arith.mulf %179, %162 : vector<8x64xf32>
    %182 = arith.mulf %178, %177 : vector<8x64xf32>
    %183 = arith.addf %181, %182 : vector<8x64xf32>
    %184 = math.tanh %183 : vector<8x64xf32>
    %185 = arith.mulf %180, %184 : vector<8x64xf32>
    %186 = vector.broadcast %1 : vector<1x64xf32> to vector<8x64xf32>
    %187 = arith.mulf %38, %186 : vector<8x64xf32>
    %cst_56 = arith.constant 1.000000e+00 : f32
    %188 = vector.broadcast %cst_56 : f32 to vector<1x64xf32>
    %189 = arith.subf %188, %1 : vector<1x64xf32>
    %190 = vector.broadcast %189 : vector<1x64xf32> to vector<8x64xf32>
    %191 = arith.mulf %185, %190 : vector<8x64xf32>
    %192 = arith.addf %187, %191 : vector<8x64xf32>
    %c0_57 = arith.constant 0 : index
    %c0_58 = arith.constant 0 : index
    %193 = vector.load %arg22[%c0_57, %c0_58] : memref<64x64xf32, #tpu.memory_space<vmem>>, vector<8x64xf32>
    tpu.vector_store %arg22[%c0_57, %c0_58], %192 {strides = array<i32>} : memref<64x64xf32, #tpu.memory_space<vmem>>, vector<8x64xf32>,
    %194 = vector.broadcast %1 : vector<1x64xf32> to vector<8x64xf32>
    %195 = arith.mulf %59, %194 : vector<8x64xf32>
    %cst_59 = arith.constant 1.000000e+00 : f32
    %196 = vector.broadcast %cst_59 : f32 to vector<1x64xf32>
    %197 = arith.subf %196, %1 : vector<1x64xf32>
    %198 = vector.broadcast %197 : vector<1x64xf32> to vector<8x64xf32>
    %199 = arith.mulf %164, %198 : vector<8x64xf32>
    %200 = arith.addf %195, %199 : vector<8x64xf32>
    %c8_60 = arith.constant 8 : index
    %c0_61 = arith.constant 0 : index
    %201 = vector.load %arg22[%c8_60, %c0_61] : memref<64x64xf32, #tpu.memory_space<vmem>>, vector<8x64xf32>
    tpu.vector_store %arg22[%c8_60, %c0_61], %200 {strides = array<i32>} : memref<64x64xf32, #tpu.memory_space<vmem>>, vector<8x64xf32>,
    %202 = vector.broadcast %1 : vector<1x64xf32> to vector<8x64xf32>
    %203 = arith.mulf %80, %202 : vector<8x64xf32>
    %cst_62 = arith.constant 1.000000e+00 : f32
    %204 = vector.broadcast %cst_62 : f32 to vector<1x64xf32>
    %205 = arith.subf %204, %1 : vector<1x64xf32>
    %206 = vector.broadcast %205 : vector<1x64xf32> to vector<8x64xf32>
    %207 = arith.mulf %143, %206 : vector<8x64xf32>
    %208 = arith.addf %203, %207 : vector<8x64xf32>
    %c16_63 = arith.constant 16 : index
    %c0_64 = arith.constant 0 : index
    %209 = vector.load %arg22[%c16_63, %c0_64] : memref<64x64xf32, #tpu.memory_space<vmem>>, vector<8x64xf32>
    tpu.vector_store %arg22[%c16_63, %c0_64], %208 {strides = array<i32>} : memref<64x64xf32, #tpu.memory_space<vmem>>, vector<8x64xf32>,
    %210 = vector.broadcast %1 : vector<1x64xf32> to vector<8x64xf32>
    %211 = arith.mulf %101, %210 : vector<8x64xf32>
    %cst_65 = arith.constant 1.000000e+00 : f32
    %212 = vector.broadcast %cst_65 : f32 to vector<1x64xf32>
    %213 = arith.subf %212, %1 : vector<1x64xf32>
    %214 = vector.broadcast %213 : vector<1x64xf32> to vector<8x64xf32>
    %215 = arith.mulf %122, %214 : vector<8x64xf32>
    %216 = arith.addf %211, %215 : vector<8x64xf32>
    %c24_66 = arith.constant 24 : index
    %c0_67 = arith.constant 0 : index
    %217 = vector.load %arg22[%c24_66, %c0_67] : memref<64x64xf32, #tpu.memory_space<vmem>>, vector<8x64xf32>
    tpu.vector_store %arg22[%c24_66, %c0_67], %216 {strides = array<i32>} : memref<64x64xf32, #tpu.memory_space<vmem>>, vector<8x64xf32>,
    %218 = vector.broadcast %1 : vector<1x64xf32> to vector<8x64xf32>
    %219 = arith.mulf %122, %218 : vector<8x64xf32>
    %cst_68 = arith.constant 1.000000e+00 : f32
    %220 = vector.broadcast %cst_68 : f32 to vector<1x64xf32>
    %221 = arith.subf %220, %1 : vector<1x64xf32>
    %222 = vector.broadcast %221 : vector<1x64xf32> to vector<8x64xf32>
    %223 = arith.mulf %101, %222 : vector<8x64xf32>
    %224 = arith.addf %219, %223 : vector<8x64xf32>
    %c32_69 = arith.constant 32 : index
    %c0_70 = arith.constant 0 : index
    %225 = vector.load %arg22[%c32_69, %c0_70] : memref<64x64xf32, #tpu.memory_space<vmem>>, vector<8x64xf32>
    tpu.vector_store %arg22[%c32_69, %c0_70], %224 {strides = array<i32>} : memref<64x64xf32, #tpu.memory_space<vmem>>, vector<8x64xf32>,
    %226 = vector.broadcast %1 : vector<1x64xf32> to vector<8x64xf32>
    %227 = arith.mulf %143, %226 : vector<8x64xf32>
    %cst_71 = arith.constant 1.000000e+00 : f32
    %228 = vector.broadcast %cst_71 : f32 to vector<1x64xf32>
    %229 = arith.subf %228, %1 : vector<1x64xf32>
    %230 = vector.broadcast %229 : vector<1x64xf32> to vector<8x64xf32>
    %231 = arith.mulf %80, %230 : vector<8x64xf32>
    %232 = arith.addf %227, %231 : vector<8x64xf32>
    %c40_72 = arith.constant 40 : index
    %c0_73 = arith.constant 0 : index
    %233 = vector.load %arg22[%c40_72, %c0_73] : memref<64x64xf32, #tpu.memory_space<vmem>>, vector<8x64xf32>
    tpu.vector_store %arg22[%c40_72, %c0_73], %232 {strides = array<i32>} : memref<64x64xf32, #tpu.memory_space<vmem>>, vector<8x64xf32>,
    %234 = vector.broadcast %1 : vector<1x64xf32> to vector<8x64xf32>
    %235 = arith.mulf %164, %234 : vector<8x64xf32>
    %cst_74 = arith.constant 1.000000e+00 : f32
    %236 = vector.broadcast %cst_74 : f32 to vector<1x64xf32>
    %237 = arith.subf %236, %1 : vector<1x64xf32>
    %238 = vector.broadcast %237 : vector<1x64xf32> to vector<8x64xf32>
    %239 = arith.mulf %59, %238 : vector<8x64xf32>
    %240 = arith.addf %235, %239 : vector<8x64xf32>
    %c48_75 = arith.constant 48 : index
    %c0_76 = arith.constant 0 : index
    %241 = vector.load %arg22[%c48_75, %c0_76] : memref<64x64xf32, #tpu.memory_space<vmem>>, vector<8x64xf32>
    tpu.vector_store %arg22[%c48_75, %c0_76], %240 {strides = array<i32>} : memref<64x64xf32, #tpu.memory_space<vmem>>, vector<8x64xf32>,
    %242 = vector.broadcast %1 : vector<1x64xf32> to vector<8x64xf32>
    %243 = arith.mulf %185, %242 : vector<8x64xf32>
    %cst_77 = arith.constant 1.000000e+00 : f32
    %244 = vector.broadcast %cst_77 : f32 to vector<1x64xf32>
    %245 = arith.subf %244, %1 : vector<1x64xf32>
    %246 = vector.broadcast %245 : vector<1x64xf32> to vector<8x64xf32>
    %247 = arith.mulf %38, %246 : vector<8x64xf32>
    %248 = arith.addf %243, %247 : vector<8x64xf32>
    %c56_78 = arith.constant 56 : index
    %c0_79 = arith.constant 0 : index
    %249 = vector.load %arg22[%c56_78, %c0_79] : memref<64x64xf32, #tpu.memory_space<vmem>>, vector<8x64xf32>
    tpu.vector_store %arg22[%c56_78, %c0_79], %248 {strides = array<i32>} : memref<64x64xf32, #tpu.memory_space<vmem>>, vector<8x64xf32>,
    %c0_80 = arith.constant 0 : index
    %c0_81 = arith.constant 0 : index
    %250 = vector.load %arg22[%c0_80, %c0_81] : memref<64x64xf32, #tpu.memory_space<vmem>>, vector<64x64xf32>
    %c0_82 = arith.constant 0 : index
    %c0_83 = arith.constant 0 : index
    %251 = vector.load %arg5[%c0_82, %c0_83] : memref<64x256xf32, #tpu.memory_space<vmem>>, vector<64x256xf32>
    %cst_84 = arith.constant dense<0.000000e+00> : vector<64x256xf32>
    %252 = tpu.matmul %250, %251, %cst_84 {dimension_numbers = #tpu.dot_dimension_numbers<[1], [0], [0], [1], [0, 0, 1, 1], [], []>} : vector<64x64xf32>, vector<64x256xf32>, vector<64x256xf32> -> vector<64x256xf32>
    %c0_85 = arith.constant 0 : index
    %c0_86 = arith.constant 0 : index
    %253 = vector.load %arg6[%c0_85, %c0_86] : memref<1x256xf32, #tpu.memory_space<vmem>>, vector<1x256xf32>
    %254 = vector.broadcast %253 : vector<1x256xf32> to vector<64x256xf32>
    %255 = arith.addf %252, %254 : vector<64x256xf32>
    %256 = vector.broadcast %0 : vector<1x256xf32> to vector<64x256xf32>
    %257 = arith.mulf %255, %256 : vector<64x256xf32>
    %c0_87 = arith.constant 0 : index
    %c0_88 = arith.constant 0 : index
    %258 = vector.load %arg20[%c0_87, %c0_88] : memref<64x256xf32, #tpu.memory_space<vmem>>, vector<64x256xf32>
    tpu.vector_store %arg20[%c0_87, %c0_88], %257 {strides = array<i32>} : memref<64x256xf32, #tpu.memory_space<vmem>>, vector<64x256xf32>,
    %259 = vector.broadcast %0 : vector<1x256xf32> to vector<64x256xf32>
    %260 = arith.mulf %255, %259 : vector<64x256xf32>
    %261 = arith.subf %255, %260 : vector<64x256xf32>
    %c0_89 = arith.constant 0 : index
    %c0_90 = arith.constant 0 : index
    %262 = vector.load %arg21[%c0_89, %c0_90] : memref<64x256xf32, #tpu.memory_space<vmem>>, vector<64x256xf32>
    tpu.vector_store %arg21[%c0_89, %c0_90], %261 {strides = array<i32>} : memref<64x256xf32, #tpu.memory_space<vmem>>, vector<64x256xf32>,
    %c0_91 = arith.constant 0 : index
    %c0_92 = arith.constant 0 : index
    %263 = vector.load %arg7[%c0_91, %c0_92] : memref<64x256xf32, #tpu.memory_space<vmem>>, vector<64x256xf32>
    %cst_93 = arith.constant 0.000000e+00 : f32
    %264 = vector.broadcast %cst_93 : f32 to vector<8x64xf32>
    %cst_94 = arith.constant 0.000000e+00 : f32
    %265 = vector.broadcast %cst_94 : f32 to vector<8x64xf32>
    %cst_95 = arith.constant dense<0.000000e+00> : vector<8x256xf32>
    %266 = tpu.matmul %264, %263, %cst_95 {dimension_numbers = #tpu.dot_dimension_numbers<[1], [0], [0], [1], [0, 0, 1, 1], [], []>} : vector<8x64xf32>, vector<64x256xf32>, vector<8x256xf32> -> vector<8x256xf32>
    %c0_96 = arith.constant 0 : index
    %c0_97 = arith.constant 0 : index
    %267 = vector.load %arg20[%c0_96, %c0_97] : memref<64x256xf32, #tpu.memory_space<vmem>>, vector<8x256xf32>
    %c56_98 = arith.constant 56 : index
    %c0_99 = arith.constant 0 : index
    %268 = vector.load %arg21[%c56_98, %c0_99] : memref<64x256xf32, #tpu.memory_space<vmem>>, vector<8x256xf32>
    %269 = arith.addf %267, %268 : vector<8x256xf32>
    %270 = arith.addf %269, %266 : vector<8x256xf32>
    %271 = vector.extract_strided_slice %270 {offsets = [0, 0], sizes = [8, 192], strides = [1, 1]} : vector<8x256xf32> to vector<8x192xf32>
    %272 = arith.negf %271 : vector<8x192xf32>
    %273 = math.exp %272 : vector<8x192xf32>
    %cst_100 = arith.constant 1.000000e+00 : f32
    %274 = vector.broadcast %cst_100 : f32 to vector<8x192xf32>
    %275 = arith.addf %274, %273 : vector<8x192xf32>
    %276 = arith.divf %274, %275 : vector<8x192xf32>
    %277 = vector.extract_strided_slice %270 {offsets = [0, 192], sizes = [8, 64], strides = [1, 1]} : vector<8x256xf32> to vector<8x64xf32>
    %278 = math.tanh %277 : vector<8x64xf32>
    %279 = vector.extract_strided_slice %276 {offsets = [0, 0], sizes = [8, 64], strides = [1, 1]} : vector<8x192xf32> to vector<8x64xf32>
    %280 = vector.extract_strided_slice %276 {offsets = [0, 64], sizes = [8, 64], strides = [1, 1]} : vector<8x192xf32> to vector<8x64xf32>
    %281 = vector.extract_strided_slice %276 {offsets = [0, 128], sizes = [8, 64], strides = [1, 1]} : vector<8x192xf32> to vector<8x64xf32>
    %282 = arith.mulf %280, %265 : vector<8x64xf32>
    %283 = arith.mulf %279, %278 : vector<8x64xf32>
    %284 = arith.addf %282, %283 : vector<8x64xf32>
    %285 = math.tanh %284 : vector<8x64xf32>
    %286 = arith.mulf %281, %285 : vector<8x64xf32>
    %cst_101 = arith.constant dense<0.000000e+00> : vector<8x256xf32>
    %287 = tpu.matmul %286, %263, %cst_101 {dimension_numbers = #tpu.dot_dimension_numbers<[1], [0], [0], [1], [0, 0, 1, 1], [], []>} : vector<8x64xf32>, vector<64x256xf32>, vector<8x256xf32> -> vector<8x256xf32>
    %c8_102 = arith.constant 8 : index
    %c0_103 = arith.constant 0 : index
    %288 = vector.load %arg20[%c8_102, %c0_103] : memref<64x256xf32, #tpu.memory_space<vmem>>, vector<8x256xf32>
    %c48_104 = arith.constant 48 : index
    %c0_105 = arith.constant 0 : index
    %289 = vector.load %arg21[%c48_104, %c0_105] : memref<64x256xf32, #tpu.memory_space<vmem>>, vector<8x256xf32>
    %290 = arith.addf %288, %289 : vector<8x256xf32>
    %291 = arith.addf %290, %287 : vector<8x256xf32>
    %292 = vector.extract_strided_slice %291 {offsets = [0, 0], sizes = [8, 192], strides = [1, 1]} : vector<8x256xf32> to vector<8x192xf32>
    %293 = arith.negf %292 : vector<8x192xf32>
    %294 = math.exp %293 : vector<8x192xf32>
    %cst_106 = arith.constant 1.000000e+00 : f32
    %295 = vector.broadcast %cst_106 : f32 to vector<8x192xf32>
    %296 = arith.addf %295, %294 : vector<8x192xf32>
    %297 = arith.divf %295, %296 : vector<8x192xf32>
    %298 = vector.extract_strided_slice %291 {offsets = [0, 192], sizes = [8, 64], strides = [1, 1]} : vector<8x256xf32> to vector<8x64xf32>
    %299 = math.tanh %298 : vector<8x64xf32>
    %300 = vector.extract_strided_slice %297 {offsets = [0, 0], sizes = [8, 64], strides = [1, 1]} : vector<8x192xf32> to vector<8x64xf32>
    %301 = vector.extract_strided_slice %297 {offsets = [0, 64], sizes = [8, 64], strides = [1, 1]} : vector<8x192xf32> to vector<8x64xf32>
    %302 = vector.extract_strided_slice %297 {offsets = [0, 128], sizes = [8, 64], strides = [1, 1]} : vector<8x192xf32> to vector<8x64xf32>
    %303 = arith.mulf %301, %284 : vector<8x64xf32>
    %304 = arith.mulf %300, %299 : vector<8x64xf32>
    %305 = arith.addf %303, %304 : vector<8x64xf32>
    %306 = math.tanh %305 : vector<8x64xf32>
    %307 = arith.mulf %302, %306 : vector<8x64xf32>
    %cst_107 = arith.constant dense<0.000000e+00> : vector<8x256xf32>
    %308 = tpu.matmul %307, %263, %cst_107 {dimension_numbers = #tpu.dot_dimension_numbers<[1], [0], [0], [1], [0, 0, 1, 1], [], []>} : vector<8x64xf32>, vector<64x256xf32>, vector<8x256xf32> -> vector<8x256xf32>
    %c16_108 = arith.constant 16 : index
    %c0_109 = arith.constant 0 : index
    %309 = vector.load %arg20[%c16_108, %c0_109] : memref<64x256xf32, #tpu.memory_space<vmem>>, vector<8x256xf32>
    %c40_110 = arith.constant 40 : index
    %c0_111 = arith.constant 0 : index
    %310 = vector.load %arg21[%c40_110, %c0_111] : memref<64x256xf32, #tpu.memory_space<vmem>>, vector<8x256xf32>
    %311 = arith.addf %309, %310 : vector<8x256xf32>
    %312 = arith.addf %311, %308 : vector<8x256xf32>
    %313 = vector.extract_strided_slice %312 {offsets = [0, 0], sizes = [8, 192], strides = [1, 1]} : vector<8x256xf32> to vector<8x192xf32>
    %314 = arith.negf %313 : vector<8x192xf32>
    %315 = math.exp %314 : vector<8x192xf32>
    %cst_112 = arith.constant 1.000000e+00 : f32
    %316 = vector.broadcast %cst_112 : f32 to vector<8x192xf32>
    %317 = arith.addf %316, %315 : vector<8x192xf32>
    %318 = arith.divf %316, %317 : vector<8x192xf32>
    %319 = vector.extract_strided_slice %312 {offsets = [0, 192], sizes = [8, 64], strides = [1, 1]} : vector<8x256xf32> to vector<8x64xf32>
    %320 = math.tanh %319 : vector<8x64xf32>
    %321 = vector.extract_strided_slice %318 {offsets = [0, 0], sizes = [8, 64], strides = [1, 1]} : vector<8x192xf32> to vector<8x64xf32>
    %322 = vector.extract_strided_slice %318 {offsets = [0, 64], sizes = [8, 64], strides = [1, 1]} : vector<8x192xf32> to vector<8x64xf32>
    %323 = vector.extract_strided_slice %318 {offsets = [0, 128], sizes = [8, 64], strides = [1, 1]} : vector<8x192xf32> to vector<8x64xf32>
    %324 = arith.mulf %322, %305 : vector<8x64xf32>
    %325 = arith.mulf %321, %320 : vector<8x64xf32>
    %326 = arith.addf %324, %325 : vector<8x64xf32>
    %327 = math.tanh %326 : vector<8x64xf32>
    %328 = arith.mulf %323, %327 : vector<8x64xf32>
    %cst_113 = arith.constant dense<0.000000e+00> : vector<8x256xf32>
    %329 = tpu.matmul %328, %263, %cst_113 {dimension_numbers = #tpu.dot_dimension_numbers<[1], [0], [0], [1], [0, 0, 1, 1], [], []>} : vector<8x64xf32>, vector<64x256xf32>, vector<8x256xf32> -> vector<8x256xf32>
    %c24_114 = arith.constant 24 : index
    %c0_115 = arith.constant 0 : index
    %330 = vector.load %arg20[%c24_114, %c0_115] : memref<64x256xf32, #tpu.memory_space<vmem>>, vector<8x256xf32>
    %c32_116 = arith.constant 32 : index
    %c0_117 = arith.constant 0 : index
    %331 = vector.load %arg21[%c32_116, %c0_117] : memref<64x256xf32, #tpu.memory_space<vmem>>, vector<8x256xf32>
    %332 = arith.addf %330, %331 : vector<8x256xf32>
    %333 = arith.addf %332, %329 : vector<8x256xf32>
    %334 = vector.extract_strided_slice %333 {offsets = [0, 0], sizes = [8, 192], strides = [1, 1]} : vector<8x256xf32> to vector<8x192xf32>
    %335 = arith.negf %334 : vector<8x192xf32>
    %336 = math.exp %335 : vector<8x192xf32>
    %cst_118 = arith.constant 1.000000e+00 : f32
    %337 = vector.broadcast %cst_118 : f32 to vector<8x192xf32>
    %338 = arith.addf %337, %336 : vector<8x192xf32>
    %339 = arith.divf %337, %338 : vector<8x192xf32>
    %340 = vector.extract_strided_slice %333 {offsets = [0, 192], sizes = [8, 64], strides = [1, 1]} : vector<8x256xf32> to vector<8x64xf32>
    %341 = math.tanh %340 : vector<8x64xf32>
    %342 = vector.extract_strided_slice %339 {offsets = [0, 0], sizes = [8, 64], strides = [1, 1]} : vector<8x192xf32> to vector<8x64xf32>
    %343 = vector.extract_strided_slice %339 {offsets = [0, 64], sizes = [8, 64], strides = [1, 1]} : vector<8x192xf32> to vector<8x64xf32>
    %344 = vector.extract_strided_slice %339 {offsets = [0, 128], sizes = [8, 64], strides = [1, 1]} : vector<8x192xf32> to vector<8x64xf32>
    %345 = arith.mulf %343, %326 : vector<8x64xf32>
    %346 = arith.mulf %342, %341 : vector<8x64xf32>
    %347 = arith.addf %345, %346 : vector<8x64xf32>
    %348 = math.tanh %347 : vector<8x64xf32>
    %349 = arith.mulf %344, %348 : vector<8x64xf32>
    %cst_119 = arith.constant dense<0.000000e+00> : vector<8x256xf32>
    %350 = tpu.matmul %349, %263, %cst_119 {dimension_numbers = #tpu.dot_dimension_numbers<[1], [0], [0], [1], [0, 0, 1, 1], [], []>} : vector<8x64xf32>, vector<64x256xf32>, vector<8x256xf32> -> vector<8x256xf32>
    %c32_120 = arith.constant 32 : index
    %c0_121 = arith.constant 0 : index
    %351 = vector.load %arg20[%c32_120, %c0_121] : memref<64x256xf32, #tpu.memory_space<vmem>>, vector<8x256xf32>
    %c24_122 = arith.constant 24 : index
    %c0_123 = arith.constant 0 : index
    %352 = vector.load %arg21[%c24_122, %c0_123] : memref<64x256xf32, #tpu.memory_space<vmem>>, vector<8x256xf32>
    %353 = arith.addf %351, %352 : vector<8x256xf32>
    %354 = arith.addf %353, %350 : vector<8x256xf32>
    %355 = vector.extract_strided_slice %354 {offsets = [0, 0], sizes = [8, 192], strides = [1, 1]} : vector<8x256xf32> to vector<8x192xf32>
    %356 = arith.negf %355 : vector<8x192xf32>
    %357 = math.exp %356 : vector<8x192xf32>
    %cst_124 = arith.constant 1.000000e+00 : f32
    %358 = vector.broadcast %cst_124 : f32 to vector<8x192xf32>
    %359 = arith.addf %358, %357 : vector<8x192xf32>
    %360 = arith.divf %358, %359 : vector<8x192xf32>
    %361 = vector.extract_strided_slice %354 {offsets = [0, 192], sizes = [8, 64], strides = [1, 1]} : vector<8x256xf32> to vector<8x64xf32>
    %362 = math.tanh %361 : vector<8x64xf32>
    %363 = vector.extract_strided_slice %360 {offsets = [0, 0], sizes = [8, 64], strides = [1, 1]} : vector<8x192xf32> to vector<8x64xf32>
    %364 = vector.extract_strided_slice %360 {offsets = [0, 64], sizes = [8, 64], strides = [1, 1]} : vector<8x192xf32> to vector<8x64xf32>
    %365 = vector.extract_strided_slice %360 {offsets = [0, 128], sizes = [8, 64], strides = [1, 1]} : vector<8x192xf32> to vector<8x64xf32>
    %366 = arith.mulf %364, %347 : vector<8x64xf32>
    %367 = arith.mulf %363, %362 : vector<8x64xf32>
    %368 = arith.addf %366, %367 : vector<8x64xf32>
    %369 = math.tanh %368 : vector<8x64xf32>
    %370 = arith.mulf %365, %369 : vector<8x64xf32>
    %cst_125 = arith.constant dense<0.000000e+00> : vector<8x256xf32>
    %371 = tpu.matmul %370, %263, %cst_125 {dimension_numbers = #tpu.dot_dimension_numbers<[1], [0], [0], [1], [0, 0, 1, 1], [], []>} : vector<8x64xf32>, vector<64x256xf32>, vector<8x256xf32> -> vector<8x256xf32>
    %c40_126 = arith.constant 40 : index
    %c0_127 = arith.constant 0 : index
    %372 = vector.load %arg20[%c40_126, %c0_127] : memref<64x256xf32, #tpu.memory_space<vmem>>, vector<8x256xf32>
    %c16_128 = arith.constant 16 : index
    %c0_129 = arith.constant 0 : index
    %373 = vector.load %arg21[%c16_128, %c0_129] : memref<64x256xf32, #tpu.memory_space<vmem>>, vector<8x256xf32>
    %374 = arith.addf %372, %373 : vector<8x256xf32>
    %375 = arith.addf %374, %371 : vector<8x256xf32>
    %376 = vector.extract_strided_slice %375 {offsets = [0, 0], sizes = [8, 192], strides = [1, 1]} : vector<8x256xf32> to vector<8x192xf32>
    %377 = arith.negf %376 : vector<8x192xf32>
    %378 = math.exp %377 : vector<8x192xf32>
    %cst_130 = arith.constant 1.000000e+00 : f32
    %379 = vector.broadcast %cst_130 : f32 to vector<8x192xf32>
    %380 = arith.addf %379, %378 : vector<8x192xf32>
    %381 = arith.divf %379, %380 : vector<8x192xf32>
    %382 = vector.extract_strided_slice %375 {offsets = [0, 192], sizes = [8, 64], strides = [1, 1]} : vector<8x256xf32> to vector<8x64xf32>
    %383 = math.tanh %382 : vector<8x64xf32>
    %384 = vector.extract_strided_slice %381 {offsets = [0, 0], sizes = [8, 64], strides = [1, 1]} : vector<8x192xf32> to vector<8x64xf32>
    %385 = vector.extract_strided_slice %381 {offsets = [0, 64], sizes = [8, 64], strides = [1, 1]} : vector<8x192xf32> to vector<8x64xf32>
    %386 = vector.extract_strided_slice %381 {offsets = [0, 128], sizes = [8, 64], strides = [1, 1]} : vector<8x192xf32> to vector<8x64xf32>
    %387 = arith.mulf %385, %368 : vector<8x64xf32>
    %388 = arith.mulf %384, %383 : vector<8x64xf32>
    %389 = arith.addf %387, %388 : vector<8x64xf32>
    %390 = math.tanh %389 : vector<8x64xf32>
    %391 = arith.mulf %386, %390 : vector<8x64xf32>
    %cst_131 = arith.constant dense<0.000000e+00> : vector<8x256xf32>
    %392 = tpu.matmul %391, %263, %cst_131 {dimension_numbers = #tpu.dot_dimension_numbers<[1], [0], [0], [1], [0, 0, 1, 1], [], []>} : vector<8x64xf32>, vector<64x256xf32>, vector<8x256xf32> -> vector<8x256xf32>
    %c48_132 = arith.constant 48 : index
    %c0_133 = arith.constant 0 : index
    %393 = vector.load %arg20[%c48_132, %c0_133] : memref<64x256xf32, #tpu.memory_space<vmem>>, vector<8x256xf32>
    %c8_134 = arith.constant 8 : index
    %c0_135 = arith.constant 0 : index
    %394 = vector.load %arg21[%c8_134, %c0_135] : memref<64x256xf32, #tpu.memory_space<vmem>>, vector<8x256xf32>
    %395 = arith.addf %393, %394 : vector<8x256xf32>
    %396 = arith.addf %395, %392 : vector<8x256xf32>
    %397 = vector.extract_strided_slice %396 {offsets = [0, 0], sizes = [8, 192], strides = [1, 1]} : vector<8x256xf32> to vector<8x192xf32>
    %398 = arith.negf %397 : vector<8x192xf32>
    %399 = math.exp %398 : vector<8x192xf32>
    %cst_136 = arith.constant 1.000000e+00 : f32
    %400 = vector.broadcast %cst_136 : f32 to vector<8x192xf32>
    %401 = arith.addf %400, %399 : vector<8x192xf32>
    %402 = arith.divf %400, %401 : vector<8x192xf32>
    %403 = vector.extract_strided_slice %396 {offsets = [0, 192], sizes = [8, 64], strides = [1, 1]} : vector<8x256xf32> to vector<8x64xf32>
    %404 = math.tanh %403 : vector<8x64xf32>
    %405 = vector.extract_strided_slice %402 {offsets = [0, 0], sizes = [8, 64], strides = [1, 1]} : vector<8x192xf32> to vector<8x64xf32>
    %406 = vector.extract_strided_slice %402 {offsets = [0, 64], sizes = [8, 64], strides = [1, 1]} : vector<8x192xf32> to vector<8x64xf32>
    %407 = vector.extract_strided_slice %402 {offsets = [0, 128], sizes = [8, 64], strides = [1, 1]} : vector<8x192xf32> to vector<8x64xf32>
    %408 = arith.mulf %406, %389 : vector<8x64xf32>
    %409 = arith.mulf %405, %404 : vector<8x64xf32>
    %410 = arith.addf %408, %409 : vector<8x64xf32>
    %411 = math.tanh %410 : vector<8x64xf32>
    %412 = arith.mulf %407, %411 : vector<8x64xf32>
    %cst_137 = arith.constant dense<0.000000e+00> : vector<8x256xf32>
    %413 = tpu.matmul %412, %263, %cst_137 {dimension_numbers = #tpu.dot_dimension_numbers<[1], [0], [0], [1], [0, 0, 1, 1], [], []>} : vector<8x64xf32>, vector<64x256xf32>, vector<8x256xf32> -> vector<8x256xf32>
    %c56_138 = arith.constant 56 : index
    %c0_139 = arith.constant 0 : index
    %414 = vector.load %arg20[%c56_138, %c0_139] : memref<64x256xf32, #tpu.memory_space<vmem>>, vector<8x256xf32>
    %c0_140 = arith.constant 0 : index
    %c0_141 = arith.constant 0 : index
    %415 = vector.load %arg21[%c0_140, %c0_141] : memref<64x256xf32, #tpu.memory_space<vmem>>, vector<8x256xf32>
    %416 = arith.addf %414, %415 : vector<8x256xf32>
    %417 = arith.addf %416, %413 : vector<8x256xf32>
    %418 = vector.extract_strided_slice %417 {offsets = [0, 0], sizes = [8, 192], strides = [1, 1]} : vector<8x256xf32> to vector<8x192xf32>
    %419 = arith.negf %418 : vector<8x192xf32>
    %420 = math.exp %419 : vector<8x192xf32>
    %cst_142 = arith.constant 1.000000e+00 : f32
    %421 = vector.broadcast %cst_142 : f32 to vector<8x192xf32>
    %422 = arith.addf %421, %420 : vector<8x192xf32>
    %423 = arith.divf %421, %422 : vector<8x192xf32>
    %424 = vector.extract_strided_slice %417 {offsets = [0, 192], sizes = [8, 64], strides = [1, 1]} : vector<8x256xf32> to vector<8x64xf32>
    %425 = math.tanh %424 : vector<8x64xf32>
    %426 = vector.extract_strided_slice %423 {offsets = [0, 0], sizes = [8, 64], strides = [1, 1]} : vector<8x192xf32> to vector<8x64xf32>
    %427 = vector.extract_strided_slice %423 {offsets = [0, 64], sizes = [8, 64], strides = [1, 1]} : vector<8x192xf32> to vector<8x64xf32>
    %428 = vector.extract_strided_slice %423 {offsets = [0, 128], sizes = [8, 64], strides = [1, 1]} : vector<8x192xf32> to vector<8x64xf32>
    %429 = arith.mulf %427, %410 : vector<8x64xf32>
    %430 = arith.mulf %426, %425 : vector<8x64xf32>
    %431 = arith.addf %429, %430 : vector<8x64xf32>
    %432 = math.tanh %431 : vector<8x64xf32>
    %433 = arith.mulf %428, %432 : vector<8x64xf32>
    %434 = vector.broadcast %1 : vector<1x64xf32> to vector<8x64xf32>
    %435 = arith.mulf %286, %434 : vector<8x64xf32>
    %cst_143 = arith.constant 1.000000e+00 : f32
    %436 = vector.broadcast %cst_143 : f32 to vector<1x64xf32>
    %437 = arith.subf %436, %1 : vector<1x64xf32>
    %438 = vector.broadcast %437 : vector<1x64xf32> to vector<8x64xf32>
    %439 = arith.mulf %433, %438 : vector<8x64xf32>
    %440 = arith.addf %435, %439 : vector<8x64xf32>
    %c0_144 = arith.constant 0 : index
    %c0_145 = arith.constant 0 : index
    %441 = vector.load %arg22[%c0_144, %c0_145] : memref<64x64xf32, #tpu.memory_space<vmem>>, vector<8x64xf32>
    tpu.vector_store %arg22[%c0_144, %c0_145], %440 {strides = array<i32>} : memref<64x64xf32, #tpu.memory_space<vmem>>, vector<8x64xf32>,
    %442 = vector.broadcast %1 : vector<1x64xf32> to vector<8x64xf32>
    %443 = arith.mulf %307, %442 : vector<8x64xf32>
    %cst_146 = arith.constant 1.000000e+00 : f32
    %444 = vector.broadcast %cst_146 : f32 to vector<1x64xf32>
    %445 = arith.subf %444, %1 : vector<1x64xf32>
    %446 = vector.broadcast %445 : vector<1x64xf32> to vector<8x64xf32>
    %447 = arith.mulf %412, %446 : vector<8x64xf32>
    %448 = arith.addf %443, %447 : vector<8x64xf32>
    %c8_147 = arith.constant 8 : index
    %c0_148 = arith.constant 0 : index
    %449 = vector.load %arg22[%c8_147, %c0_148] : memref<64x64xf32, #tpu.memory_space<vmem>>, vector<8x64xf32>
    tpu.vector_store %arg22[%c8_147, %c0_148], %448 {strides = array<i32>} : memref<64x64xf32, #tpu.memory_space<vmem>>, vector<8x64xf32>,
    %450 = vector.broadcast %1 : vector<1x64xf32> to vector<8x64xf32>
    %451 = arith.mulf %328, %450 : vector<8x64xf32>
    %cst_149 = arith.constant 1.000000e+00 : f32
    %452 = vector.broadcast %cst_149 : f32 to vector<1x64xf32>
    %453 = arith.subf %452, %1 : vector<1x64xf32>
    %454 = vector.broadcast %453 : vector<1x64xf32> to vector<8x64xf32>
    %455 = arith.mulf %391, %454 : vector<8x64xf32>
    %456 = arith.addf %451, %455 : vector<8x64xf32>
    %c16_150 = arith.constant 16 : index
    %c0_151 = arith.constant 0 : index
    %457 = vector.load %arg22[%c16_150, %c0_151] : memref<64x64xf32, #tpu.memory_space<vmem>>, vector<8x64xf32>
    tpu.vector_store %arg22[%c16_150, %c0_151], %456 {strides = array<i32>} : memref<64x64xf32, #tpu.memory_space<vmem>>, vector<8x64xf32>,
    %458 = vector.broadcast %1 : vector<1x64xf32> to vector<8x64xf32>
    %459 = arith.mulf %349, %458 : vector<8x64xf32>
    %cst_152 = arith.constant 1.000000e+00 : f32
    %460 = vector.broadcast %cst_152 : f32 to vector<1x64xf32>
    %461 = arith.subf %460, %1 : vector<1x64xf32>
    %462 = vector.broadcast %461 : vector<1x64xf32> to vector<8x64xf32>
    %463 = arith.mulf %370, %462 : vector<8x64xf32>
    %464 = arith.addf %459, %463 : vector<8x64xf32>
    %c24_153 = arith.constant 24 : index
    %c0_154 = arith.constant 0 : index
    %465 = vector.load %arg22[%c24_153, %c0_154] : memref<64x64xf32, #tpu.memory_space<vmem>>, vector<8x64xf32>
    tpu.vector_store %arg22[%c24_153, %c0_154], %464 {strides = array<i32>} : memref<64x64xf32, #tpu.memory_space<vmem>>, vector<8x64xf32>,
    %466 = vector.broadcast %1 : vector<1x64xf32> to vector<8x64xf32>
    %467 = arith.mulf %370, %466 : vector<8x64xf32>
    %cst_155 = arith.constant 1.000000e+00 : f32
    %468 = vector.broadcast %cst_155 : f32 to vector<1x64xf32>
    %469 = arith.subf %468, %1 : vector<1x64xf32>
    %470 = vector.broadcast %469 : vector<1x64xf32> to vector<8x64xf32>
    %471 = arith.mulf %349, %470 : vector<8x64xf32>
    %472 = arith.addf %467, %471 : vector<8x64xf32>
    %c32_156 = arith.constant 32 : index
    %c0_157 = arith.constant 0 : index
    %473 = vector.load %arg22[%c32_156, %c0_157] : memref<64x64xf32, #tpu.memory_space<vmem>>, vector<8x64xf32>
    tpu.vector_store %arg22[%c32_156, %c0_157], %472 {strides = array<i32>} : memref<64x64xf32, #tpu.memory_space<vmem>>, vector<8x64xf32>,
    %474 = vector.broadcast %1 : vector<1x64xf32> to vector<8x64xf32>
    %475 = arith.mulf %391, %474 : vector<8x64xf32>
    %cst_158 = arith.constant 1.000000e+00 : f32
    %476 = vector.broadcast %cst_158 : f32 to vector<1x64xf32>
    %477 = arith.subf %476, %1 : vector<1x64xf32>
    %478 = vector.broadcast %477 : vector<1x64xf32> to vector<8x64xf32>
    %479 = arith.mulf %328, %478 : vector<8x64xf32>
    %480 = arith.addf %475, %479 : vector<8x64xf32>
    %c40_159 = arith.constant 40 : index
    %c0_160 = arith.constant 0 : index
    %481 = vector.load %arg22[%c40_159, %c0_160] : memref<64x64xf32, #tpu.memory_space<vmem>>, vector<8x64xf32>
    tpu.vector_store %arg22[%c40_159, %c0_160], %480 {strides = array<i32>} : memref<64x64xf32, #tpu.memory_space<vmem>>, vector<8x64xf32>,
    %482 = vector.broadcast %1 : vector<1x64xf32> to vector<8x64xf32>
    %483 = arith.mulf %412, %482 : vector<8x64xf32>
    %cst_161 = arith.constant 1.000000e+00 : f32
    %484 = vector.broadcast %cst_161 : f32 to vector<1x64xf32>
    %485 = arith.subf %484, %1 : vector<1x64xf32>
    %486 = vector.broadcast %485 : vector<1x64xf32> to vector<8x64xf32>
    %487 = arith.mulf %307, %486 : vector<8x64xf32>
    %488 = arith.addf %483, %487 : vector<8x64xf32>
    %c48_162 = arith.constant 48 : index
    %c0_163 = arith.constant 0 : index
    %489 = vector.load %arg22[%c48_162, %c0_163] : memref<64x64xf32, #tpu.memory_space<vmem>>, vector<8x64xf32>
    tpu.vector_store %arg22[%c48_162, %c0_163], %488 {strides = array<i32>} : memref<64x64xf32, #tpu.memory_space<vmem>>, vector<8x64xf32>,
    %490 = vector.broadcast %1 : vector<1x64xf32> to vector<8x64xf32>
    %491 = arith.mulf %433, %490 : vector<8x64xf32>
    %cst_164 = arith.constant 1.000000e+00 : f32
    %492 = vector.broadcast %cst_164 : f32 to vector<1x64xf32>
    %493 = arith.subf %492, %1 : vector<1x64xf32>
    %494 = vector.broadcast %493 : vector<1x64xf32> to vector<8x64xf32>
    %495 = arith.mulf %286, %494 : vector<8x64xf32>
    %496 = arith.addf %491, %495 : vector<8x64xf32>
    %c56_165 = arith.constant 56 : index
    %c0_166 = arith.constant 0 : index
    %497 = vector.load %arg22[%c56_165, %c0_166] : memref<64x64xf32, #tpu.memory_space<vmem>>, vector<8x64xf32>
    tpu.vector_store %arg22[%c56_165, %c0_166], %496 {strides = array<i32>} : memref<64x64xf32, #tpu.memory_space<vmem>>, vector<8x64xf32>,
    %c0_167 = arith.constant 0 : index
    %c0_168 = arith.constant 0 : index
    %498 = vector.load %arg22[%c0_167, %c0_168] : memref<64x64xf32, #tpu.memory_space<vmem>>, vector<64x64xf32>
    %c0_169 = arith.constant 0 : index
    %c0_170 = arith.constant 0 : index
    %499 = vector.load %arg8[%c0_169, %c0_170] : memref<64x32xf32, #tpu.memory_space<vmem>>, vector<64x32xf32>
    %cst_171 = arith.constant dense<0.000000e+00> : vector<64x32xf32>
    %500 = tpu.matmul %498, %499, %cst_171 {dimension_numbers = #tpu.dot_dimension_numbers<[1], [0], [0], [1], [0, 0, 1, 1], [], []>} : vector<64x64xf32>, vector<64x32xf32>, vector<64x32xf32> -> vector<64x32xf32>
    %c0_172 = arith.constant 0 : index
    %c0_173 = arith.constant 0 : index
    %501 = vector.load %arg9[%c0_172, %c0_173] : memref<1x32xf32, #tpu.memory_space<vmem>>, vector<1x32xf32>
    %502 = vector.broadcast %501 : vector<1x32xf32> to vector<64x32xf32>
    %503 = arith.addf %500, %502 : vector<64x32xf32>
    %504 = math.tanh %503 : vector<64x32xf32>
    %c0_174 = arith.constant 0 : index
    %c0_175 = arith.constant 0 : index
    %505 = vector.load %arg10[%c0_174, %c0_175] : memref<1x32xf32, #tpu.memory_space<vmem>>, vector<1x32xf32>
    %506 = vector.broadcast %505 : vector<1x32xf32> to vector<64x32xf32>
    %507 = arith.mulf %504, %506 : vector<64x32xf32>
    %cst_176 = arith.constant dense<0.000000e+00> : vector<64xf32>
    %508 = vector.multi_reduction <add>, %507, %cst_176 [1] : vector<64x32xf32> to vector<64xf32>
    %509 = vector.shape_cast %508 : vector<64xf32> to vector<64x1xf32>
    %c0_177 = arith.constant 0 : index
    %c0_178 = arith.constant 0 : index
    %510 = vector.load %arg11[%c0_177, %c0_178] : memref<1x1xf32, #tpu.memory_space<vmem>>, vector<1x1xf32>
    %511 = vector.broadcast %510 : vector<1x1xf32> to vector<64x1xf32>
    %512 = arith.addf %509, %511 : vector<64x1xf32>
    %513 = vector.extract_strided_slice %512 {offsets = [0, 0], sizes = [8, 1], strides = [1, 1]} : vector<64x1xf32> to vector<8x1xf32>
    %514 = vector.extract_strided_slice %512 {offsets = [8, 0], sizes = [8, 1], strides = [1, 1]} : vector<64x1xf32> to vector<8x1xf32>
    %515 = vector.extract_strided_slice %512 {offsets = [16, 0], sizes = [8, 1], strides = [1, 1]} : vector<64x1xf32> to vector<8x1xf32>
    %516 = vector.extract_strided_slice %512 {offsets = [24, 0], sizes = [8, 1], strides = [1, 1]} : vector<64x1xf32> to vector<8x1xf32>
    %517 = vector.extract_strided_slice %512 {offsets = [32, 0], sizes = [8, 1], strides = [1, 1]} : vector<64x1xf32> to vector<8x1xf32>
    %518 = vector.extract_strided_slice %512 {offsets = [40, 0], sizes = [8, 1], strides = [1, 1]} : vector<64x1xf32> to vector<8x1xf32>
    %519 = vector.extract_strided_slice %512 {offsets = [48, 0], sizes = [8, 1], strides = [1, 1]} : vector<64x1xf32> to vector<8x1xf32>
    %520 = vector.extract_strided_slice %512 {offsets = [56, 0], sizes = [8, 1], strides = [1, 1]} : vector<64x1xf32> to vector<8x1xf32>
    %521 = arith.maximumf %513, %514 : vector<8x1xf32>
    %522 = arith.maximumf %521, %515 : vector<8x1xf32>
    %523 = arith.maximumf %522, %516 : vector<8x1xf32>
    %524 = arith.maximumf %523, %517 : vector<8x1xf32>
    %525 = arith.maximumf %524, %518 : vector<8x1xf32>
    %526 = arith.maximumf %525, %519 : vector<8x1xf32>
    %527 = arith.maximumf %526, %520 : vector<8x1xf32>
    %528 = arith.subf %513, %527 : vector<8x1xf32>
    %529 = math.exp %528 : vector<8x1xf32>
    %530 = arith.subf %514, %527 : vector<8x1xf32>
    %531 = math.exp %530 : vector<8x1xf32>
    %532 = arith.subf %515, %527 : vector<8x1xf32>
    %533 = math.exp %532 : vector<8x1xf32>
    %534 = arith.subf %516, %527 : vector<8x1xf32>
    %535 = math.exp %534 : vector<8x1xf32>
    %536 = arith.subf %517, %527 : vector<8x1xf32>
    %537 = math.exp %536 : vector<8x1xf32>
    %538 = arith.subf %518, %527 : vector<8x1xf32>
    %539 = math.exp %538 : vector<8x1xf32>
    %540 = arith.subf %519, %527 : vector<8x1xf32>
    %541 = math.exp %540 : vector<8x1xf32>
    %542 = arith.subf %520, %527 : vector<8x1xf32>
    %543 = math.exp %542 : vector<8x1xf32>
    %544 = arith.addf %529, %531 : vector<8x1xf32>
    %545 = arith.addf %544, %533 : vector<8x1xf32>
    %546 = arith.addf %545, %535 : vector<8x1xf32>
    %547 = arith.addf %546, %537 : vector<8x1xf32>
    %548 = arith.addf %547, %539 : vector<8x1xf32>
    %549 = arith.addf %548, %541 : vector<8x1xf32>
    %550 = arith.addf %549, %543 : vector<8x1xf32>
    %cst_179 = arith.constant 1.000000e+00 : f32
    %551 = vector.broadcast %cst_179 : f32 to vector<8x1xf32>
    %552 = arith.divf %551, %550 : vector<8x1xf32>
    %cst_180 = arith.constant 0.000000e+00 : f32
    %553 = vector.broadcast %cst_180 : f32 to vector<8x64xf32>
    %554 = arith.mulf %529, %552 : vector<8x1xf32>
    %555 = vector.extract_strided_slice %498 {offsets = [0, 0], sizes = [8, 64], strides = [1, 1]} : vector<64x64xf32> to vector<8x64xf32>
    %556 = vector.broadcast %554 : vector<8x1xf32> to vector<8x64xf32>
    %557 = arith.mulf %556, %555 : vector<8x64xf32>
    %558 = arith.addf %553, %557 : vector<8x64xf32>
    %559 = vector.extract_strided_slice %554 {offsets = [0, 0], sizes = [2, 1], strides = [1, 1]} : vector<8x1xf32> to vector<2x1xf32>
    %c0_181 = arith.constant 0 : index
    %c0_182 = arith.constant 0 : index
    %560 = vector.load %arg19[%c0_181, %c0_182] : memref<2x8xf32, #tpu.memory_space<vmem>>, vector<2x1xf32>
    tpu.vector_store %arg19[%c0_181, %c0_182], %559 {strides = array<i32>} : memref<2x8xf32, #tpu.memory_space<vmem>>, vector<2x1xf32>,
    %561 = arith.mulf %531, %552 : vector<8x1xf32>
    %562 = vector.extract_strided_slice %498 {offsets = [8, 0], sizes = [8, 64], strides = [1, 1]} : vector<64x64xf32> to vector<8x64xf32>
    %563 = vector.broadcast %561 : vector<8x1xf32> to vector<8x64xf32>
    %564 = arith.mulf %563, %562 : vector<8x64xf32>
    %565 = arith.addf %558, %564 : vector<8x64xf32>
    %566 = vector.extract_strided_slice %561 {offsets = [0, 0], sizes = [2, 1], strides = [1, 1]} : vector<8x1xf32> to vector<2x1xf32>
    %c0_183 = arith.constant 0 : index
    %c1 = arith.constant 1 : index
    %567 = vector.load %arg19[%c0_183, %c1] : memref<2x8xf32, #tpu.memory_space<vmem>>, vector<2x1xf32>
    tpu.vector_store %arg19[%c0_183, %c1], %566 {strides = array<i32>} : memref<2x8xf32, #tpu.memory_space<vmem>>, vector<2x1xf32>,
    %568 = arith.mulf %533, %552 : vector<8x1xf32>
    %569 = vector.extract_strided_slice %498 {offsets = [16, 0], sizes = [8, 64], strides = [1, 1]} : vector<64x64xf32> to vector<8x64xf32>
    %570 = vector.broadcast %568 : vector<8x1xf32> to vector<8x64xf32>
    %571 = arith.mulf %570, %569 : vector<8x64xf32>
    %572 = arith.addf %565, %571 : vector<8x64xf32>
    %573 = vector.extract_strided_slice %568 {offsets = [0, 0], sizes = [2, 1], strides = [1, 1]} : vector<8x1xf32> to vector<2x1xf32>
    %c0_184 = arith.constant 0 : index
    %c2 = arith.constant 2 : index
    %574 = vector.load %arg19[%c0_184, %c2] : memref<2x8xf32, #tpu.memory_space<vmem>>, vector<2x1xf32>
    tpu.vector_store %arg19[%c0_184, %c2], %573 {strides = array<i32>} : memref<2x8xf32, #tpu.memory_space<vmem>>, vector<2x1xf32>,
    %575 = arith.mulf %535, %552 : vector<8x1xf32>
    %576 = vector.extract_strided_slice %498 {offsets = [24, 0], sizes = [8, 64], strides = [1, 1]} : vector<64x64xf32> to vector<8x64xf32>
    %577 = vector.broadcast %575 : vector<8x1xf32> to vector<8x64xf32>
    %578 = arith.mulf %577, %576 : vector<8x64xf32>
    %579 = arith.addf %572, %578 : vector<8x64xf32>
    %580 = vector.extract_strided_slice %575 {offsets = [0, 0], sizes = [2, 1], strides = [1, 1]} : vector<8x1xf32> to vector<2x1xf32>
    %c0_185 = arith.constant 0 : index
    %c3 = arith.constant 3 : index
    %581 = vector.load %arg19[%c0_185, %c3] : memref<2x8xf32, #tpu.memory_space<vmem>>, vector<2x1xf32>
    tpu.vector_store %arg19[%c0_185, %c3], %580 {strides = array<i32>} : memref<2x8xf32, #tpu.memory_space<vmem>>, vector<2x1xf32>,
    %582 = arith.mulf %537, %552 : vector<8x1xf32>
    %583 = vector.extract_strided_slice %498 {offsets = [32, 0], sizes = [8, 64], strides = [1, 1]} : vector<64x64xf32> to vector<8x64xf32>
    %584 = vector.broadcast %582 : vector<8x1xf32> to vector<8x64xf32>
    %585 = arith.mulf %584, %583 : vector<8x64xf32>
    %586 = arith.addf %579, %585 : vector<8x64xf32>
    %587 = vector.extract_strided_slice %582 {offsets = [0, 0], sizes = [2, 1], strides = [1, 1]} : vector<8x1xf32> to vector<2x1xf32>
    %c0_186 = arith.constant 0 : index
    %c4 = arith.constant 4 : index
    %588 = vector.load %arg19[%c0_186, %c4] : memref<2x8xf32, #tpu.memory_space<vmem>>, vector<2x1xf32>
    tpu.vector_store %arg19[%c0_186, %c4], %587 {strides = array<i32>} : memref<2x8xf32, #tpu.memory_space<vmem>>, vector<2x1xf32>,
    %589 = arith.mulf %539, %552 : vector<8x1xf32>
    %590 = vector.extract_strided_slice %498 {offsets = [40, 0], sizes = [8, 64], strides = [1, 1]} : vector<64x64xf32> to vector<8x64xf32>
    %591 = vector.broadcast %589 : vector<8x1xf32> to vector<8x64xf32>
    %592 = arith.mulf %591, %590 : vector<8x64xf32>
    %593 = arith.addf %586, %592 : vector<8x64xf32>
    %594 = vector.extract_strided_slice %589 {offsets = [0, 0], sizes = [2, 1], strides = [1, 1]} : vector<8x1xf32> to vector<2x1xf32>
    %c0_187 = arith.constant 0 : index
    %c5 = arith.constant 5 : index
    %595 = vector.load %arg19[%c0_187, %c5] : memref<2x8xf32, #tpu.memory_space<vmem>>, vector<2x1xf32>
    tpu.vector_store %arg19[%c0_187, %c5], %594 {strides = array<i32>} : memref<2x8xf32, #tpu.memory_space<vmem>>, vector<2x1xf32>,
    %596 = arith.mulf %541, %552 : vector<8x1xf32>
    %597 = vector.extract_strided_slice %498 {offsets = [48, 0], sizes = [8, 64], strides = [1, 1]} : vector<64x64xf32> to vector<8x64xf32>
    %598 = vector.broadcast %596 : vector<8x1xf32> to vector<8x64xf32>
    %599 = arith.mulf %598, %597 : vector<8x64xf32>
    %600 = arith.addf %593, %599 : vector<8x64xf32>
    %601 = vector.extract_strided_slice %596 {offsets = [0, 0], sizes = [2, 1], strides = [1, 1]} : vector<8x1xf32> to vector<2x1xf32>
    %c0_188 = arith.constant 0 : index
    %c6 = arith.constant 6 : index
    %602 = vector.load %arg19[%c0_188, %c6] : memref<2x8xf32, #tpu.memory_space<vmem>>, vector<2x1xf32>
    tpu.vector_store %arg19[%c0_188, %c6], %601 {strides = array<i32>} : memref<2x8xf32, #tpu.memory_space<vmem>>, vector<2x1xf32>,
    %603 = arith.mulf %543, %552 : vector<8x1xf32>
    %604 = vector.extract_strided_slice %498 {offsets = [56, 0], sizes = [8, 64], strides = [1, 1]} : vector<64x64xf32> to vector<8x64xf32>
    %605 = vector.broadcast %603 : vector<8x1xf32> to vector<8x64xf32>
    %606 = arith.mulf %605, %604 : vector<8x64xf32>
    %607 = arith.addf %600, %606 : vector<8x64xf32>
    %608 = vector.extract_strided_slice %603 {offsets = [0, 0], sizes = [2, 1], strides = [1, 1]} : vector<8x1xf32> to vector<2x1xf32>
    %c0_189 = arith.constant 0 : index
    %c7 = arith.constant 7 : index
    %609 = vector.load %arg19[%c0_189, %c7] : memref<2x8xf32, #tpu.memory_space<vmem>>, vector<2x1xf32>
    tpu.vector_store %arg19[%c0_189, %c7], %608 {strides = array<i32>} : memref<2x8xf32, #tpu.memory_space<vmem>>, vector<2x1xf32>,
    %c0_190 = arith.constant 0 : index
    %c0_191 = arith.constant 0 : index
    %610 = vector.load %arg12[%c0_190, %c0_191] : memref<64x32xf32, #tpu.memory_space<vmem>>, vector<64x32xf32>
    %cst_192 = arith.constant dense<0.000000e+00> : vector<8x32xf32>
    %611 = tpu.matmul %607, %610, %cst_192 {dimension_numbers = #tpu.dot_dimension_numbers<[1], [0], [0], [1], [0, 0, 1, 1], [], []>} : vector<8x64xf32>, vector<64x32xf32>, vector<8x32xf32> -> vector<8x32xf32>
    %c0_193 = arith.constant 0 : index
    %c0_194 = arith.constant 0 : index
    %612 = vector.load %arg13[%c0_193, %c0_194] : memref<1x32xf32, #tpu.memory_space<vmem>>, vector<1x32xf32>
    %613 = vector.broadcast %612 : vector<1x32xf32> to vector<8x32xf32>
    %614 = arith.addf %611, %613 : vector<8x32xf32>
    %cst_195 = arith.constant 0.000000e+00 : f32
    %615 = vector.broadcast %cst_195 : f32 to vector<8x32xf32>
    %616 = arith.maximumf %614, %615 : vector<8x32xf32>
    %c0_196 = arith.constant 0 : index
    %c0_197 = arith.constant 0 : index
    %617 = vector.load %arg14[%c0_196, %c0_197] : memref<32x16xf32, #tpu.memory_space<vmem>>, vector<32x16xf32>
    %cst_198 = arith.constant dense<0.000000e+00> : vector<8x16xf32>
    %618 = tpu.matmul %616, %617, %cst_198 {dimension_numbers = #tpu.dot_dimension_numbers<[1], [0], [0], [1], [0, 0, 1, 1], [], []>} : vector<8x32xf32>, vector<32x16xf32>, vector<8x16xf32> -> vector<8x16xf32>
    %c0_199 = arith.constant 0 : index
    %c0_200 = arith.constant 0 : index
    %619 = vector.load %arg15[%c0_199, %c0_200] : memref<1x16xf32, #tpu.memory_space<vmem>>, vector<1x16xf32>
    %620 = vector.broadcast %619 : vector<1x16xf32> to vector<8x16xf32>
    %621 = arith.addf %618, %620 : vector<8x16xf32>
    %cst_201 = arith.constant 0.000000e+00 : f32
    %622 = vector.broadcast %cst_201 : f32 to vector<8x16xf32>
    %623 = arith.maximumf %621, %622 : vector<8x16xf32>
    %c0_202 = arith.constant 0 : index
    %c0_203 = arith.constant 0 : index
    %624 = vector.load %arg16[%c0_202, %c0_203] : memref<16x2xf32, #tpu.memory_space<vmem>>, vector<16x2xf32>
    %cst_204 = arith.constant dense<0.000000e+00> : vector<8x2xf32>
    %625 = tpu.matmul %623, %624, %cst_204 {dimension_numbers = #tpu.dot_dimension_numbers<[1], [0], [0], [1], [0, 0, 1, 1], [], []>} : vector<8x16xf32>, vector<16x2xf32>, vector<8x2xf32> -> vector<8x2xf32>
    %c0_205 = arith.constant 0 : index
    %c0_206 = arith.constant 0 : index
    %626 = vector.load %arg17[%c0_205, %c0_206] : memref<1x2xf32, #tpu.memory_space<vmem>>, vector<1x2xf32>
    %627 = vector.broadcast %626 : vector<1x2xf32> to vector<8x2xf32>
    %628 = arith.addf %625, %627 : vector<8x2xf32>
    %629 = vector.extract_strided_slice %628 {offsets = [0, 0], sizes = [2, 2], strides = [1, 1]} : vector<8x2xf32> to vector<2x2xf32>
    %c0_207 = arith.constant 0 : index
    %c0_208 = arith.constant 0 : index
    %630 = vector.load %arg18[%c0_207, %c0_208] : memref<2x2xf32, #tpu.memory_space<vmem>>, vector<2x2xf32>
    tpu.vector_store %arg18[%c0_207, %c0_208], %629 {strides = array<i32>} : memref<2x2xf32, #tpu.memory_space<vmem>>, vector<2x2xf32>,
    return
  }
}

</mosaic_0001>

<bundles_post_ra>
// kernel: lstm_model_forward.1
= control target key start
LH: loop header
LB: loop body
LE: loop exit
PB: predicated region body
PF: predicated region fallthrough
CT: control target
= control target key end

     0   :  { %s5122_s0 = inlined_call_operand.vmem [shape: f32[64,16], index: 0, kind: input, shape index: {}]   ;;  %s5123_s1 = inlined_call_operand.hbm [shape: f32[1,256], index: 1, kind: input, shape index: {}]   ;;  %s5124_s2 = inlined_call_operand.hbm [shape: f32[16,256], index: 2, kind: input, shape index: {}]   ;;  %s5125_s3 = inlined_call_operand.vmem [shape: f32[1,256], index: 3, kind: input, shape index: {}]   ;;  %s5126_s4 = inlined_call_operand.vmem [shape: f32[64,256], index: 4, kind: input, shape index: {}]   ;;  %s5127_s5 = inlined_call_operand.vmem [shape: f32[64,256], index: 5, kind: input, shape index: {}]   ;;  %s5128_s6 = inlined_call_operand.vmem [shape: f32[1,256], index: 6, kind: input, shape index: {}]   ;;  %s5129_s7 = inlined_call_operand.vmem [shape: f32[64,256], index: 7, kind: input, shape index: {}]   ;;  %s5130_s8 = inlined_call_operand.vmem [shape: f32[64,32], index: 8, kind: input, shape index: {}]   ;;  %s5131_s9 = inlined_call_operand.hbm [shape: f32[1,32], index: 9, kind: input, shape index: {}]   ;;  %s5132_s10 = inlined_call_operand.hbm [shape: f32[1,32], index: 10, kind: input, shape index: {}]   ;;  %s5133_s11 = inlined_call_operand.<no memory space> [shape: f32[1,1], index: 11, kind: input, shape index: {}]   ;;  %s5134_s12 = inlined_call_operand.vmem [shape: f32[64,32], index: 12, kind: input, shape index: {}]   ;;  %s5135_s13 = inlined_call_operand.hbm [shape: f32[1,32], index: 13, kind: input, shape index: {}]   ;;  %s5136_s14 = inlined_call_operand.vmem [shape: f32[32,16], index: 14, kind: input, shape index: {}]   ;;  %s5137_s15 = inlined_call_operand.vmem [shape: f32[1,16], index: 15, kind: input, shape index: {}]   ;;  %s5138_s16 = inlined_call_operand.vmem [shape: f32[16,2], index: 16, kind: input, shape index: {}]   ;;  %s5139_s17 = inlined_call_operand.vmem [shape: f32[1,2], index: 17, kind: input, shape index: {}]   ;;  %s5140_s18 = inlined_call_operand.hbm [shape: f32[2,2], index: 18, kind: output, shape index: {0}]   ;;  %s5141_s19 = inlined_call_operand.hbm [shape: f32[2,8], index: 19, kind: output, shape index: {1}]  }
   0x1   :  { %5146 = sst [smem:[#allocation23_spill]] %s5122_s0  ;;  %v25_v0 = vstv %s5133_s11 }
   0x2   :  { %5147 = sst [smem:[#allocation24_spill]] %s5123_s1  ;;  %26 = vst [vmem:[#allocation5] sm:$0x1] %v25_v0 }
   0x3   :  { %5148 = sst [smem:[#allocation25_spill]] %s5124_s2 }
   0x4   :  { %5149 = sst [smem:[#allocation26_spill]] %s5125_s3 }
   0x5   :  { %5150 = sst [smem:[#allocation27_spill]] %s5140_s18 }
   0x6   :  { %27 = vsyncpa [#allocation7], 0 }
   0x7   :  { %28 = vsyncpa [#allocation10], 0 }
   0x8   :  { %29 = vsyncpa [#allocation13], 0 }
   0x9   :  { %30 = vsyncpa [#allocation8], 0 }
   0xa   :  { %31 = vsyncpa [#allocation17], 0  ;;  %s4041_s20 = smov [#allocation9]   ;;  %s5151_s2 = sld [smem:[#allocation25_spill]] }
   0xb   :  { %s49_s21 = sshll.u32 %s4041_s20, 4  ;;  %s50_s21 = int_to_ptr.vmem [resolvable:$true] %s49_s21 }
  0x10   :  { %s3877_s23 = scalar_lea.hbm %s5151_s2, 512 }
  0x11   :  { %p3878_p0 = scmp.ne.s32.totalorder %s5151_s2, %s3877_s23  ;;  %p3881_p1 = scmp.lt.u32.totalorder %s3877_s23, %s5151_s2 }
  0x13   :  { %p3883_p2 = pnand %p3881_p1, %p3878_p0 }
  0x15   :  { %3886 = shalt.err (!%p3883_p2)
}
  0x16   :  { %s3887_s11 = scalar_lea.vmem %s50_s21, 512  ;;  %p3892_p4 = scmp.lt.s32.totalorder %s50_s21, %s50_s21 }
  0x17   :  { %p3888_p3 = scmp.ne.s32.totalorder %s50_s21, %s3887_s11  ;;  %p3893_p5 = scmp.lt.s32.totalorder %s3887_s11, %s3887_s11 }
  0x19   :  { %p3894_p6 = por %p3893_p5, %p3892_p4 }
  0x1b   :  { %p3895_p7 = pnand %p3894_p6, %p3888_p3 }
  0x1d   :  { %3898 = shalt.err (!%p3895_p7)
}
  0x1e   :  { %s4042_s27 = smov 256   ;;  %s4043_s28 = smov 16  }
  0x1f   :  { %55 = dma.hbm_to_vmem [thread:$0]  %s5151_s2, 512, %s50_s21, [#allocation10], %s4042_s27, %s4042_s27, %s4043_s28  }
  0x20   :  { %s4044_s30 = smov [#allocation12]   ;;  %s4045_s1 = smov [#allocation6]  }
  0x21   :  { %s84_s20 = sshll.u32 %s4044_s30, 4  ;;  %s40_s22 = sshll.u32 %s4045_s1, 4  ;;  %s85_s20 = int_to_ptr.vmem [resolvable:$true] %s84_s20  ;;  %s41_s22 = int_to_ptr.vmem [resolvable:$true] %s40_s22 }
  0x22   :  { %s3899_s25 = scalar_lea.hbm %s5132_s10, 16 }
  0x23   :  { %p3900_p8 = scmp.ne.s32.totalorder %s5132_s10, %s3899_s25  ;;  %p3903_p9 = scmp.lt.u32.totalorder %s3899_s25, %s5132_s10 }
  0x25   :  { %p3905_p10 = pnand %p3903_p9, %p3900_p8 }
  0x27   :  { %3908 = shalt.err (!%p3905_p10)
}
  0x28   :  { %s3909_s21 = scalar_lea.vmem %s85_s20, 16  ;;  %s3913_s2 = scalar_lea.vmem %s85_s20, 32 }
  0x29   :  { %p3910_p11 = scmp.ne.s32.totalorder %s85_s20, %s3909_s21  ;;  %p3914_p12 = scmp.lt.s32.totalorder %s85_s20, %s85_s20 }
  0x2a   :  { %p3915_p13 = scmp.lt.s32.totalorder %s3913_s2, %s3909_s21 }
  0x2c   :  { %p3916_p0 = por %p3915_p13, %p3914_p12 }
  0x2e   :  { %p3917_p1 = pnand %p3916_p0, %p3910_p11 }
  0x30   :  { %3920 = shalt.err (!%p3917_p1)
}
  0x31   :  { %87 = dma.hbm_to_vmem [thread:$0]  %s5132_s10, 16, %s85_s20, [#allocation13]  }
  0x32   :  { %s5152_s30 = sld [smem:[#allocation24_spill]] }
  0x38   :  { %s3921_s18 = scalar_lea.hbm %s5152_s30, 32 }
  0x39   :  { %p3922_p2 = scmp.ne.s32.totalorder %s5152_s30, %s3921_s18  ;;  %p3925_p3 = scmp.lt.u32.totalorder %s3921_s18, %s5152_s30 }
  0x3b   :  { %p3927_p4 = pnand %p3925_p3, %p3922_p2 }
  0x3d   :  { %3930 = shalt.err (!%p3927_p4)
}
  0x3e   :  { %s3931_s3 = scalar_lea.vmem %s41_s22, 32  ;;  %p3936_p6 = scmp.lt.s32.totalorder %s41_s22, %s41_s22 }
  0x3f   :  { %p3932_p5 = scmp.ne.s32.totalorder %s41_s22, %s3931_s3  ;;  %p3937_p7 = scmp.lt.s32.totalorder %s3931_s3, %s3931_s3 }
  0x41   :  { %p3938_p8 = por %p3937_p7, %p3936_p6 }
  0x43   :  { %p3939_p9 = pnand %p3938_p8, %p3932_p5 }
  0x45   :  { %3942 = shalt.err (!%p3939_p9)
}
  0x46   :  { %43 = dma.hbm_to_vmem [thread:$0]  %s5152_s30, 32, %s41_s22, [#allocation7]  }
  0x47   :  { %s4046_s26 = smov [#allocation11]   ;;  %s4047_s21 = smov [#allocation14]  }
  0x48   :  { %s74_s11 = sshll.u32 %s4046_s26, 4  ;;  %s98_s2 = sshll.u32 %s4047_s21, 4  ;;  %s75_s11 = int_to_ptr.vmem [resolvable:$true] %s74_s11  ;;  %s99_s2 = int_to_ptr.vmem [resolvable:$true] %s98_s2 }
  0x49   :  { %s3943_s29 = scalar_lea.hbm %s5131_s9, 16 }
  0x4a   :  { %p3944_p10 = scmp.ne.s32.totalorder %s5131_s9, %s3943_s29  ;;  %p3947_p11 = scmp.lt.u32.totalorder %s3943_s29, %s5131_s9 }
  0x4c   :  { %p3949_p12 = pnand %p3947_p11, %p3944_p10 }
  0x4e   :  { %3952 = shalt.err (!%p3949_p12)
}
  0x4f   :  { %s3953_s22 = scalar_lea.vmem %s75_s11, 16  ;;  %s3957_s30 = scalar_lea.vmem %s75_s11, 32 }
  0x50   :  { %p3954_p13 = scmp.ne.s32.totalorder %s75_s11, %s3953_s22  ;;  %p3958_p0 = scmp.lt.s32.totalorder %s75_s11, %s75_s11 }
  0x51   :  { %p3959_p1 = scmp.lt.s32.totalorder %s3957_s30, %s3953_s22 }
  0x53   :  { %p3960_p2 = por %p3959_p1, %p3958_p0 }
  0x55   :  { %p3961_p3 = pnand %p3960_p2, %p3954_p13 }
  0x57   :  { %3964 = shalt.err (!%p3961_p3)
}
  0x58   :  { %77 = dma.hbm_to_vmem [thread:$0]  %s5131_s9, 16, %s75_s11, [#allocation10]  }
  0x59   :  { %s3965_s20 = scalar_lea.hbm %s5135_s13, 16 }
  0x5a   :  { %p3966_p4 = scmp.ne.s32.totalorder %s5135_s13, %s3965_s20  ;;  %p3969_p5 = scmp.lt.u32.totalorder %s3965_s20, %s5135_s13 }
  0x5c   :  { %p3971_p6 = pnand %p3969_p5, %p3966_p4 }
  0x5e   :  { %3974 = shalt.err (!%p3971_p6)
}
  0x5f   :  { %s3975_s29 = scalar_lea.vmem %s99_s2, 16  ;;  %s3979_s0 = scalar_lea.vmem %s99_s2, 32 }
  0x60   :  { %p3976_p7 = scmp.ne.s32.totalorder %s99_s2, %s3975_s29  ;;  %p3980_p8 = scmp.lt.s32.totalorder %s99_s2, %s99_s2 }
  0x61   :  { %p3981_p9 = scmp.lt.s32.totalorder %s3979_s0, %s3975_s29 }
  0x63   :  { %p3982_p10 = por %p3981_p9, %p3980_p8 }
  0x65   :  { %p3983_p11 = pnand %p3982_p10, %p3976_p7 }
  0x67   :  { %3986 = shalt.err (!%p3983_p11)
}
  0x68   :  { %101 = dma.hbm_to_vmem [thread:$0]  %s5135_s13, 16, %s99_s2, [#allocation13]  }
  0x69   :  { %4031 = dma.done.wait [#allocation7], 32  }
  0x6a   :  { %4032 = vsyncadd [#allocation7], 4294967264 }
  0x6b   :  { %4033 = dma.done.wait [#allocation10], 528  }
  0x6c   :  { %4034 = vsyncadd [#allocation10], 4294966768 }
  0x6d   :  { %4035 = dma.done.wait [#allocation13], 32  }
  0x6e   :  { %4036 = vsyncadd [#allocation13], 4294967264  ;;  %v4048_v1 = vmov 0.0   ;;  %v135_v2 = vld [vmem:[#allocation9 + $0x8] sm:$0xff]  ;;  %v137_v3 = vld [vmem:[#allocation9 + $0x18] sm:$0xff]  ;;  %s5153_s2 = sld [smem:[#allocation23_spill]]  ;;  %v140_v40 = vlaneseq }
  0x6f   :  { %239 = vmatprep.mubr.f32.mxu0 %v4048_v1  ;;  %447 = vmatprep.mubr.f32.mxu1 %v4048_v1  ;;  %v134_v4 = vld [vmem:[#allocation9] sm:$0xff]  ;;  %v3315_v5 = vpack.c.bf16 %v137_v3, %v135_v2  ;;  %v136_v6 = vld [vmem:[#allocation9 + $0x10] sm:$0xff]  ;;  %vm150_vm0 = vcmask 130048   ;;  %s5154_s26 = sld [smem:[#allocation26_spill]]  ;;  %v4366_v45 = vld [vmem:[#allocation6] sm:$0x3] }
  0x70   :  { %v3317_v7 = vpack.c.bf16 %v136_v6, %v134_v4  ;;  %v364_v9 = vld [vmem:[%s5126_s4 + $0x8] sm:$0xff]  ;;  %v366_v10 = vld [vmem:[%s5126_s4 + $0x18] sm:$0xff]  ;;  %v363_v12 = vld [vmem:[%s5126_s4] sm:$0xff]  ;;  %v141_v41 = vshrl.u32 %v140_v40, 7  ;;  %vm379_vm1 = vcmask 523264   ;;  %vm2668_vm2 = vcmask 261120  }
  0x71   :  { %3316 = vmatprep.subr.bf16.mxu0 %v3315_v5  ;;  %v4236_v11 = vpack.c.bf16 %v366_v10, %v364_v9  ;;  %v365_v13 = vld [vmem:[%s5126_s4 + $0x10] sm:$0xff]  ;;  %v368_v14 = vld [vmem:[%s5126_s4 + $0x28] sm:$0xff]  ;;  %v370_v16 = vld [vmem:[%s5126_s4 + $0x38] sm:$0xff]  ;;  %vm2756_vm3 = vcmask 1024   ;;  %vm4055_vm4 = vmmov 0   ;;  %s4056_s22 = smov 1  }
  0x72   :  { %3318 = vmatpush1.bf16.msra.mxu0 %v3317_v7  ;;  %v4247_v15 = vpack.c.bf16 %v365_v13, %v363_v12  ;;  %v367_v17 = vld [vmem:[%s5126_s4 + $0x20] sm:$0xff]  ;;  %v4256_v18 = vpack.c.bf16 %v370_v16, %v368_v14  ;;  %v369_v19 = vld [vmem:[%s5126_s4 + $0x30] sm:$0xff]  ;;  %v372_v20 = vld [vmem:[%s5126_s4 + $0x48] sm:$0xff]  ;;  %v4359_v42 = vsub.s32 0, %v141_v41  ;;  %v4364_v44 = vsub.s32 1, %v141_v41  ;;  %s4057_s30 = smov 2  }
  0x73   :  { %3320 = vmatprep.subr.bf16.mxu1 %v4236_v11  ;;  %v374_v21 = vld [vmem:[%s5126_s4 + $0x58] sm:$0xff]  ;;  %3352 = vmatprep.subr.bf16.mxu0 %v4236_v11  ;;  %v4270_v22 = vpack.c.bf16 %v369_v19, %v367_v17  ;;  %v371_v25 = vld [vmem:[%s5126_s4 + $0x40] sm:$0xff]  ;;  %v373_v26 = vld [vmem:[%s5126_s4 + $0x50] sm:$0xff]  ;;  %s4058_s24 = smov 4   ;;  %s4059_s25 = smov 6   ;;  %vm2769_vm5 = vcmask 9224  }
  0x74   :  { %v126_v8 = vld [vmem:[%s5153_s2] sm:$0xff]  ;;  %3322 = vmatpush1.bf16.msra.mxu1 %v4247_v15  ;;  %v127_v23 = vld [vmem:[%s5153_s2 + $0x8] sm:$0xff]  ;;  %v4277_v24 = vpack.c.bf16 %v374_v21, %v372_v20  ;;  %v378_v28 = vld [vmem:[%s5126_s4 + $0x78] sm:$0xff]  ;;  %v4295_v29 = vpack.c.bf16 %v373_v26, %v371_v25  ;;  %v4376_v48 = vrot.slane %v4366_v45, %v4359_v42  ;;  %v4380_v50 = vrot.slane %v4366_v45, %v4364_v44  ;;  %s4060_s29 = smov [#allocation16]  }
  0x75   :  { %3138 = vmatmul.mubr.msk.f32.vlgmr.msra.gmra.mrb[0].mxu0 %vm150_vm0, %v126_v8  ;;  %3324 = vmatprep.subr.bf16.mxu1 %v4256_v18  ;;  %v376_v27 = vld [vmem:[%s5126_s4 + $0x68] sm:$0xff]  ;;  %v128_v30 = vld [vmem:[%s5153_s2 + $0x10] sm:$0xff]  ;;  %v375_v32 = vld [vmem:[%s5126_s4 + $0x60] sm:$0xff]  ;;  %vm2782_vm6 = vcmask 17424   ;;  %vm2795_vm7 = vcmask 25624   ;;  %vm2808_vm8 = vcmask 33824  }
  0x76   :  { %245 = vmatprep.mubr.f32.mxu0 %v4048_v1  ;;  %3354 = vmatpush1.bf16.msra.mxu0 %v4247_v15  ;;  %v4302_v31 = vpack.c.bf16 %v378_v28, %v376_v27  ;;  %v377_v33 = vld [vmem:[%s5126_s4 + $0x70] sm:$0xff]  ;;  %v129_v35 = vld [vmem:[%s5153_s2 + $0x18] sm:$0xff]  ;;  %v130_v36 = vld [vmem:[%s5153_s2 + $0x20] sm:$0xff]  ;;  %vm2821_vm9 = vcmask 42024   ;;  %vm2834_vm10 = vcmask 50224   ;;  %vm2847_vm11 = vcmask 58424  }
  0x77   :  { %3356 = vmatprep.subr.bf16.mxu0 %v4256_v18  ;;  %v4314_v34 = vpack.c.bf16 %v377_v33, %v375_v32  ;;  %v131_v37 = vld [vmem:[%s5153_s2 + $0x28] sm:$0xff]  ;;  %v132_v38 = vld [vmem:[%s5153_s2 + $0x30] sm:$0xff]  ;;  %v133_v39 = vld [vmem:[%s5153_s2 + $0x38] sm:$0xff]  ;;  %s4049_s2 = smov 64   ;;  %s3123_s0 = sshll.u32 %s4060_s29, 4  ;;  %s3124_s0 = int_to_ptr.vmem [resolvable:$true] %s3123_s0 }
  0x78   :  { %3326 = vmatpush1.bf16.msra.mxu1 %v4270_v22  ;;  %v138_v43 = vld [vmem:[%s5154_s26] sm:$0x3]  ;;  %s3987_s9 = scalar_lea.vmem %s3124_s0, 32  ;;  %p3992_p13 = scmp.lt.s32.totalorder %s3124_s0, %s3124_s0 }
  0x79   :  { %3139 = vmatmul.mubr.msk.f32.gmra.mrb[2].mxu0 %vm150_vm0, %v127_v23  ;;  %3328 = vmatprep.subr.bf16.mxu1 %v4277_v24  ;;  %v4369_v46 = vrot.slane %v138_v43, %v4359_v42  ;;  %v4372_v47 = vrot.slane %v138_v43, %v4364_v44  ;;  %p3988_p12 = scmp.ne.s32.totalorder %s3124_s0, %s3987_s9  ;;  %p3993_p0 = scmp.lt.s32.totalorder %s3987_s9, %s3987_s9 }
  0x7a   :  { %251 = vmatprep.mubr.f32.mxu0 %v4048_v1  ;;  %3358 = vmatpush1.bf16.msra.mxu0 %v4270_v22 }
  0x7b   :  { %3360 = vmatprep.subr.bf16.mxu0 %v4277_v24  ;;  %p3994_p1 = por %p3993_p0, %p3992_p13 }
  0x7c   :  { %3330 = vmatpush1.bf16.msra.mxu1 %v4295_v29 }
  0x7d   :  { %3140 = vmatmul.mubr.msk.f32.gmra.mrb[4].mxu0 %vm150_vm0, %v128_v30  ;;  %3332 = vmatprep.subr.bf16.mxu1 %v4302_v31  ;;  %p3995_p2 = pnand %p3994_p1, %p3988_p12 }
  0x7e   :  { %257 = vmatprep.mubr.f32.mxu0 %v4048_v1  ;;  %3362 = vmatpush1.bf16.msra.mxu0 %v4295_v29 }
  0x7f   :  { %3364 = vmatprep.subr.bf16.mxu0 %v4302_v31 }
  0x80   :  { %3334 = vmatpush1.bf16.msra.mxu1 %v4314_v34 }
  0x81   :  { %3141 = vmatmul.mubr.msk.f32.gmra.mrb[6].mxu0 %vm150_vm0, %v129_v35  ;;  %3336 = vmatprep.subr.bf16.mxu1 %v4236_v11 }
  0x82   :  { %263 = vmatprep.mubr.f32.mxu0 %v4048_v1  ;;  %3366 = vmatpush1.bf16.msra.mxu0 %v4314_v34 }
  0x83   :  { %448 = vmatmul.mubr.f32.vlgmr.msra.gmra.mrb[0].mxu1 %v4048_v1  ;;  %3384 = vmatprep.subr.bf16.mxu0 %v4236_v11 }
  0x84   :  { %3338 = vmatpush1.bf16.msra.mxu1 %v4247_v15  ;;  %559 = vmatprep.mubr.f32.mxu1 %v4048_v1 }
  0x85   :  { %3142 = vmatmul.mubr.msk.f32.gmra.mrb[8].mxu0 %vm150_vm0, %v130_v36  ;;  %3340 = vmatprep.subr.bf16.mxu1 %v4256_v18 }
  0x86   :  { %269 = vmatprep.mubr.f32.mxu0 %v4048_v1 }
  0x88   :  { %3342 = vmatpush1.bf16.msra.mxu1 %v4270_v22 }
  0x89   :  { %3143 = vmatmul.mubr.msk.f32.gmra.mrb[10].mxu0 %vm150_vm0, %v131_v37  ;;  %3344 = vmatprep.subr.bf16.mxu1 %v4277_v24 }
  0x8a   :  { %275 = vmatprep.mubr.f32.mxu0 %v4048_v1 }
  0x8c   :  { %3346 = vmatpush1.bf16.msra.mxu1 %v4295_v29 }
  0x8d   :  { %3144 = vmatmul.mubr.msk.f32.gmra.mrb[12].mxu0 %vm150_vm0, %v132_v38  ;;  %3348 = vmatprep.subr.bf16.mxu1 %v4302_v31 }
  0x8e   :  { %281 = vmatprep.mubr.f32.mxu0 %v4048_v1 }
  0x90   :  { %3350 = vmatpush1.bf16.msra.mxu1 %v4314_v34 }
  0x91   :  { %3145 = vmatmul.mubr.msk.f32.gmra.mrb[14].mxu0 %vm150_vm0, %v133_v39  ;;  %3368 = vmatprep.subr.bf16.mxu1 %v4236_v11 }
  0x92   :  { %671 = vmatprep.mubr.f32.mxu0 %v4048_v1 }
 0x148   :  { %v241_v49 = vpop.f32.mrb[0].mxu0 }
 0x149   :  { %v4383_v51 = vadd.f32 %v241_v49, %v4369_v46  ;;  %v243_v52 = vpop.f32.mrb[1].mxu0 }
 0x14a   :  { %v4386_v53 = vadd.f32 %v243_v52, %v4372_v47 }
 0x14b   :  { %v4390_v54 = vmul.f32 %v4376_v48, %v4383_v51 }
 0x14c   :  { %v4394_v55 = vmul.f32 %v4380_v50, %v4386_v53  ;;  %v247_v56 = vpop.f32.mrb[2].mxu0 }
 0x14d   :  { %v331_v57 = vsub.f32 %v4383_v51, %v4390_v54  ;;  %v248_v58 = vadd.f32 %v247_v56, %v4369_v46  ;;  %v249_v59 = vpop.f32.mrb[3].mxu0 }
 0x14e   :  { %v332_v60 = vsub.f32 %v4386_v53, %v4394_v55  ;;  %v250_v61 = vadd.f32 %v249_v59, %v4372_v47 }
 0x14f   :  { %v301_v62 = vmul.f32 %v4376_v48, %v248_v58 }
 0x150   :  { %v302_v63 = vmul.f32 %v4380_v50, %v250_v61  ;;  %v253_v0 = vpop.f32.mrb[4].mxu0 }
 0x151   :  { %v333_v2 = vsub.f32 %v248_v58, %v301_v62  ;;  %v254_v3 = vadd.f32 %v253_v0, %v4369_v46  ;;  %v255_v4 = vpop.f32.mrb[5].mxu0 }
 0x152   :  { %v334_v5 = vsub.f32 %v250_v61, %v302_v63  ;;  %v256_v6 = vadd.f32 %v255_v4, %v4372_v47 }
 0x153   :  { %v303_v7 = vmul.f32 %v4376_v48, %v254_v3 }
 0x154   :  { %v304_v8 = vmul.f32 %v4380_v50, %v256_v6  ;;  %v259_v9 = vpop.f32.mrb[6].mxu0 }
 0x155   :  { %v335_v10 = vsub.f32 %v254_v3, %v303_v7  ;;  %v260_v12 = vadd.f32 %v259_v9, %v4369_v46  ;;  %v261_v13 = vpop.f32.mrb[7].mxu0 }
 0x156   :  { %v336_v14 = vsub.f32 %v256_v6, %v304_v8  ;;  %v262_v16 = vadd.f32 %v261_v13, %v4372_v47  ;;  %v449_v19 = vpop.f32.mrb[0].mxu1 }
 0x157   :  { %v305_v17 = vmul.f32 %v4376_v48, %v260_v12  ;;  %v451_v23 = vpop.f32.mrb[1].mxu1 }
 0x158   :  { %v306_v20 = vmul.f32 %v4380_v50, %v262_v16  ;;  %v265_v21 = vpop.f32.mrb[8].mxu0 }
 0x159   :  { %v337_v25 = vsub.f32 %v260_v12, %v305_v17  ;;  %v266_v26 = vadd.f32 %v265_v21, %v4369_v46  ;;  %v267_v27 = vpop.f32.mrb[9].mxu0 }
 0x15a   :  { %v338_v28 = vsub.f32 %v262_v16, %v306_v20  ;;  %v268_v30 = vadd.f32 %v267_v27, %v4372_v47 }
 0x15b   :  { %v307_v32 = vmul.f32 %v4376_v48, %v266_v26 }
 0x15c   :  { %v308_v33 = vmul.f32 %v4380_v50, %v268_v30  ;;  %v271_v35 = vpop.f32.mrb[10].mxu0 }
 0x15d   :  { %v339_v36 = vsub.f32 %v266_v26, %v307_v32  ;;  %v272_v37 = vadd.f32 %v271_v35, %v4369_v46  ;;  %v273_v38 = vpop.f32.mrb[11].mxu0  ;;  %v4417_v39 = vadd.f32 %v337_v25, %v307_v32 }
 0x15e   :  { %v340_v40 = vsub.f32 %v268_v30, %v308_v33  ;;  %v274_v41 = vadd.f32 %v273_v38, %v4372_v47  ;;  %v4420_v43 = vadd.f32 %v338_v28, %v308_v33 }
 0x15f   :  { %v309_v49 = vmul.f32 %v4376_v48, %v272_v37  ;;  %v4423_v52 = vadd.f32 %v339_v36, %v305_v17 }
 0x160   :  { %v310_v56 = vmul.f32 %v4380_v50, %v274_v41  ;;  %v277_v58 = vpop.f32.mrb[12].mxu0  ;;  %v4426_v59 = vadd.f32 %v340_v40, %v306_v20 }
 0x161   :  { %v341_v61 = vsub.f32 %v272_v37, %v309_v49  ;;  %v278_v0 = vadd.f32 %v277_v58, %v4369_v46  ;;  %v279_v3 = vpop.f32.mrb[13].mxu0  ;;  %v4429_v4 = vadd.f32 %v335_v10, %v309_v49 }
 0x162   :  { %v342_v6 = vsub.f32 %v274_v41, %v310_v56  ;;  %v280_v9 = vadd.f32 %v279_v3, %v4372_v47  ;;  %v4432_v12 = vadd.f32 %v336_v14, %v310_v56 }
 0x163   :  { %v311_v13 = vmul.f32 %v4376_v48, %v278_v0  ;;  %v4435_v16 = vadd.f32 %v341_v61, %v303_v7 }
 0x164   :  { %v312_v17 = vmul.f32 %v4380_v50, %v280_v9  ;;  %v283_v21 = vpop.f32.mrb[14].mxu0  ;;  %v4438_v20 = vadd.f32 %v342_v6, %v304_v8 }
 0x165   :  { %v343_v25 = vsub.f32 %v278_v0, %v311_v13  ;;  %v284_v26 = vadd.f32 %v283_v21, %v4369_v46  ;;  %v285_v27 = vpop.f32.mrb[15].mxu0  ;;  %v4441_v10 = vadd.f32 %v333_v2, %v311_v13 }
 0x166   :  { %v344_v28 = vsub.f32 %v280_v9, %v312_v17  ;;  %v286_v30 = vadd.f32 %v285_v27, %v4372_v47  ;;  %v4444_v14 = vadd.f32 %v334_v5, %v312_v17 }
 0x167   :  { %v313_v32 = vmul.f32 %v4376_v48, %v284_v26  ;;  %v570_v7 = vadd.f32 %v343_v25, %v301_v62 }
 0x168   :  { %v314_v33 = vmul.f32 %v4380_v50, %v286_v30  ;;  %v571_v35 = vadd.f32 %v344_v28, %v302_v63 }
 0x169   :  { %v345_v36 = vsub.f32 %v284_v26, %v313_v32  ;;  %v4451_v8 = vadd.f32 %v331_v57, %v313_v32 }
 0x16a   :  { %v346_v46 = vsub.f32 %v286_v30, %v314_v33  ;;  %v4456_v2 = vadd.f32 %v332_v60, %v314_v33 }
 0x16b   :  { %v458_v47 = vadd.f32 %v345_v36, %v4390_v54 }
 0x16c   :  { %v459_v5 = vadd.f32 %v346_v46, %v4394_v55 }
 0x16d   :  { %v460_v62 = vadd.f32 %v458_v47, %v449_v19 }
 0x16e   :  { %v461_v37 = vadd.f32 %v459_v5, %v451_v23 }
 0x16f   :  { %v3146_v51 = vmul.f32 -1.442695, %v460_v62 }
 0x170   :  { %3651 = vtanh.f32 %v461_v37  ;;  %v3147_v23 = vmul.f32 -1.442695, %v461_v37 }
 0x171   :  { %3653 = vpow2.f32 %v3146_v51 }
 0x17a   :  { %v3652_v63 = vpop.eup %3651 }
 0x17b   :  { %477 = vrot.lane.b32.xlu0 %v3652_v63, %s4049_s2  ;;  %v3654_v57 = vpop.eup %3653 }
 0x17c   :  { %v468_v38 = vadd.f32 1.0, %v3654_v57 }
 0x17e   :  { %3655 = vrcp.f32 %v468_v38 }
 0x188   :  { %v3656_v40 = vpop.eup %3655 }
 0x189   :  { %v475_v54 = vmul.f32 0.0, %v3656_v40 }
 0x1ed   :  { %v478_v53 = vpop.permute.xlu0 %477 }
 0x1ee   :  { %v480_v60 = vmul.f32 %v3656_v40, %v478_v53 }
 0x1f0   :  { %482 = vrot.lane.b32.xlu0 %v480_v60, %s4049_s2 }
 0x262   :  { %v483_v41 = vpop.permute.xlu0 %482 }
 0x263   :  { %v485_v55 = vadd.f32 %v483_v41, %v475_v54 }
 0x265   :  { %3657 = vtanh.f32 %v485_v55 }
 0x266   :  { %3659 = vpow2.f32 %v3147_v23 }
 0x26f   :  { %v3658_v19 = vpop.eup %3657 }
 0x270   :  { %488 = vrot.lane.b32.xlu1 %v3658_v19, %s4049_s2  ;;  %v3660_v49 = vpop.eup %3659 }
 0x271   :  { %v469_v56 = vadd.f32 1.0, %v3660_v49 }
 0x273   :  { %3661 = vrcp.f32 %v469_v56 }
 0x27d   :  { %v3662_v58 = vpop.eup %3661 }
 0x2e2   :  { %v489_v61 = vpop.permute.xlu1 %488 }
 0x2e3   :  { %v4463_v0 = vmul.f32 %v3662_v58, %v489_v61 }
 0x2e5   :  { %3148 = vmatmul.mubr.msk.f32.vlgmr.msra.gmra.mrb[2].mxu1 %vm379_vm1, %v4463_v0 }
 0x2e6   :  { %3370 = vmatpush1.bf16.msra.mxu1 %v4247_v15  ;;  %783 = vmatprep.mubr.f32.mxu1 %v4048_v1 }
 0x2e7   :  { %3372 = vmatprep.subr.bf16.mxu1 %v4256_v18 }
 0x2ea   :  { %3374 = vmatpush1.bf16.msra.mxu1 %v4270_v22 }
 0x2eb   :  { %3376 = vmatprep.subr.bf16.mxu1 %v4277_v24 }
 0x2ee   :  { %3378 = vmatpush1.bf16.msra.mxu1 %v4295_v29 }
 0x2ef   :  { %3380 = vmatprep.subr.bf16.mxu1 %v4302_v31 }
 0x2f2   :  { %3382 = vmatpush1.bf16.msra.mxu1 %v4314_v34 }
 0x2f3   :  { %3400 = vmatprep.subr.bf16.mxu1 %v4236_v11 }
 0x3b8   :  { %v561_v3 = vpop.f32.mrb[2].mxu1 }
 0x3b9   :  { %v572_v6 = vadd.f32 %v570_v7, %v561_v3  ;;  %v563_v9 = vpop.f32.mrb[3].mxu1 }
 0x3ba   :  { %v573_v13 = vadd.f32 %v571_v35, %v563_v9 }
 0x3bb   :  { %v3149_v21 = vmul.f32 -1.442695, %v572_v6 }
 0x3bc   :  { %3663 = vtanh.f32 %v573_v13  ;;  %v3150_v35 = vmul.f32 -1.442695, %v573_v13 }
 0x3bd   :  { %3665 = vpow2.f32 %v3149_v21 }
 0x3c6   :  { %v3664_v17 = vpop.eup %3663 }
 0x3c7   :  { %589 = vrot.lane.b32.xlu1 %v3664_v17, %s4049_s2  ;;  %v3666_v25 = vpop.eup %3665 }
 0x3c8   :  { %v580_v26 = vadd.f32 1.0, %v3666_v25 }
 0x3ca   :  { %3667 = vrcp.f32 %v580_v26 }
 0x3d4   :  { %v3668_v27 = vpop.eup %3667 }
 0x3d5   :  { %v587_v32 = vmul.f32 %v3668_v27, %v485_v55 }
 0x439   :  { %v590_v28 = vpop.permute.xlu1 %589 }
 0x43a   :  { %v592_v30 = vmul.f32 %v3668_v27, %v590_v28 }
 0x43c   :  { %594 = vrot.lane.b32.xlu0 %v592_v30, %s4049_s2 }
 0x4ae   :  { %v595_v33 = vpop.permute.xlu0 %594 }
 0x4af   :  { %v597_v36 = vadd.f32 %v595_v33, %v587_v32 }
 0x4b1   :  { %3669 = vtanh.f32 %v597_v36 }
 0x4b2   :  { %3671 = vpow2.f32 %v3150_v35 }
 0x4bb   :  { %v3670_v7 = vpop.eup %3669 }
 0x4bc   :  { %600 = vrot.lane.b32.xlu1 %v3670_v7, %s4049_s2  ;;  %v3672_v46 = vpop.eup %3671 }
 0x4bd   :  { %v581_v47 = vadd.f32 1.0, %v3672_v46 }
 0x4bf   :  { %3673 = vrcp.f32 %v581_v47 }
 0x4c9   :  { %v3674_v5 = vpop.eup %3673 }
 0x52e   :  { %v601_v62 = vpop.permute.xlu1 %600 }
 0x52f   :  { %v4479_v37 = vmul.f32 %v3674_v5, %v601_v62 }
 0x531   :  { %3151 = vmatmul.mubr.msk.f32.vlgmr.msra.gmra.mrb[16].mxu0 %vm379_vm1, %v4479_v37 }
 0x532   :  { %3386 = vmatpush1.bf16.msra.mxu0 %v4247_v15  ;;  %895 = vmatprep.mubr.f32.mxu0 %v4048_v1 }
 0x533   :  { %3388 = vmatprep.subr.bf16.mxu0 %v4256_v18 }
 0x536   :  { %3390 = vmatpush1.bf16.msra.mxu0 %v4270_v22 }
 0x537   :  { %3392 = vmatprep.subr.bf16.mxu0 %v4277_v24 }
 0x53a   :  { %3394 = vmatpush1.bf16.msra.mxu0 %v4295_v29 }
 0x53b   :  { %3396 = vmatprep.subr.bf16.mxu0 %v4302_v31 }
 0x53e   :  { %3398 = vmatpush1.bf16.msra.mxu0 %v4314_v34 }
 0x53f   :  { %3416 = vmatprep.subr.bf16.mxu0 %v4236_v11 }
 0x604   :  { %v673_v63 = vpop.f32.mrb[16].mxu0 }
 0x605   :  { %v684_v51 = vadd.f32 %v4435_v16, %v673_v63  ;;  %v675_v57 = vpop.f32.mrb[17].mxu0 }
 0x606   :  { %v685_v38 = vadd.f32 %v4438_v20, %v675_v57 }
 0x607   :  { %v3152_v53 = vmul.f32 -1.442695, %v684_v51 }
 0x608   :  { %3675 = vtanh.f32 %v685_v38  ;;  %v3153_v20 = vmul.f32 -1.442695, %v685_v38 }
 0x609   :  { %3677 = vpow2.f32 %v3152_v53 }
 0x612   :  { %v3676_v40 = vpop.eup %3675 }
 0x613   :  { %701 = vrot.lane.b32.xlu0 %v3676_v40, %s4049_s2  ;;  %v3678_v60 = vpop.eup %3677 }
 0x614   :  { %v692_v54 = vadd.f32 1.0, %v3678_v60 }
 0x616   :  { %3679 = vrcp.f32 %v692_v54 }
 0x620   :  { %v3680_v41 = vpop.eup %3679 }
 0x621   :  { %v699_v23 = vmul.f32 %v3680_v41, %v597_v36 }
 0x685   :  { %v702_v55 = vpop.permute.xlu0 %701 }
 0x686   :  { %v704_v19 = vmul.f32 %v3680_v41, %v702_v55 }
 0x688   :  { %706 = vrot.lane.b32.xlu1 %v704_v19, %s4049_s2 }
 0x6fa   :  { %v707_v49 = vpop.permute.xlu1 %706 }
 0x6fb   :  { %v709_v16 = vadd.f32 %v707_v49, %v699_v23 }
 0x6fd   :  { %3681 = vtanh.f32 %v709_v16 }
 0x6fe   :  { %3683 = vpow2.f32 %v3153_v20 }
 0x707   :  { %v3682_v56 = vpop.eup %3681 }
 0x708   :  { %712 = vrot.lane.b32.xlu0 %v3682_v56, %s4049_s2  ;;  %v3684_v58 = vpop.eup %3683 }
 0x709   :  { %v693_v61 = vadd.f32 1.0, %v3684_v58 }
 0x70b   :  { %3685 = vrcp.f32 %v693_v61  ;;  %v1277_v61 = vsub.f32 1.0, %v4366_v45 }
 0x715   :  { %v3686_v3 = vpop.eup %3685 }
 0x77a   :  { %v713_v6 = vpop.permute.xlu0 %712 }
 0x77b   :  { %v4497_v9 = vmul.f32 %v3686_v3, %v713_v6 }
 0x77d   :  { %3154 = vmatmul.mubr.msk.f32.vlgmr.msra.gmra.mrb[4].mxu1 %vm379_vm1, %v4497_v9 }
 0x77e   :  { %3402 = vmatpush1.bf16.msra.mxu1 %v4247_v15  ;;  %1007 = vmatprep.mubr.f32.mxu1 %v4048_v1 }
 0x77f   :  { %3404 = vmatprep.subr.bf16.mxu1 %v4256_v18 }
 0x782   :  { %3406 = vmatpush1.bf16.msra.mxu1 %v4270_v22 }
 0x783   :  { %3408 = vmatprep.subr.bf16.mxu1 %v4277_v24 }
 0x786   :  { %3410 = vmatpush1.bf16.msra.mxu1 %v4295_v29 }
 0x787   :  { %3412 = vmatprep.subr.bf16.mxu1 %v4302_v31 }
 0x78a   :  { %3414 = vmatpush1.bf16.msra.mxu1 %v4314_v34 }
 0x78b   :  { %3432 = vmatprep.subr.bf16.mxu1 %v4236_v11 }
 0x850   :  { %v785_v13 = vpop.f32.mrb[4].mxu1 }
 0x851   :  { %v796_v17 = vadd.f32 %v4423_v52, %v785_v13  ;;  %v787_v21 = vpop.f32.mrb[5].mxu1  ;;  %v4531_v13 = vrot.slane %v1277_v61, %v4359_v42 }
 0x852   :  { %v797_v25 = vadd.f32 %v4426_v59, %v787_v21 }
 0x853   :  { %v3155_v27 = vmul.f32 -1.442695, %v796_v17 }
 0x854   :  { %3687 = vtanh.f32 %v797_v25  ;;  %v3156_v59 = vmul.f32 -1.442695, %v797_v25 }
 0x855   :  { %3689 = vpow2.f32 %v3155_v27 }
 0x85e   :  { %v3688_v26 = vpop.eup %3687 }
 0x85f   :  { %813 = vrot.lane.b32.xlu1 %v3688_v26, %s4049_s2  ;;  %v3690_v28 = vpop.eup %3689 }
 0x860   :  { %v804_v30 = vadd.f32 1.0, %v3690_v28 }
 0x862   :  { %3691 = vrcp.f32 %v804_v30 }
 0x86c   :  { %v3692_v32 = vpop.eup %3691 }
 0x86d   :  { %v811_v11 = vmul.f32 %v3692_v32, %v709_v16 }
 0x8d1   :  { %v814_v33 = vpop.permute.xlu1 %813 }
 0x8d2   :  { %v816_v36 = vmul.f32 %v3692_v32, %v814_v33 }
 0x8d4   :  { %818 = vrot.lane.b32.xlu0 %v816_v36, %s4049_s2 }
 0x946   :  { %v819_v7 = vpop.permute.xlu0 %818 }
 0x947   :  { %v821_v52 = vadd.f32 %v819_v7, %v811_v11 }
 0x949   :  { %3693 = vtanh.f32 %v821_v52 }
 0x94a   :  { %3695 = vpow2.f32 %v3156_v59 }
 0x953   :  { %v3694_v35 = vpop.eup %3693 }
 0x954   :  { %824 = vrot.lane.b32.xlu1 %v3694_v35, %s4049_s2  ;;  %v3696_v46 = vpop.eup %3695 }
 0x955   :  { %v805_v47 = vadd.f32 1.0, %v3696_v46 }
 0x957   :  { %3697 = vrcp.f32 %v805_v47 }
 0x961   :  { %v3698_v5 = vpop.eup %3697 }
 0x9c6   :  { %v825_v62 = vpop.permute.xlu1 %824 }
 0x9c7   :  { %v827_v63 = vmul.f32 %v3698_v5, %v825_v62  ;;  %v1291_v62 = vmul.f32 %v4497_v9, %v4376_v48 }
 0x9c9   :  { %3157 = vmatmul.mubr.msk.f32.vlgmr.msra.gmra.mrb[18].mxu0 %vm379_vm1, %v827_v63  ;;  %v1295_v21 = vmul.f32 %v827_v63, %v4376_v48  ;;  %v1300_v25 = vmul.f32 %v4531_v13, %v827_v63  ;;  %v1304_v63 = vmul.f32 %v4531_v13, %v4497_v9 }
 0x9ca   :  { %3418 = vmatpush1.bf16.msra.mxu0 %v4247_v15  ;;  %1119 = vmatprep.mubr.f32.mxu0 %v4048_v1 }
 0x9cb   :  { %3420 = vmatprep.subr.bf16.mxu0 %v4256_v18 }
 0x9ce   :  { %3422 = vmatpush1.bf16.msra.mxu0 %v4270_v22 }
 0x9cf   :  { %3424 = vmatprep.subr.bf16.mxu0 %v4277_v24 }
 0x9d2   :  { %3426 = vmatpush1.bf16.msra.mxu0 %v4295_v29 }
 0x9d3   :  { %3428 = vmatprep.subr.bf16.mxu0 %v4302_v31 }
 0x9d6   :  { %3430 = vmatpush1.bf16.msra.mxu0 %v4314_v34 }
 0xa9c   :  { %v897_v51 = vpop.f32.mrb[18].mxu0 }
 0xa9d   :  { %v908_v57 = vadd.f32 %v4417_v39, %v897_v51  ;;  %v899_v38 = vpop.f32.mrb[19].mxu0 }
 0xa9e   :  { %v909_v40 = vadd.f32 %v4420_v43, %v899_v38 }
 0xa9f   :  { %v3158_v60 = vmul.f32 -1.442695, %v908_v57 }
 0xaa0   :  { %3699 = vtanh.f32 %v909_v40  ;;  %v3159_v43 = vmul.f32 -1.442695, %v909_v40 }
 0xaa1   :  { %3701 = vpow2.f32 %v3158_v60 }
 0xaaa   :  { %v3700_v53 = vpop.eup %3699 }
 0xaab   :  { %925 = vrot.lane.b32.xlu0 %v3700_v53, %s4049_s2  ;;  %v3702_v54 = vpop.eup %3701 }
 0xaac   :  { %v916_v41 = vadd.f32 1.0, %v3702_v54 }
 0xaae   :  { %3703 = vrcp.f32 %v916_v41 }
 0xab8   :  { %v3704_v55 = vpop.eup %3703 }
 0xab9   :  { %v923_v49 = vmul.f32 %v3704_v55, %v821_v52 }
 0xb1d   :  { %v926_v19 = vpop.permute.xlu0 %925 }
 0xb1e   :  { %v928_v23 = vmul.f32 %v3704_v55, %v926_v19 }
 0xb20   :  { %930 = vrot.lane.b32.xlu1 %v928_v23, %s4049_s2 }
 0xb92   :  { %v931_v16 = vpop.permute.xlu1 %930 }
 0xb93   :  { %v933_v39 = vadd.f32 %v931_v16, %v923_v49 }
 0xb95   :  { %3705 = vtanh.f32 %v933_v39 }
 0xb96   :  { %3707 = vpow2.f32 %v3159_v43 }
 0xb9f   :  { %v3706_v56 = vpop.eup %3705 }
 0xba0   :  { %936 = vrot.lane.b32.xlu0 %v3706_v56, %s4049_s2  ;;  %v3708_v20 = vpop.eup %3707 }
 0xba1   :  { %v917_v58 = vadd.f32 1.0, %v3708_v20 }
 0xba3   :  { %3709 = vrcp.f32 %v917_v58 }
 0xbad   :  { %v3710_v3 = vpop.eup %3709 }
 0xc12   :  { %v937_v6 = vpop.permute.xlu0 %936 }
 0xc13   :  { %v939_v17 = vmul.f32 %v3710_v3, %v937_v6 }
 0xc15   :  { %v1296_v26 = vmul.f32 %v4531_v13, %v939_v17  ;;  %v1299_v27 = vmul.f32 %v939_v17, %v4376_v48  ;;  %3160 = vmatmul.mubr.msk.f32.vlgmr.msra.gmra.mrb[6].mxu1 %vm379_vm1, %v939_v17 }
 0xc16   :  { %3434 = vmatpush1.bf16.msra.mxu1 %v4247_v15  ;;  %1231 = vmatprep.mubr.f32.mxu1 %v4048_v1 }
 0xc17   :  { %v1297_v45 = vadd.f32 %v1296_v26, %v1295_v21  ;;  %v1301_v28 = vadd.f32 %v1300_v25, %v1299_v27  ;;  %3436 = vmatprep.subr.bf16.mxu1 %v4256_v18  ;;  %v1287_v21 = vmul.f32 %v4479_v37, %v4376_v48  ;;  %v1308_v25 = vmul.f32 %v4531_v13, %v4479_v37 }
 0xc19   :  { %1298 = vst.msk [vmem:[#allocation4 + $0x18] sm:$0xff] %vm379_vm1, %v1297_v45  ;;  %1302 = vst.msk [vmem:[#allocation4 + $0x20] sm:$0xff] %vm379_vm1, %v1301_v28 }
 0xc1a   :  { %3438 = vmatpush1.bf16.msra.mxu1 %v4270_v22 }
 0xc1b   :  { %3440 = vmatprep.subr.bf16.mxu1 %v4277_v24 }
 0xc1e   :  { %3442 = vmatpush1.bf16.msra.mxu1 %v4295_v29 }
 0xc1f   :  { %3444 = vmatprep.subr.bf16.mxu1 %v4302_v31 }
 0xc22   :  { %3446 = vmatpush1.bf16.msra.mxu1 %v4314_v34 }
 0xce8   :  { %v1009_v15 = vpop.f32.mrb[6].mxu1 }
 0xce9   :  { %v1020_v30 = vadd.f32 %v4429_v4, %v1009_v15  ;;  %v1011_v32 = vpop.f32.mrb[7].mxu1 }
 0xcea   :  { %v1021_v18 = vadd.f32 %v4432_v12, %v1011_v32 }
 0xceb   :  { %v3161_v36 = vmul.f32 -1.442695, %v1020_v30 }
 0xcec   :  { %3711 = vtanh.f32 %v1021_v18  ;;  %v3162_v12 = vmul.f32 -1.442695, %v1021_v18 }
 0xced   :  { %3713 = vpow2.f32 %v3161_v36 }
 0xcf6   :  { %v3712_v33 = vpop.eup %3711 }
 0xcf7   :  { %1037 = vrot.lane.b32.xlu1 %v3712_v33, %s4049_s2  ;;  %v3714_v22 = vpop.eup %3713 }
 0xcf8   :  { %v1028_v24 = vadd.f32 1.0, %v3714_v22 }
 0xcfa   :  { %3715 = vrcp.f32 %v1028_v24 }
 0xd04   :  { %v3716_v29 = vpop.eup %3715 }
 0xd05   :  { %v1035_v34 = vmul.f32 %v3716_v29, %v933_v39 }
 0xd69   :  { %v1038_v11 = vpop.permute.xlu1 %1037 }
 0xd6a   :  { %v1040_v31 = vmul.f32 %v3716_v29, %v1038_v11 }
 0xd6c   :  { %1042 = vrot.lane.b32.xlu0 %v1040_v31, %s4049_s2  ;;  %v1323_v31 = vld [vmem:[%s5127_s5] sm:$0xff] }
 0xdde   :  { %v1043_v7 = vpop.permute.xlu0 %1042 }
 0xddf   :  { %v1045_v4 = vadd.f32 %v1043_v7, %v1035_v34  ;;  %v1325_v7 = vld [vmem:[%s5127_s5 + $0x10] sm:$0xff] }
 0xde1   :  { %3717 = vtanh.f32 %v1045_v4 }
 0xde2   :  { %3719 = vpow2.f32 %v3162_v12 }
 0xdeb   :  { %v3718_v52 = vpop.eup %3717 }
 0xdec   :  { %1048 = vrot.lane.b32.xlu1 %v3718_v52, %s4049_s2  ;;  %v3720_v35 = vpop.eup %3719 }
 0xded   :  { %v1029_v59 = vadd.f32 1.0, %v3720_v35  ;;  %v1328_v35 = vld [vmem:[%s5127_s5 + $0x28] sm:$0xff] }
 0xdef   :  { %3721 = vrcp.f32 %v1029_v59  ;;  %v1330_v59 = vld [vmem:[%s5127_s5 + $0x38] sm:$0xff] }
 0xdf9   :  { %v3722_v46 = vpop.eup %3721 }
 0xe5e   :  { %v1049_v47 = vpop.permute.xlu1 %1048 }
 0xe5f   :  { %v1051_v5 = vmul.f32 %v3722_v46, %v1049_v47  ;;  %v3451_v47 = vpack.c.bf16 %v1330_v59, %v1328_v35  ;;  %v1318_v59 = vld [vmem:[#allocation4 + $0x18] sm:$0xff] }
 0xe61   :  { %v1292_v51 = vmul.f32 %v4531_v13, %v1051_v5  ;;  %v1303_v57 = vmul.f32 %v1051_v5, %v4376_v48  ;;  %3163 = vmatmul.mubr.msk.f32.vlgmr.msra.gmra.mrb[20].mxu0 %vm379_vm1, %v1051_v5  ;;  %v1327_v5 = vld [vmem:[%s5127_s5 + $0x20] sm:$0xff] }
 0xe62   :  { %1439 = vmatprep.mubr.f32.mxu0 %v4048_v1 }
 0xe63   :  { %v1293_v38 = vadd.f32 %v1292_v51, %v1291_v62  ;;  %v1305_v40 = vadd.f32 %v1304_v63, %v1303_v57  ;;  %v1329_v62 = vld [vmem:[%s5127_s5 + $0x30] sm:$0xff]  ;;  %v1332_v51 = vld [vmem:[%s5127_s5 + $0x48] sm:$0xff]  ;;  %v1334_v57 = vld [vmem:[%s5127_s5 + $0x58] sm:$0xff] }
 0xe64   :  { %v3453_v63 = vpack.c.bf16 %v1329_v62, %v1327_v5 }
 0xe65   :  { %1294 = vst.msk [vmem:[#allocation4 + $0x10] sm:$0xff] %vm379_vm1, %v1293_v38  ;;  %1306 = vst.msk [vmem:[#allocation4 + $0x28] sm:$0xff] %vm379_vm1, %v1305_v40  ;;  %v3455_v38 = vpack.c.bf16 %v1334_v57, %v1332_v51  ;;  %v1331_v40 = vld [vmem:[%s5127_s5 + $0x40] sm:$0xff] }
 0xe66   :  { %v1339_v57 = vld [vmem:[%s5128_s6] sm:$0x3] }
 0xe6c   :  { %v1317_v35 = vld [vmem:[#allocation4 + $0x10] sm:$0xff] }
 0xf34   :  { %v1121_v53 = vpop.f32.mrb[20].mxu0 }
 0xf35   :  { %v1132_v60 = vadd.f32 %v4441_v10, %v1121_v53  ;;  %v1123_v54 = vpop.f32.mrb[21].mxu0  ;;  %v1333_v53 = vld [vmem:[%s5127_s5 + $0x50] sm:$0xff] }
 0xf36   :  { %v1133_v9 = vadd.f32 %v4444_v14, %v1123_v54  ;;  %v1336_v54 = vld [vmem:[%s5127_s5 + $0x68] sm:$0xff] }
 0xf37   :  { %v3164_v55 = vmul.f32 -1.442695, %v1132_v60  ;;  %v3457_v60 = vpack.c.bf16 %v1333_v53, %v1331_v40  ;;  %v4762_v40 = vrot.slane %v1339_v57, %v4364_v44 }
 0xf38   :  { %3723 = vtanh.f32 %v1133_v9  ;;  %v3165_v14 = vmul.f32 -1.442695, %v1133_v9  ;;  %v1338_v9 = vld [vmem:[%s5127_s5 + $0x78] sm:$0xff] }
 0xf39   :  { %3725 = vpow2.f32 %v3164_v55  ;;  %v3459_v55 = vpack.c.bf16 %v1338_v9, %v1336_v54 }
 0xf42   :  { %v3724_v41 = vpop.eup %3723 }
 0xf43   :  { %1149 = vrot.lane.b32.xlu0 %v3724_v41, %s4049_s2  ;;  %v3726_v19 = vpop.eup %3725  ;;  %v1335_v41 = vld [vmem:[%s5127_s5 + $0x60] sm:$0xff] }
 0xf44   :  { %v1140_v23 = vadd.f32 1.0, %v3726_v19  ;;  %v1337_v19 = vld [vmem:[%s5127_s5 + $0x70] sm:$0xff] }
 0xf46   :  { %3727 = vrcp.f32 %v1140_v23  ;;  %v3461_v23 = vpack.c.bf16 %v1337_v19, %v1335_v41 }
 0xf50   :  { %v3728_v49 = vpop.eup %3727 }
 0xf51   :  { %v1147_v56 = vmul.f32 %v3728_v49, %v1045_v4  ;;  %v3449_v4 = vpack.c.bf16 %v1325_v7, %v1323_v31  ;;  %v1276_v31 = vmul.f32 %v4463_v0, %v4376_v48 }
 0xfb5   :  { %v1150_v16 = vpop.permute.xlu0 %1149 }
 0xfb6   :  { %v1152_v39 = vmul.f32 %v3728_v49, %v1150_v16  ;;  %v1553_v16 = vld [vmem:[%s5129_s7 + $0x8] sm:$0xff] }
 0xfb8   :  { %1154 = vrot.lane.b32.xlu1 %v1152_v39, %s4049_s2  ;;  %v1555_v39 = vld [vmem:[%s5129_s7 + $0x18] sm:$0xff] }
0x102a   :  { %v1155_v43 = vpop.permute.xlu1 %1154 }
0x102b   :  { %v1157_v10 = vadd.f32 %v1155_v43, %v1147_v56  ;;  %v4640_v56 = vpack.c.bf16 %v1555_v39, %v1553_v16  ;;  %v1552_v43 = vld [vmem:[%s5129_s7] sm:$0xff] }
0x102d   :  { %3729 = vtanh.f32 %v1157_v10  ;;  %3464 = vmatprep.subr.bf16.mxu1 %v4640_v56 }
0x102e   :  { %3731 = vpow2.f32 %v3165_v14  ;;  %v1557_v14 = vld [vmem:[%s5129_s7 + $0x28] sm:$0xff] }
0x1037   :  { %v3730_v20 = vpop.eup %3729 }
0x1038   :  { %1160 = vrot.lane.b32.xlu0 %v3730_v20, %s4049_s2  ;;  %v3732_v58 = vpop.eup %3731 }
0x1039   :  { %v1141_v61 = vadd.f32 1.0, %v3732_v58  ;;  %v1559_v58 = vld [vmem:[%s5129_s7 + $0x38] sm:$0xff] }
0x103b   :  { %3733 = vrcp.f32 %v1141_v61  ;;  %v4659_v61 = vpack.c.bf16 %v1559_v58, %v1557_v14 }
0x1045   :  { %v3734_v3 = vpop.eup %3733 }
0x10aa   :  { %v1161_v6 = vpop.permute.xlu0 %1160 }
0x10ab   :  { %v1163_v17 = vmul.f32 %v3734_v3, %v1161_v6  ;;  %v1556_v3 = vld [vmem:[%s5129_s7 + $0x20] sm:$0xff]  ;;  %v1558_v6 = vld [vmem:[%s5129_s7 + $0x30] sm:$0xff] }
0x10ad   :  { %v1288_v26 = vmul.f32 %v4531_v13, %v1163_v17  ;;  %v1307_v27 = vmul.f32 %v1163_v17, %v4376_v48  ;;  %3166 = vmatmul.mubr.msk.f32.vlgmr.msra.gmra.mrb[8].mxu1 %vm379_vm1, %v1163_v17  ;;  %v4667_v17 = vpack.c.bf16 %v1558_v6, %v1556_v3 }
0x10ae   :  { %1632 = vmatprep.mubr.f32.mxu1 %v4048_v1 }
0x10af   :  { %v1289_v45 = vadd.f32 %v1288_v26, %v1287_v21  ;;  %v1309_v28 = vadd.f32 %v1308_v25, %v1307_v27  ;;  %v1561_v21 = vld [vmem:[%s5129_s7 + $0x48] sm:$0xff]  ;;  %v1563_v25 = vld [vmem:[%s5129_s7 + $0x58] sm:$0xff]  ;;  %v1560_v27 = vld [vmem:[%s5129_s7 + $0x40] sm:$0xff] }
0x10b0   :  { %v4677_v26 = vpack.c.bf16 %v1563_v25, %v1561_v21 }
0x10b1   :  { %1290 = vst.msk [vmem:[#allocation4 + $0x8] sm:$0xff] %vm379_vm1, %v1289_v45  ;;  %1310 = vst.msk [vmem:[#allocation4 + $0x30] sm:$0xff] %vm379_vm1, %v1309_v28  ;;  %v1562_v45 = vld [vmem:[%s5129_s7 + $0x50] sm:$0xff] }
0x10b2   :  { %v4685_v28 = vpack.c.bf16 %v1562_v45, %v1560_v27 }
0x10b8   :  { %v1321_v5 = vld [vmem:[#allocation4 + $0x30] sm:$0xff] }
0x1180   :  { %v1233_v15 = vpop.f32.mrb[8].mxu1 }
0x1181   :  { %v1244_v30 = vadd.f32 %v4451_v8, %v1233_v15  ;;  %v1235_v32 = vpop.f32.mrb[9].mxu1  ;;  %v1324_v8 = vld [vmem:[%s5127_s5 + $0x8] sm:$0xff] }
0x1182   :  { %v4580_v37 = vadd.f32 %v4456_v2, %v1235_v32  ;;  %v1326_v2 = vld [vmem:[%s5127_s5 + $0x18] sm:$0xff]  ;;  %v1565_v15 = vld [vmem:[%s5129_s7 + $0x68] sm:$0xff]  ;;  %v1564_v32 = vld [vmem:[%s5129_s7 + $0x60] sm:$0xff]  ;;  %s4053_s5 = smov 7  }
0x1183   :  { %v3167_v33 = vmul.f32 -1.442695, %v1244_v30  ;;  %v3447_v34 = vpack.c.bf16 %v1326_v2, %v1324_v8  ;;  %v1567_v30 = vld [vmem:[%s5129_s7 + $0x78] sm:$0xff] }
0x1184   :  { %3735 = vtanh.f32 %v4580_v37 }
0x1185   :  { %3737 = vpow2.f32 %v3167_v33  ;;  %3448 = vmatprep.subr.bf16.mxu0 %v3447_v34  ;;  %v1566_v33 = vld [vmem:[%s5129_s7 + $0x70] sm:$0xff]  ;;  %v1312_v34 = vmul.f32 %v4531_v13, %v4463_v0  ;;  %v1316_v0 = vld [vmem:[#allocation4 + $0x8] sm:$0xff] }
0x1186   :  { %3450 = vmatpush1.bf16.msra.mxu0 %v3449_v4 }
0x1187   :  { %3452 = vmatprep.subr.bf16.mxu0 %v3451_v47  ;;  %v1320_v47 = vld [vmem:[#allocation4 + $0x28] sm:$0xff] }
0x118a   :  { %3454 = vmatpush1.bf16.msra.mxu0 %v3453_v63 }
0x118b   :  { %3456 = vmatprep.subr.bf16.mxu0 %v3455_v38  ;;  %v4759_v38 = vrot.slane %v1339_v57, %v4359_v42 }
0x118e   :  { %v3736_v18 = vpop.eup %3735  ;;  %3458 = vmatpush1.bf16.msra.mxu0 %v3457_v60 }
0x118f   :  { %1261 = vrot.lane.b32.xlu1 %v3736_v18, %s4049_s2  ;;  %v3738_v36 = vpop.eup %3737  ;;  %3460 = vmatprep.subr.bf16.mxu0 %v3459_v55  ;;  %v4698_v18 = vpack.c.bf16 %v1567_v30, %v1565_v15 }
0x1190   :  { %v1252_v22 = vadd.f32 1.0, %v3738_v36  ;;  %v4703_v36 = vpack.c.bf16 %v1566_v33, %v1564_v32 }
0x1192   :  { %3739 = vrcp.f32 %v1252_v22  ;;  %3462 = vmatpush1.bf16.msra.mxu0 %v3461_v23  ;;  %v3168_v22 = vmul.f32 -1.442695, %v4580_v37 }
0x1193   :  { %3496 = vmatprep.subr.bf16.mxu0 %v4640_v56 }
0x119c   :  { %v3740_v24 = vpop.eup %3739 }
0x119d   :  { %v1259_v52 = vmul.f32 %v3740_v24, %v1157_v10  ;;  %v1554_v10 = vld [vmem:[%s5129_s7 + $0x10] sm:$0xff] }
0x119e   :  { %v4648_v20 = vpack.c.bf16 %v1554_v10, %v1552_v43 }
0x11a0   :  { %3466 = vmatpush1.bf16.msra.mxu1 %v4648_v20 }
0x11a1   :  { %3468 = vmatprep.subr.bf16.mxu1 %v4659_v61 }
0x11a4   :  { %3470 = vmatpush1.bf16.msra.mxu1 %v4667_v17 }
0x11a5   :  { %3472 = vmatprep.subr.bf16.mxu1 %v4677_v26 }
0x11a8   :  { %3474 = vmatpush1.bf16.msra.mxu1 %v4685_v28 }
0x11a9   :  { %3476 = vmatprep.subr.bf16.mxu1 %v4698_v18 }
0x11ac   :  { %3478 = vmatpush1.bf16.msra.mxu1 %v4703_v36 }
0x11ad   :  { %3480 = vmatprep.subr.bf16.mxu1 %v4640_v56 }
0x11af   :  { %1633 = vmatmul.mubr.f32.vlgmr.msra.gmra.mrb[10].mxu1 %v4048_v1 }
0x11b0   :  { %3482 = vmatpush1.bf16.msra.mxu1 %v4648_v20  ;;  %1744 = vmatprep.mubr.f32.mxu1 %v4048_v1 }
0x11b1   :  { %3484 = vmatprep.subr.bf16.mxu1 %v4659_v61 }
0x11b4   :  { %3486 = vmatpush1.bf16.msra.mxu1 %v4667_v17 }
0x11b5   :  { %3488 = vmatprep.subr.bf16.mxu1 %v4677_v26 }
0x11b8   :  { %3490 = vmatpush1.bf16.msra.mxu1 %v4685_v28 }
0x11b9   :  { %3492 = vmatprep.subr.bf16.mxu1 %v4698_v18 }
0x11bc   :  { %3494 = vmatpush1.bf16.msra.mxu1 %v4703_v36 }
0x11bd   :  { %3512 = vmatprep.subr.bf16.mxu1 %v4640_v56 }
0x1201   :  { %v1262_v29 = vpop.permute.xlu1 %1261 }
0x1202   :  { %v1264_v11 = vmul.f32 %v3740_v24, %v1262_v29 }
0x1204   :  { %1266 = vrot.lane.b32.xlu0 %v1264_v11, %s4049_s2 }
0x1276   :  { %v1267_v12 = vpop.permute.xlu0 %1266 }
0x1277   :  { %v1269_v46 = vadd.f32 %v1267_v12, %v1259_v52 }
0x1279   :  { %3741 = vtanh.f32 %v1269_v46  ;;  %v1319_v46 = vld [vmem:[#allocation4 + $0x20] sm:$0xff] }
0x127a   :  { %3743 = vpow2.f32 %v3168_v22 }
0x1282   :  { %v4751_v63 = vpop.f32.mrb[10].mxu1 }
0x1283   :  { %v3742_v49 = vpop.eup %3741  ;;  %v4753_v51 = vpop.f32.mrb[11].mxu1 }
0x1284   :  { %1272 = vrot.lane.b32.xlu1 %v3742_v49, %s4049_s2  ;;  %v3744_v24 = vpop.eup %3743 }
0x1285   :  { %v1253_v29 = vadd.f32 1.0, %v3744_v24 }
0x1287   :  { %3745 = vrcp.f32 %v1253_v29 }
0x1291   :  { %v3746_v11 = vpop.eup %3745 }
0x12f6   :  { %v1273_v8 = vpop.permute.xlu1 %1272 }
0x12f7   :  { %v1275_v2 = vmul.f32 %v3746_v11, %v1273_v8 }
0x12f9   :  { %v1284_v7 = vmul.f32 %v4531_v13, %v1275_v2  ;;  %v1311_v4 = vmul.f32 %v1275_v2, %v4376_v48 }
0x12fb   :  { %v1285_v52 = vadd.f32 %v1284_v7, %v1276_v31  ;;  %v1313_v12 = vadd.f32 %v1312_v34, %v1311_v4 }
0x12fd   :  { %1286 = vst.msk [vmem:[#allocation4] sm:$0xff] %vm379_vm1, %v1285_v52  ;;  %1314 = vst.msk [vmem:[#allocation4 + $0x38] sm:$0xff] %vm379_vm1, %v1313_v12 }
0x1304   :  { %v1315_v37 = vld [vmem:[#allocation4] sm:$0xff]  ;;  %v1322_v62 = vld [vmem:[#allocation4 + $0x38] sm:$0xff] }
0x1305   :  { %3169 = vmatmul.mubr.msk.f32.vlgmr.msra.gmra.mrb[22].mxu0 %vm379_vm1, %v1315_v37 }
0x1306   :  { %1445 = vmatprep.mubr.f32.mxu0 %v4048_v1  ;;  %3498 = vmatpush1.bf16.msra.mxu0 %v4648_v20 }
0x1307   :  { %3500 = vmatprep.subr.bf16.mxu0 %v4659_v61 }
0x1309   :  { %3170 = vmatmul.mubr.msk.f32.gmra.mrb[24].mxu0 %vm379_vm1, %v1316_v0 }
0x130a   :  { %1451 = vmatprep.mubr.f32.mxu0 %v4048_v1  ;;  %3502 = vmatpush1.bf16.msra.mxu0 %v4667_v17 }
0x130b   :  { %3504 = vmatprep.subr.bf16.mxu0 %v4677_v26 }
0x130d   :  { %3171 = vmatmul.mubr.msk.f32.gmra.mrb[26].mxu0 %vm379_vm1, %v1317_v35 }
0x130e   :  { %1457 = vmatprep.mubr.f32.mxu0 %v4048_v1  ;;  %3506 = vmatpush1.bf16.msra.mxu0 %v4685_v28 }
0x130f   :  { %3508 = vmatprep.subr.bf16.mxu0 %v4698_v18 }
0x1311   :  { %3172 = vmatmul.mubr.msk.f32.gmra.mrb[28].mxu0 %vm379_vm1, %v1318_v59 }
0x1312   :  { %1463 = vmatprep.mubr.f32.mxu0 %v4048_v1  ;;  %3510 = vmatpush1.bf16.msra.mxu0 %v4703_v36 }
0x1313   :  { %3528 = vmatprep.subr.bf16.mxu0 %v4640_v56 }
0x1315   :  { %3173 = vmatmul.mubr.msk.f32.gmra.mrb[30].mxu0 %vm379_vm1, %v1319_v46 }
0x1316   :  { %1469 = vmatprep.mubr.f32.mxu0 %v4048_v1 }
0x1319   :  { %3174 = vmatmul.mubr.msk.f32.gmra.mrb[32].mxu0 %vm379_vm1, %v1320_v47 }
0x131a   :  { %1475 = vmatprep.mubr.f32.mxu0 %v4048_v1 }
0x131d   :  { %3175 = vmatmul.mubr.msk.f32.gmra.mrb[34].mxu0 %vm379_vm1, %v1321_v5 }
0x131e   :  { %1481 = vmatprep.mubr.f32.mxu0 %v4048_v1 }
0x1321   :  { %3176 = vmatmul.mubr.msk.f32.gmra.mrb[36].mxu0 %vm379_vm1, %v1322_v62 }
0x1322   :  { %1856 = vmatprep.mubr.f32.mxu0 %v4048_v1 }
0x13d8   :  { %v1441_v53 = vpop.f32.mrb[22].mxu0 }
0x13d9   :  { %v4765_v60 = vadd.f32 %v1441_v53, %v4759_v38  ;;  %v1443_v54 = vpop.f32.mrb[23].mxu0 }
0x13da   :  { %v4768_v9 = vadd.f32 %v1443_v54, %v4762_v40 }
0x13db   :  { %v4772_v41 = vmul.f32 %v4765_v60, %v4376_v48 }
0x13dc   :  { %v4776_v55 = vmul.f32 %v4768_v9, %v4380_v50  ;;  %v1447_v42 = vpop.f32.mrb[24].mxu0 }
0x13dd   :  { %v1520_v44 = vsub.f32 %v4765_v60, %v4772_v41  ;;  %v1448_v19 = vadd.f32 %v1447_v42, %v4759_v38  ;;  %v1449_v23 = vpop.f32.mrb[25].mxu0 }
0x13de   :  { %v1521_v49 = vsub.f32 %v4768_v9, %v4776_v55  ;;  %v1450_v16 = vadd.f32 %v1449_v23, %v4762_v40 }
0x13df   :  { %v1490_v39 = vmul.f32 %v1448_v19, %v4376_v48 }
0x13e0   :  { %v1491_v43 = vmul.f32 %v1450_v16, %v4380_v50  ;;  %v1453_v10 = vpop.f32.mrb[26].mxu0 }
0x13e1   :  { %v1522_v14 = vsub.f32 %v1448_v19, %v1490_v39  ;;  %v1454_v58 = vadd.f32 %v1453_v10, %v4759_v38  ;;  %v1455_v3 = vpop.f32.mrb[27].mxu0 }
0x13e2   :  { %v1523_v6 = vsub.f32 %v1450_v16, %v1491_v43  ;;  %v1456_v21 = vadd.f32 %v1455_v3, %v4762_v40 }
0x13e3   :  { %v1492_v25 = vmul.f32 %v1454_v58, %v4376_v48 }
0x13e4   :  { %v1493_v27 = vmul.f32 %v1456_v21, %v4380_v50  ;;  %v1459_v45 = vpop.f32.mrb[28].mxu0 }
0x13e5   :  { %v1524_v15 = vsub.f32 %v1454_v58, %v1492_v25  ;;  %v1460_v30 = vadd.f32 %v1459_v45, %v4759_v38  ;;  %v1461_v32 = vpop.f32.mrb[29].mxu0 }
0x13e6   :  { %v1525_v33 = vsub.f32 %v1456_v21, %v1493_v27  ;;  %v1462_v22 = vadd.f32 %v1461_v32, %v4762_v40 }
0x13e7   :  { %v1494_v24 = vmul.f32 %v1460_v30, %v4376_v48 }
0x13e8   :  { %v1495_v29 = vmul.f32 %v1462_v22, %v4380_v50  ;;  %v1465_v11 = vpop.f32.mrb[30].mxu0 }
0x13e9   :  { %v1526_v8 = vsub.f32 %v1460_v30, %v1494_v24  ;;  %v1466_v2 = vadd.f32 %v1465_v11, %v4759_v38  ;;  %v1467_v31 = vpop.f32.mrb[31].mxu0 }
0x13ea   :  { %v1527_v34 = vsub.f32 %v1462_v22, %v1495_v29  ;;  %v1468_v7 = vadd.f32 %v1467_v31, %v4762_v40 }
0x13eb   :  { %v1496_v4 = vmul.f32 %v1466_v2, %v4376_v48 }
0x13ec   :  { %v1497_v52 = vmul.f32 %v1468_v7, %v4380_v50  ;;  %v1471_v12 = vpop.f32.mrb[32].mxu0 }
0x13ed   :  { %v1528_v37 = vsub.f32 %v1466_v2, %v1496_v4  ;;  %v1472_v0 = vadd.f32 %v1471_v12, %v4759_v38  ;;  %v1473_v35 = vpop.f32.mrb[33].mxu0  ;;  %v4799_v59 = vadd.f32 %v1526_v8, %v1496_v4 }
0x13ee   :  { %v1529_v46 = vsub.f32 %v1468_v7, %v1497_v52  ;;  %v1474_v47 = vadd.f32 %v1473_v35, %v4762_v40  ;;  %v4802_v5 = vadd.f32 %v1527_v34, %v1497_v52 }
0x13ef   :  { %v1498_v62 = vmul.f32 %v1472_v0, %v4376_v48  ;;  %v4805_v57 = vadd.f32 %v1528_v37, %v1494_v24 }
0x13f0   :  { %v1499_v53 = vmul.f32 %v1474_v47, %v4380_v50  ;;  %v1477_v54 = vpop.f32.mrb[34].mxu0  ;;  %v4808_v42 = vadd.f32 %v1529_v46, %v1495_v29 }
0x13f1   :  { %v1530_v19 = vsub.f32 %v1472_v0, %v1498_v62  ;;  %v1478_v23 = vadd.f32 %v1477_v54, %v4759_v38  ;;  %v1479_v16 = vpop.f32.mrb[35].mxu0  ;;  %v4811_v10 = vadd.f32 %v1524_v15, %v1498_v62 }
0x13f2   :  { %v1531_v58 = vsub.f32 %v1474_v47, %v1499_v53  ;;  %v1480_v3 = vadd.f32 %v1479_v16, %v4762_v40  ;;  %v4814_v21 = vadd.f32 %v1525_v33, %v1499_v53 }
0x13f3   :  { %v1500_v45 = vmul.f32 %v1478_v23, %v4376_v48  ;;  %v4817_v30 = vadd.f32 %v1530_v19, %v1492_v25 }
0x13f4   :  { %v1501_v32 = vmul.f32 %v1480_v3, %v4380_v50  ;;  %v1483_v22 = vpop.f32.mrb[36].mxu0  ;;  %v4820_v24 = vadd.f32 %v1531_v58, %v1493_v27 }
0x13f5   :  { %v1532_v29 = vsub.f32 %v1478_v23, %v1500_v45  ;;  %v1484_v11 = vadd.f32 %v1483_v22, %v4759_v38  ;;  %v1485_v8 = vpop.f32.mrb[37].mxu0  ;;  %v4823_v15 = vadd.f32 %v1522_v14, %v1500_v45 }
0x13f6   :  { %v1533_v2 = vsub.f32 %v1480_v3, %v1501_v32  ;;  %v1486_v31 = vadd.f32 %v1485_v8, %v4762_v40  ;;  %v4826_v33 = vadd.f32 %v1523_v6, %v1501_v32 }
0x13f7   :  { %v1502_v34 = vmul.f32 %v1484_v11, %v4376_v48  ;;  %v1755_v25 = vadd.f32 %v1532_v29, %v1490_v39 }
0x13f8   :  { %v1503_v7 = vmul.f32 %v1486_v31, %v4380_v50  ;;  %v1756_v4 = vadd.f32 %v1533_v2, %v1491_v43 }
0x13f9   :  { %v1534_v52 = vsub.f32 %v1484_v11, %v1502_v34  ;;  %v4833_v27 = vadd.f32 %v1520_v44, %v1502_v34 }
0x13fa   :  { %v1535_v38 = vsub.f32 %v1486_v31, %v1503_v7  ;;  %v4838_v14 = vadd.f32 %v1521_v49, %v1503_v7 }
0x13fb   :  { %v1643_v40 = vadd.f32 %v1534_v52, %v4772_v41 }
0x13fc   :  { %v1644_v6 = vadd.f32 %v1535_v38, %v4776_v55 }
0x13fd   :  { %v1645_v39 = vadd.f32 %v1643_v40, %v4751_v63 }
0x13fe   :  { %v1646_v50 = vadd.f32 %v1644_v6, %v4753_v51 }
0x13ff   :  { %v3177_v60 = vmul.f32 -1.442695, %v1645_v39 }
0x1400   :  { %3747 = vtanh.f32 %v1646_v50  ;;  %v3178_v51 = vmul.f32 -1.442695, %v1646_v50 }
0x1401   :  { %3749 = vpow2.f32 %v3177_v60 }
0x140a   :  { %v3748_v43 = vpop.eup %3747 }
0x140b   :  { %1662 = vrot.lane.b32.xlu0 %v3748_v43, %s4049_s2  ;;  %v3750_v44 = vpop.eup %3749 }
0x140c   :  { %v1653_v12 = vadd.f32 1.0, %v3750_v44 }
0x140e   :  { %3751 = vrcp.f32 %v1653_v12 }
0x1418   :  { %v3752_v9 = vpop.eup %3751 }
0x1419   :  { %v1660_v41 = vmul.f32 0.0, %v3752_v9 }
0x147d   :  { %v1663_v49 = vpop.permute.xlu0 %1662 }
0x147e   :  { %v1665_v37 = vmul.f32 %v3752_v9, %v1663_v49 }
0x1480   :  { %1667 = vrot.lane.b32.xlu1 %v1665_v37, %s4049_s2 }
0x14f2   :  { %v1668_v55 = vpop.permute.xlu1 %1667 }
0x14f3   :  { %v1670_v0 = vadd.f32 %v1668_v55, %v1660_v41 }
0x14f5   :  { %3753 = vtanh.f32 %v1670_v0 }
0x14f6   :  { %3755 = vpow2.f32 %v3178_v51 }
0x14ff   :  { %v3754_v63 = vpop.eup %3753 }
0x1500   :  { %1673 = vrot.lane.b32.xlu0 %v3754_v63, %s4049_s2  ;;  %v3756_v35 = vpop.eup %3755 }
0x1501   :  { %v1654_v46 = vadd.f32 1.0, %v3756_v35 }
0x1503   :  { %3757 = vrcp.f32 %v1654_v46 }
0x150d   :  { %v3758_v47 = vpop.eup %3757 }
0x1572   :  { %v1674_v62 = vpop.permute.xlu0 %1673 }
0x1573   :  { %v4847_v53 = vmul.f32 %v3758_v47, %v1674_v62 }
0x1575   :  { %3179 = vmatmul.mubr.msk.f32.vlgmr.msra.gmra.mrb[12].mxu1 %vm379_vm1, %v4847_v53 }
0x1576   :  { %3514 = vmatpush1.bf16.msra.mxu1 %v4648_v20  ;;  %1968 = vmatprep.mubr.f32.mxu1 %v4048_v1 }
0x1577   :  { %3516 = vmatprep.subr.bf16.mxu1 %v4659_v61 }
0x157a   :  { %3518 = vmatpush1.bf16.msra.mxu1 %v4667_v17 }
0x157b   :  { %3520 = vmatprep.subr.bf16.mxu1 %v4677_v26 }
0x157e   :  { %3522 = vmatpush1.bf16.msra.mxu1 %v4685_v28 }
0x157f   :  { %3524 = vmatprep.subr.bf16.mxu1 %v4698_v18 }
0x1582   :  { %3526 = vmatpush1.bf16.msra.mxu1 %v4703_v36 }
0x1583   :  { %3544 = vmatprep.subr.bf16.mxu1 %v4640_v56 }
0x1648   :  { %v1746_v54 = vpop.f32.mrb[12].mxu1 }
0x1649   :  { %v1757_v19 = vadd.f32 %v1755_v25, %v1746_v54  ;;  %v1748_v23 = vpop.f32.mrb[13].mxu1 }
0x164a   :  { %v1758_v16 = vadd.f32 %v1756_v4, %v1748_v23 }
0x164b   :  { %v3180_v3 = vmul.f32 -1.442695, %v1757_v19 }
0x164c   :  { %3759 = vtanh.f32 %v1758_v16  ;;  %v3181_v25 = vmul.f32 -1.442695, %v1758_v16 }
0x164d   :  { %3761 = vpow2.f32 %v3180_v3 }
0x1656   :  { %v3760_v58 = vpop.eup %3759 }
0x1657   :  { %1774 = vrot.lane.b32.xlu1 %v3760_v58, %s4049_s2  ;;  %v3762_v45 = vpop.eup %3761 }
0x1658   :  { %v1765_v32 = vadd.f32 1.0, %v3762_v45 }
0x165a   :  { %3763 = vrcp.f32 %v1765_v32 }
0x1664   :  { %v3764_v22 = vpop.eup %3763 }
0x1665   :  { %v1772_v8 = vmul.f32 %v3764_v22, %v1670_v0 }
0x16c9   :  { %v1775_v29 = vpop.permute.xlu1 %1774 }
0x16ca   :  { %v1777_v11 = vmul.f32 %v3764_v22, %v1775_v29 }
0x16cc   :  { %1779 = vrot.lane.b32.xlu0 %v1777_v11, %s4049_s2 }
0x173e   :  { %v1780_v2 = vpop.permute.xlu0 %1779 }
0x173f   :  { %v1782_v31 = vadd.f32 %v1780_v2, %v1772_v8 }
0x1741   :  { %3765 = vtanh.f32 %v1782_v31 }
0x1742   :  { %3767 = vpow2.f32 %v3181_v25 }
0x174b   :  { %v3766_v34 = vpop.eup %3765 }
0x174c   :  { %1785 = vrot.lane.b32.xlu1 %v3766_v34, %s4049_s2  ;;  %v3768_v7 = vpop.eup %3767 }
0x174d   :  { %v1766_v4 = vadd.f32 1.0, %v3768_v7 }
0x174f   :  { %3769 = vrcp.f32 %v1766_v4 }
0x1759   :  { %v3770_v52 = vpop.eup %3769 }
0x17be   :  { %v1786_v38 = vpop.permute.xlu1 %1785 }
0x17bf   :  { %v4863_v40 = vmul.f32 %v3770_v52, %v1786_v38 }
0x17c1   :  { %3182 = vmatmul.mubr.msk.f32.vlgmr.msra.gmra.mrb[38].mxu0 %vm379_vm1, %v4863_v40 }
0x17c2   :  { %3530 = vmatpush1.bf16.msra.mxu0 %v4648_v20  ;;  %2080 = vmatprep.mubr.f32.mxu0 %v4048_v1 }
0x17c3   :  { %3532 = vmatprep.subr.bf16.mxu0 %v4659_v61 }
0x17c6   :  { %3534 = vmatpush1.bf16.msra.mxu0 %v4667_v17 }
0x17c7   :  { %3536 = vmatprep.subr.bf16.mxu0 %v4677_v26 }
0x17ca   :  { %3538 = vmatpush1.bf16.msra.mxu0 %v4685_v28 }
0x17cb   :  { %3540 = vmatprep.subr.bf16.mxu0 %v4698_v18 }
0x17ce   :  { %3542 = vmatpush1.bf16.msra.mxu0 %v4703_v36 }
0x17cf   :  { %3560 = vmatprep.subr.bf16.mxu0 %v4640_v56 }
0x1894   :  { %v1858_v6 = vpop.f32.mrb[38].mxu0 }
0x1895   :  { %v1869_v39 = vadd.f32 %v4817_v30, %v1858_v6  ;;  %v1860_v50 = vpop.f32.mrb[39].mxu0 }
0x1896   :  { %v1870_v43 = vadd.f32 %v4820_v24, %v1860_v50 }
0x1897   :  { %v3183_v44 = vmul.f32 -1.442695, %v1869_v39 }
0x1898   :  { %3771 = vtanh.f32 %v1870_v43  ;;  %v3184_v24 = vmul.f32 -1.442695, %v1870_v43 }
0x1899   :  { %3773 = vpow2.f32 %v3183_v44 }
0x18a2   :  { %v3772_v60 = vpop.eup %3771 }
0x18a3   :  { %1886 = vrot.lane.b32.xlu0 %v3772_v60, %s4049_s2  ;;  %v3774_v12 = vpop.eup %3773 }
0x18a4   :  { %v1877_v9 = vadd.f32 1.0, %v3774_v12 }
0x18a6   :  { %3775 = vrcp.f32 %v1877_v9 }
0x18b0   :  { %v3776_v49 = vpop.eup %3775 }
0x18b1   :  { %v1884_v55 = vmul.f32 %v3776_v49, %v1782_v31 }
0x1915   :  { %v1887_v37 = vpop.permute.xlu0 %1886 }
0x1916   :  { %v1889_v41 = vmul.f32 %v3776_v49, %v1887_v37 }
0x1918   :  { %1891 = vrot.lane.b32.xlu1 %v1889_v41, %s4049_s2 }
0x198a   :  { %v1892_v0 = vpop.permute.xlu1 %1891 }
0x198b   :  { %v1894_v30 = vadd.f32 %v1892_v0, %v1884_v55 }
0x198d   :  { %3777 = vtanh.f32 %v1894_v30 }
0x198e   :  { %3779 = vpow2.f32 %v3184_v24 }
0x1997   :  { %v3778_v63 = vpop.eup %3777 }
0x1998   :  { %1897 = vrot.lane.b32.xlu0 %v3778_v63, %s4049_s2  ;;  %v3780_v51 = vpop.eup %3779 }
0x1999   :  { %v1878_v35 = vadd.f32 1.0, %v3780_v51 }
0x199b   :  { %3781 = vrcp.f32 %v1878_v35 }
0x19a5   :  { %v3782_v46 = vpop.eup %3781 }
0x1a0a   :  { %v1898_v47 = vpop.permute.xlu0 %1897 }
0x1a0b   :  { %v4881_v62 = vmul.f32 %v3782_v46, %v1898_v47 }
0x1a0d   :  { %3185 = vmatmul.mubr.msk.f32.vlgmr.msra.gmra.mrb[14].mxu1 %vm379_vm1, %v4881_v62 }
0x1a0e   :  { %3546 = vmatpush1.bf16.msra.mxu1 %v4648_v20  ;;  %2192 = vmatprep.mubr.f32.mxu1 %v4048_v1 }
0x1a0f   :  { %3548 = vmatprep.subr.bf16.mxu1 %v4659_v61 }
0x1a12   :  { %3550 = vmatpush1.bf16.msra.mxu1 %v4667_v17 }
0x1a13   :  { %3552 = vmatprep.subr.bf16.mxu1 %v4677_v26 }
0x1a16   :  { %3554 = vmatpush1.bf16.msra.mxu1 %v4685_v28 }
0x1a17   :  { %3556 = vmatprep.subr.bf16.mxu1 %v4698_v18 }
0x1a1a   :  { %3558 = vmatpush1.bf16.msra.mxu1 %v4703_v36 }
0x1a1b   :  { %3576 = vmatprep.subr.bf16.mxu1 %v4640_v56 }
0x1ae0   :  { %v1970_v54 = vpop.f32.mrb[14].mxu1 }
0x1ae1   :  { %v1981_v19 = vadd.f32 %v4805_v57, %v1970_v54  ;;  %v1972_v23 = vpop.f32.mrb[15].mxu1 }
0x1ae2   :  { %v1982_v16 = vadd.f32 %v4808_v42, %v1972_v23 }
0x1ae3   :  { %v3186_v3 = vmul.f32 -1.442695, %v1981_v19 }
0x1ae4   :  { %3783 = vtanh.f32 %v1982_v16  ;;  %v3187_v42 = vmul.f32 -1.442695, %v1982_v16 }
0x1ae5   :  { %3785 = vpow2.f32 %v3186_v3 }
0x1aee   :  { %v3784_v58 = vpop.eup %3783 }
0x1aef   :  { %1998 = vrot.lane.b32.xlu1 %v3784_v58, %s4049_s2  ;;  %v3786_v45 = vpop.eup %3785 }
0x1af0   :  { %v1989_v32 = vadd.f32 1.0, %v3786_v45 }
0x1af2   :  { %3787 = vrcp.f32 %v1989_v32 }
0x1afc   :  { %v3788_v22 = vpop.eup %3787 }
0x1afd   :  { %v1996_v56 = vmul.f32 %v3788_v22, %v1894_v30 }
0x1b61   :  { %v1999_v29 = vpop.permute.xlu1 %1998 }
0x1b62   :  { %v2001_v11 = vmul.f32 %v3788_v22, %v1999_v29 }
0x1b64   :  { %2003 = vrot.lane.b32.xlu0 %v2001_v11, %s4049_s2 }
0x1bd6   :  { %v2004_v8 = vpop.permute.xlu0 %2003 }
0x1bd7   :  { %v2006_v57 = vadd.f32 %v2004_v8, %v1996_v56 }
0x1bd9   :  { %3789 = vtanh.f32 %v2006_v57 }
0x1bda   :  { %3791 = vpow2.f32 %v3187_v42  ;;  %v2469_v42 = vmul.f32 %v4881_v62, %v4376_v48 }
0x1be3   :  { %v3790_v2 = vpop.eup %3789 }
0x1be4   :  { %2009 = vrot.lane.b32.xlu1 %v3790_v2, %s4049_s2  ;;  %v3792_v31 = vpop.eup %3791 }
0x1be5   :  { %v1990_v34 = vadd.f32 1.0, %v3792_v31  ;;  %v2482_v31 = vmul.f32 %v4881_v62, %v4531_v13 }
0x1be7   :  { %3793 = vrcp.f32 %v1990_v34 }
0x1bf1   :  { %v3794_v25 = vpop.eup %3793 }
0x1c56   :  { %v2010_v7 = vpop.permute.xlu1 %2009 }
0x1c57   :  { %v2012_v4 = vmul.f32 %v3794_v25, %v2010_v7 }
0x1c59   :  { %3188 = vmatmul.mubr.msk.f32.vlgmr.msra.gmra.mrb[40].mxu0 %vm379_vm1, %v2012_v4  ;;  %v2473_v35 = vmul.f32 %v2012_v4, %v4376_v48  ;;  %v2478_v46 = vmul.f32 %v2012_v4, %v4531_v13 }
0x1c5a   :  { %3562 = vmatpush1.bf16.msra.mxu0 %v4648_v20  ;;  %2304 = vmatprep.mubr.f32.mxu0 %v4048_v1 }
0x1c5b   :  { %3564 = vmatprep.subr.bf16.mxu0 %v4659_v61 }
0x1c5e   :  { %3566 = vmatpush1.bf16.msra.mxu0 %v4667_v17 }
0x1c5f   :  { %3568 = vmatprep.subr.bf16.mxu0 %v4677_v26 }
0x1c62   :  { %3570 = vmatpush1.bf16.msra.mxu0 %v4685_v28 }
0x1c63   :  { %3572 = vmatprep.subr.bf16.mxu0 %v4698_v18 }
0x1c66   :  { %3574 = vmatpush1.bf16.msra.mxu0 %v4703_v36 }
0x1d2c   :  { %v2082_v52 = vpop.f32.mrb[40].mxu0 }
0x1d2d   :  { %v2093_v38 = vadd.f32 %v4799_v59, %v2082_v52  ;;  %v2084_v6 = vpop.f32.mrb[41].mxu0 }
0x1d2e   :  { %v2094_v39 = vadd.f32 %v4802_v5, %v2084_v6 }
0x1d2f   :  { %v3189_v43 = vmul.f32 -1.442695, %v2093_v38 }
0x1d30   :  { %3795 = vtanh.f32 %v2094_v39  ;;  %v3190_v5 = vmul.f32 -1.442695, %v2094_v39 }
0x1d31   :  { %3797 = vpow2.f32 %v3189_v43 }
0x1d3a   :  { %v3796_v50 = vpop.eup %3795 }
0x1d3b   :  { %2110 = vrot.lane.b32.xlu0 %v3796_v50, %s4049_s2  ;;  %v3798_v60 = vpop.eup %3797 }
0x1d3c   :  { %v2101_v44 = vadd.f32 1.0, %v3798_v60 }
0x1d3e   :  { %3799 = vrcp.f32 %v2101_v44 }
0x1d48   :  { %v3800_v12 = vpop.eup %3799 }
0x1d49   :  { %v2108_v37 = vmul.f32 %v3800_v12, %v2006_v57 }
0x1dad   :  { %v2111_v9 = vpop.permute.xlu0 %2110 }
0x1dae   :  { %v2113_v49 = vmul.f32 %v3800_v12, %v2111_v9 }
0x1db0   :  { %2115 = vrot.lane.b32.xlu1 %v2113_v49, %s4049_s2 }
0x1e22   :  { %v2116_v41 = vpop.permute.xlu1 %2115 }
0x1e23   :  { %v2118_v59 = vadd.f32 %v2116_v41, %v2108_v37 }
0x1e25   :  { %3801 = vtanh.f32 %v2118_v59 }
0x1e26   :  { %3803 = vpow2.f32 %v3190_v5 }
0x1e2f   :  { %v3802_v55 = vpop.eup %3801 }
0x1e30   :  { %2121 = vrot.lane.b32.xlu0 %v3802_v55, %s4049_s2  ;;  %v3804_v0 = vpop.eup %3803 }
0x1e31   :  { %v2102_v30 = vadd.f32 1.0, %v3804_v0 }
0x1e33   :  { %3805 = vrcp.f32 %v2102_v30 }
0x1e3d   :  { %v3806_v63 = vpop.eup %3805 }
0x1ea2   :  { %v2122_v24 = vpop.permute.xlu0 %2121 }
0x1ea3   :  { %v2124_v51 = vmul.f32 %v3806_v63, %v2122_v24  ;;  %v2465_v63 = vmul.f32 %v4863_v40, %v4376_v48  ;;  %v2486_v24 = vmul.f32 %v4863_v40, %v4531_v13 }
0x1ea5   :  { %v2474_v47 = vmul.f32 %v2124_v51, %v4531_v13  ;;  %v2477_v54 = vmul.f32 %v2124_v51, %v4376_v48  ;;  %3191 = vmatmul.mubr.msk.f32.vlgmr.msra.gmra.mrb[16].mxu1 %vm379_vm1, %v2124_v51 }
0x1ea6   :  { %3578 = vmatpush1.bf16.msra.mxu1 %v4648_v20  ;;  %2416 = vmatprep.mubr.f32.mxu1 %v4048_v1 }
0x1ea7   :  { %v2475_v19 = vadd.f32 %v2474_v47, %v2473_v35  ;;  %v2479_v23 = vadd.f32 %v2478_v46, %v2477_v54  ;;  %3580 = vmatprep.subr.bf16.mxu1 %v4659_v61 }
0x1ea9   :  { %2476 = vst.msk [vmem:[#allocation4 + $0x18] sm:$0xff] %vm379_vm1, %v2475_v19  ;;  %2480 = vst.msk [vmem:[#allocation4 + $0x20] sm:$0xff] %vm379_vm1, %v2479_v23 }
0x1eaa   :  { %3582 = vmatpush1.bf16.msra.mxu1 %v4667_v17 }
0x1eab   :  { %3584 = vmatprep.subr.bf16.mxu1 %v4677_v26 }
0x1eae   :  { %3586 = vmatpush1.bf16.msra.mxu1 %v4685_v28 }
0x1eaf   :  { %3588 = vmatprep.subr.bf16.mxu1 %v4698_v18 }
0x1eb2   :  { %3590 = vmatpush1.bf16.msra.mxu1 %v4703_v36 }
0x1f78   :  { %v2194_v20 = vpop.f32.mrb[16].mxu1 }
0x1f79   :  { %v2205_v16 = vadd.f32 %v4811_v10, %v2194_v20  ;;  %v2196_v58 = vpop.f32.mrb[17].mxu1 }
0x1f7a   :  { %v2206_v61 = vadd.f32 %v4814_v21, %v2196_v58 }
0x1f7b   :  { %v3192_v45 = vmul.f32 -1.442695, %v2205_v16 }
0x1f7c   :  { %3807 = vtanh.f32 %v2206_v61  ;;  %v3193_v21 = vmul.f32 -1.442695, %v2206_v61 }
0x1f7d   :  { %3809 = vpow2.f32 %v3192_v45 }
0x1f86   :  { %v3808_v3 = vpop.eup %3807 }
0x1f87   :  { %2222 = vrot.lane.b32.xlu1 %v3808_v3, %s4049_s2  ;;  %v3810_v17 = vpop.eup %3809 }
0x1f88   :  { %v2213_v26 = vadd.f32 1.0, %v3810_v17 }
0x1f8a   :  { %3811 = vrcp.f32 %v2213_v26 }
0x1f94   :  { %v3812_v28 = vpop.eup %3811 }
0x1f95   :  { %v2220_v36 = vmul.f32 %v3812_v28, %v2118_v59 }
0x1ff9   :  { %v2223_v32 = vpop.permute.xlu1 %2222 }
0x1ffa   :  { %v2225_v18 = vmul.f32 %v3812_v28, %v2223_v32 }
0x1ffc   :  { %2227 = vrot.lane.b32.xlu0 %v2225_v18, %s4049_s2 }
0x206e   :  { %v2228_v22 = vpop.permute.xlu0 %2227 }
0x206f   :  { %v2230_v10 = vadd.f32 %v2228_v22, %v2220_v36  ;;  %v2503_v36 = vld [vmem:[%s5130_s8 + $0x10] sm:$0xff]  ;;  %v2504_v22 = vld [vmem:[%s5130_s8 + $0x18] sm:$0xff] }
0x2071   :  { %3813 = vtanh.f32 %v2230_v10 }
0x2072   :  { %3815 = vpow2.f32 %v3193_v21  ;;  %v2506_v21 = vld [vmem:[%s5130_s8 + $0x28] sm:$0xff] }
0x207b   :  { %v3814_v29 = vpop.eup %3813 }
0x207c   :  { %2233 = vrot.lane.b32.xlu1 %v3814_v29, %s4049_s2  ;;  %v3816_v11 = vpop.eup %3815  ;;  %v2505_v29 = vld [vmem:[%s5130_s8 + $0x20] sm:$0xff] }
0x207d   :  { %v2214_v56 = vadd.f32 1.0, %v3816_v11  ;;  %v3599_v11 = vpack.c.bf16 %v2506_v21, %v2505_v29 }
0x207f   :  { %3817 = vrcp.f32 %v2214_v56  ;;  %v2507_v56 = vld [vmem:[%s5130_s8 + $0x30] sm:$0xff] }
0x2089   :  { %v3818_v8 = vpop.eup %3817 }
0x20ee   :  { %v2234_v57 = vpop.permute.xlu1 %2233 }
0x20ef   :  { %v2236_v2 = vmul.f32 %v3818_v8, %v2234_v57  ;;  %v2508_v8 = vld [vmem:[%s5130_s8 + $0x38] sm:$0xff] }
0x20f0   :  { %v3603_v57 = vpack.c.bf16 %v2508_v8, %v2507_v56 }
0x20f1   :  { %v2470_v34 = vmul.f32 %v2236_v2, %v4531_v13  ;;  %v2481_v25 = vmul.f32 %v2236_v2, %v4376_v48  ;;  %3194 = vmatmul.mubr.msk.f32.vlgmr.msra.gmra.mrb[42].mxu0 %vm379_vm1, %v2236_v2 }
0x20f3   :  { %v2471_v7 = vadd.f32 %v2470_v34, %v2469_v42  ;;  %v2483_v4 = vadd.f32 %v2482_v31, %v2481_v25 }
0x20f5   :  { %2472 = vst.msk [vmem:[#allocation4 + $0x10] sm:$0xff] %vm379_vm1, %v2471_v7  ;;  %2484 = vst.msk [vmem:[#allocation4 + $0x28] sm:$0xff] %vm379_vm1, %v2483_v4 }
0x21c4   :  { %v2306_v52 = vpop.f32.mrb[42].mxu0 }
0x21c5   :  { %v2317_v38 = vadd.f32 %v4823_v15, %v2306_v52  ;;  %v2308_v6 = vpop.f32.mrb[43].mxu0  ;;  %v2461_v52 = vmul.f32 %v4847_v53, %v4376_v48 }
0x21c6   :  { %v2318_v39 = vadd.f32 %v4826_v33, %v2308_v6 }
0x21c7   :  { %v3195_v50 = vmul.f32 -1.442695, %v2317_v38  ;;  %v2490_v38 = vmul.f32 %v4847_v53, %v4531_v13  ;;  %v5001_v53 = vld [vmem:[#allocation4 + $0x10] sm:$0xff] }
0x21c8   :  { %3819 = vtanh.f32 %v2318_v39  ;;  %v3196_v33 = vmul.f32 -1.442695, %v2318_v39 }
0x21c9   :  { %3821 = vpow2.f32 %v3195_v50 }
0x21d2   :  { %v3820_v62 = vpop.eup %3819 }
0x21d3   :  { %2334 = vrot.lane.b32.xlu0 %v3820_v62, %s4049_s2  ;;  %v3822_v43 = vpop.eup %3821 }
0x21d4   :  { %v2325_v60 = vadd.f32 1.0, %v3822_v43 }
0x21d6   :  { %3823 = vrcp.f32 %v2325_v60 }
0x21e0   :  { %v3824_v44 = vpop.eup %3823 }
0x21e1   :  { %v2332_v49 = vmul.f32 %v3824_v44, %v2230_v10  ;;  %v3595_v10 = vpack.c.bf16 %v2504_v22, %v2503_v36 }
0x2245   :  { %v2335_v12 = vpop.permute.xlu0 %2334 }
0x2246   :  { %v2337_v9 = vmul.f32 %v3824_v44, %v2335_v12  ;;  %v5013_v44 = vld [vmem:[#allocation4 + $0x28] sm:$0xff] }
0x2248   :  { %2339 = vrot.lane.b32.xlu1 %v2337_v9, %s4049_s2 }
0x22ba   :  { %v2340_v37 = vpop.permute.xlu1 %2339 }
0x22bb   :  { %v2342_v15 = vadd.f32 %v2340_v37, %v2332_v49  ;;  %v3200_v49 = vld [vmem:[#allocation11] ss:$0 sm:$0xff] }
0x22bd   :  { %3825 = vtanh.f32 %v2342_v15 }
0x22be   :  { %3827 = vpow2.f32 %v3196_v33 }
0x22c7   :  { %v3826_v41 = vpop.eup %3825 }
0x22c8   :  { %2345 = vrot.lane.b32.xlu0 %v3826_v41, %s4049_s2  ;;  %v3828_v59 = vpop.eup %3827 }
0x22c9   :  { %v2326_v55 = vadd.f32 1.0, %v3828_v59 }
0x22cb   :  { %3829 = vrcp.f32 %v2326_v55 }
0x22d5   :  { %v3830_v5 = vpop.eup %3829 }
0x233a   :  { %v2346_v0 = vpop.permute.xlu0 %2345 }
0x233b   :  { %v2348_v30 = vmul.f32 %v3830_v5, %v2346_v0 }
0x233d   :  { %v2466_v51 = vmul.f32 %v2348_v30, %v4531_v13  ;;  %v2485_v35 = vmul.f32 %v2348_v30, %v4376_v48  ;;  %3197 = vmatmul.mubr.msk.f32.vlgmr.msra.gmra.mrb[18].mxu1 %vm379_vm1, %v2348_v30 }
0x233e   :  { %3294 = vmatprep.mubr.msk.f32.mxu1 %vm4055_vm4, %v4048_v1 }
0x233f   :  { %v2467_v46 = vadd.f32 %v2466_v51, %v2465_v63  ;;  %v2487_v47 = vadd.f32 %v2486_v24, %v2485_v35  ;;  %v3209_v35 = vld [vmem:[#allocation12] ss:$0 sm:$0xff] }
0x2341   :  { %2468 = vst.msk [vmem:[#allocation4 + $0x8] sm:$0xff] %vm379_vm1, %v2467_v46  ;;  %2488 = vst.msk [vmem:[#allocation4 + $0x30] sm:$0xff] %vm379_vm1, %v2487_v47 }
0x2348   :  { %v4997_v60 = vld [vmem:[#allocation4 + $0x8] sm:$0xff]  ;;  %v5017_v12 = vld [vmem:[#allocation4 + $0x30] sm:$0xff] }
0x2410   :  { %v2418_v54 = vpop.f32.mrb[18].mxu1 }
0x2411   :  { %v2429_v19 = vadd.f32 %v4833_v27, %v2418_v54  ;;  %v2420_v23 = vpop.f32.mrb[19].mxu1  ;;  %v2501_v27 = vld [vmem:[%s5130_s8] sm:$0xff] }
0x2412   :  { %v2430_v20 = vadd.f32 %v4838_v14, %v2420_v23  ;;  %v2502_v14 = vld [vmem:[%s5130_s8 + $0x8] sm:$0xff]  ;;  %s4051_s8 = smov 3  }
0x2413   :  { %v3198_v16 = vmul.f32 -1.442695, %v2429_v19  ;;  %v3591_v26 = vpack.c.bf16 %v2502_v14, %v2501_v27 }
0x2414   :  { %3831 = vtanh.f32 %v2430_v20  ;;  %v3199_v42 = vmul.f32 -1.442695, %v2430_v20 }
0x2415   :  { %3833 = vpow2.f32 %v3198_v16  ;;  %3592 = vmatprep.subr.bf16.mxu0 %v3591_v26 }
0x2416   :  { %3594 = vmatpush3.bf16.msra.mxu0 %v3591_v26 }
0x2417   :  { %3596 = vmatprep.subr.bf16.mxu0 %v3595_v10 }
0x241a   :  { %3598 = vmatpush3.bf16.msra.mxu0 %v3595_v10 }
0x241b   :  { %3600 = vmatprep.subr.bf16.mxu0 %v3599_v11 }
0x241e   :  { %v3832_v40 = vpop.eup %3831  ;;  %3602 = vmatpush3.bf16.msra.mxu0 %v3599_v11 }
0x241f   :  { %2446 = vrot.lane.b32.xlu1 %v3832_v40, %s4049_s2  ;;  %v3834_v58 = vpop.eup %3833  ;;  %3604 = vmatprep.subr.bf16.mxu0 %v3603_v57 }
0x2420   :  { %v2437_v61 = vadd.f32 1.0, %v3834_v58 }
0x2422   :  { %3835 = vrcp.f32 %v2437_v61  ;;  %3606 = vmatpush3.bf16.msra.mxu0 %v3603_v57 }
0x242c   :  { %v3836_v3 = vpop.eup %3835 }
0x242d   :  { %v2444_v28 = vmul.f32 %v3836_v3, %v2342_v15 }
0x2491   :  { %v2447_v45 = vpop.permute.xlu1 %2446 }
0x2492   :  { %v2449_v17 = vmul.f32 %v3836_v3, %v2447_v45 }
0x2494   :  { %2451 = vrot.lane.b32.xlu0 %v2449_v17, %s4049_s2 }
0x2506   :  { %v2452_v32 = vpop.permute.xlu0 %2451 }
0x2507   :  { %v2454_v18 = vadd.f32 %v2452_v32, %v2444_v28 }
0x2509   :  { %3837 = vtanh.f32 %v2454_v18 }
0x250a   :  { %3839 = vpow2.f32 %v3199_v42  ;;  %v3210_v42 = vld [vmem:[#allocation5] ss:$0 sm:$0xff] }
0x2513   :  { %v3838_v2 = vpop.eup %3837 }
0x2514   :  { %2457 = vrot.lane.b32.xlu1 %v3838_v2, %s4049_s2  ;;  %v3840_v31 = vpop.eup %3839  ;;  %v4050_v2 = vmov 0   ;;  %s4052_s2 = smov 5  }
0x2515   :  { %v2438_v34 = vadd.f32 1.0, %v3840_v31  ;;  %3650 = vset.pattern.permute.xlu0 %v4050_v2  ;;  %3649 = vset.pattern.permute.xlu1 %v4050_v2 }
0x2517   :  { %3841 = vrcp.f32 %v2438_v34 }
0x2521   :  { %v3842_v25 = vpop.eup %3841 }
0x2586   :  { %v2458_v7 = vpop.permute.xlu1 %2457 }
0x2587   :  { %v2460_v4 = vmul.f32 %v3842_v25, %v2458_v7 }
0x2589   :  { %v2462_v6 = vmul.f32 %v2460_v4, %v4531_v13  ;;  %v2489_v39 = vmul.f32 %v2460_v4, %v4376_v48  ;;  %v5005_v48 = vld [vmem:[#allocation4 + $0x18] sm:$0xff]  ;;  %v5009_v13 = vld [vmem:[#allocation4 + $0x20] sm:$0xff] }
0x258b   :  { %v2463_v62 = vadd.f32 %v2462_v6, %v2461_v52  ;;  %v2491_v50 = vadd.f32 %v2490_v38, %v2489_v39 }
0x258d   :  { %2464 = vst.msk [vmem:[#allocation4] sm:$0xff] %vm379_vm1, %v2463_v62  ;;  %2492 = vst.msk [vmem:[#allocation4 + $0x38] sm:$0xff] %vm379_vm1, %v2491_v50 }
0x2594   :  { %v4993_v43 = vld [vmem:[#allocation4] sm:$0xff]  ;;  %v5021_v9 = vld [vmem:[#allocation4 + $0x38] sm:$0xff] }
0x2595   :  { %3266 = vmatprep.mubr.msk.f32.mxu0 %vm379_vm1, %v4993_v43 }
0x2596   :  { %3267 = vmatmul.mubr.msk.f32.vlgmr.msra.gmra.mrb[44].mxu0 %vm379_vm1, %v4997_v60 }
0x2597   :  { %3269 = vmatprep.mubr.msk.f32.mxu0 %vm379_vm1, %v5001_v53 }
0x259a   :  { %3270 = vmatmul.mubr.msk.f32.gmra.mrb[46].mxu0 %vm379_vm1, %v5005_v48 }
0x259b   :  { %3272 = vmatprep.mubr.msk.f32.mxu0 %vm379_vm1, %v5009_v13 }
0x259e   :  { %3273 = vmatmul.mubr.msk.f32.gmra.mrb[48].mxu0 %vm379_vm1, %v5013_v44 }
0x259f   :  { %3275 = vmatprep.mubr.msk.f32.mxu0 %vm379_vm1, %v5017_v12 }
0x25a2   :  { %3276 = vmatmul.mubr.msk.f32.gmra.mrb[50].mxu0 %vm379_vm1, %v5021_v9 }
0x25a3   :  { %3305 = vmatprep.mubr.msk.f32.mxu0 %vm4055_vm4, %v4048_v1 }
0x2669   :  { %v3268_v37 = vpop.f32.mrb[44].mxu0 }
0x266a   :  { %v2612_v15 = vadd.f32 %v3268_v37, %v3200_v49  ;;  %v2606_v41 = vpop.f32.mrb[45].mxu0 }
0x266b   :  { %v2607_v33 = vadd.f32 %v3200_v49, %v2606_v41 }
0x266c   :  { %3843 = vtanh.f32 %v2612_v15 }
0x266d   :  { %3845 = vtanh.f32 %v2607_v33  ;;  %v3271_v59 = vpop.f32.mrb[46].mxu0 }
0x266e   :  { %v2622_v55 = vadd.f32 %v3271_v59, %v3200_v49  ;;  %v2616_v5 = vpop.f32.mrb[47].mxu0 }
0x266f   :  { %v2617_v0 = vadd.f32 %v3200_v49, %v2616_v5 }
0x2670   :  { %3847 = vtanh.f32 %v2622_v55 }
0x2671   :  { %3849 = vtanh.f32 %v2617_v0  ;;  %v3274_v30 = vpop.f32.mrb[48].mxu0 }
0x2672   :  { %v2632_v63 = vadd.f32 %v3274_v30, %v3200_v49  ;;  %v2626_v24 = vpop.f32.mrb[49].mxu0 }
0x2673   :  { %v2627_v51 = vadd.f32 %v3200_v49, %v2626_v24 }
0x2674   :  { %3851 = vtanh.f32 %v2632_v63 }
0x2675   :  { %3853 = vtanh.f32 %v2627_v51  ;;  %v3277_v46 = vpop.f32.mrb[50].mxu0 }
0x2676   :  { %v3844_v47 = vpop.eup %3843  ;;  %v2642_v54 = vadd.f32 %v3277_v46, %v3200_v49  ;;  %v2636_v19 = vpop.f32.mrb[51].mxu0 }
0x2677   :  { %v3846_v23 = vpop.eup %3845  ;;  %v2637_v20 = vadd.f32 %v3200_v49, %v2636_v19  ;;  %v2661_v40 = vmul.f32 %v3844_v47, %v3209_v35 }
0x2678   :  { %3855 = vtanh.f32 %v2642_v54  ;;  %v2660_v16 = vmul.f32 %v3846_v23, %v3209_v35 }
0x2679   :  { %3857 = vtanh.f32 %v2637_v20  ;;  %v2672_v58 = vsel %vm2668_vm2, %v2661_v40, 0.0 }
0x267a   :  { %v3848_v61 = vpop.eup %3847  ;;  %2673 = vadd.xlane.f32.xlu1 %v2672_v58  ;;  %v2669_v3 = vsel %vm2668_vm2, %v2660_v16, 0.0 }
0x267b   :  { %v3850_v45 = vpop.eup %3849  ;;  %2670 = vadd.xlane.f32.xlu0 %v2669_v3  ;;  %v2663_v26 = vmul.f32 %v3848_v61, %v3209_v35 }
0x267c   :  { %v2662_v17 = vmul.f32 %v3850_v45, %v3209_v35 }
0x267d   :  { %v2678_v22 = vsel %vm2668_vm2, %v2663_v26, 0.0 }
0x267e   :  { %v3852_v27 = vpop.eup %3851  ;;  %v2675_v14 = vsel %vm2668_vm2, %v2662_v17, 0.0 }
0x267f   :  { %v3854_v28 = vpop.eup %3853  ;;  %2676 = vadd.xlane.f32.xlu0 %v2675_v14  ;;  %v2665_v10 = vmul.f32 %v3852_v27, %v3209_v35 }
0x2680   :  { %v2664_v32 = vmul.f32 %v3854_v28, %v3209_v35 }
0x2681   :  { %v2684_v56 = vsel %vm2668_vm2, %v2665_v10, 0.0 }
0x2682   :  { %v3856_v18 = vpop.eup %3855  ;;  %v2681_v36 = vsel %vm2668_vm2, %v2664_v32, 0.0 }
0x2683   :  { %v3858_v29 = vpop.eup %3857  ;;  %2682 = vadd.xlane.f32.xlu1 %v2681_v36  ;;  %2679 = vadd.xlane.f32.xlu0 %v2678_v22  ;;  %v2667_v8 = vmul.f32 %v3856_v18, %v3209_v35 }
0x2684   :  { %v2666_v21 = vmul.f32 %v3858_v29, %v3209_v35 }
0x2685   :  { %v2690_v57 = vsel %vm2668_vm2, %v2667_v8, 0.0 }
0x2686   :  { %v2687_v11 = vsel %vm2668_vm2, %v2666_v21, 0.0 }
0x2687   :  { %2688 = vadd.xlane.f32.xlu1 %v2687_v11  ;;  %2685 = vadd.xlane.f32.xlu0 %v2684_v56 }
0x268b   :  { %2691 = vadd.xlane.f32.xlu0 %v2690_v57 }
0x2707   :  { %v2674_v31 = vpop.xlane.xlu1 %2673 }
0x2708   :  { %v2671_v34 = vpop.xlane.xlu0 %2670  ;;  %v2701_v25 = vadd.f32 %v3210_v42, %v2674_v31 }
0x2709   :  { %v2700_v7 = vadd.f32 %v3210_v42, %v2671_v34 }
0x270b   :  { %v2708_v38 = vmax.f32 %v2700_v7, %v2701_v25 }
0x270c   :  { %v2677_v4 = vpop.xlane.xlu0 %2676 }
0x270d   :  { %v2702_v52 = vadd.f32 %v3210_v42, %v2677_v4 }
0x270f   :  { %v2709_v62 = vmax.f32 %v2708_v38, %v2702_v52 }
0x2710   :  { %v2683_v6 = vpop.xlane.xlu1 %2682  ;;  %v2680_v39 = vpop.xlane.xlu0 %2679 }
0x2711   :  { %v2703_v50 = vadd.f32 %v3210_v42, %v2680_v39  ;;  %v2704_v49 = vadd.f32 %v3210_v42, %v2683_v6  ;;  %v2849_v6 = vld [vmem:[%s5134_s12] sm:$0xff]  ;;  %v2850_v39 = vld [vmem:[%s5134_s12 + $0x8] sm:$0xff] }
0x2713   :  { %v2710_v37 = vmax.f32 %v2709_v62, %v2703_v50  ;;  %v4054_v62 = vmov 0.0|0.0  }
0x2714   :  { %v2689_v15 = vpop.xlane.xlu1 %2688  ;;  %v2686_v41 = vpop.xlane.xlu0 %2685  ;;  %3607 = vmatprep.subr.bf16.mxu1 %v4054_v62  ;;  %3619 = vmatprep.subr.bf16.mxu0 %v4054_v62 }
0x2715   :  { %v2711_v33 = vmax.f32 %v2710_v37, %v2704_v49  ;;  %v2705_v59 = vadd.f32 %v3210_v42, %v2686_v41  ;;  %v2706_v55 = vadd.f32 %v3210_v42, %v2689_v15  ;;  %v2851_v37 = vld [vmem:[%s5134_s12 + $0x10] sm:$0xff]  ;;  %v2852_v15 = vld [vmem:[%s5134_s12 + $0x18] sm:$0xff] }
0x2716   :  { %v3611_v41 = vpack.c.bf16 %v2852_v15, %v2851_v37 }
0x2717   :  { %v2712_v5 = vmax.f32 %v2711_v33, %v2705_v59  ;;  %v2853_v33 = vld [vmem:[%s5134_s12 + $0x20] sm:$0xff] }
0x2718   :  { %v2692_v0 = vpop.xlane.xlu0 %2691 }
0x2719   :  { %v2713_v30 = vmax.f32 %v2712_v5, %v2706_v55  ;;  %v2707_v63 = vadd.f32 %v3210_v42, %v2692_v0  ;;  %v2855_v5 = vld [vmem:[%s5134_s12 + $0x30] sm:$0xff]  ;;  %v2856_v0 = vld [vmem:[%s5134_s12 + $0x38] sm:$0xff] }
0x271b   :  { %v2714_v24 = vmax.f32 %v2713_v30, %v2707_v63  ;;  %v3617_v30 = vpack.c.bf16 %v2856_v0, %v2855_v5 }
0x271d   :  { %v2715_v51 = vsub.f32 %v2700_v7, %v2714_v24  ;;  %v2718_v35 = vsub.f32 %v2701_v25, %v2714_v24  ;;  %v2721_v46 = vsub.f32 %v2702_v52, %v2714_v24  ;;  %v2724_v47 = vsub.f32 %v2703_v50, %v2714_v24 }
0x271e   :  { %v2727_v20 = vsub.f32 %v2704_v49, %v2714_v24  ;;  %v2730_v16 = vsub.f32 %v2705_v59, %v2714_v24  ;;  %v2733_v61 = vsub.f32 %v2706_v55, %v2714_v24  ;;  %v2736_v45 = vsub.f32 %v2707_v63, %v2714_v24  ;;  %v2854_v59 = vld [vmem:[%s5134_s12 + $0x28] sm:$0xff]  ;;  %v2938_v63 = vld [vmem:[%s5136_s14] sm:$0xff] }
0x271f   :  { %v2716_v54 = vmul.f32 1.442695, %v2715_v51  ;;  %v2719_v19 = vmul.f32 1.442695, %v2718_v35  ;;  %v2722_v23 = vmul.f32 1.442695, %v2721_v46  ;;  %v3608_v50 = vpack.c.bf16 %v2850_v39, %v2849_v6 }
0x2720   :  { %v2725_v40 = vmul.f32 1.442695, %v2724_v47  ;;  %v2728_v58 = vmul.f32 1.442695, %v2727_v20  ;;  %v2731_v3 = vmul.f32 1.442695, %v2730_v16  ;;  %v3614_v55 = vpack.c.bf16 %v2854_v59, %v2853_v33 }
0x2721   :  { %3859 = vpow2.f32 %v2716_v54  ;;  %v2734_v17 = vmul.f32 1.442695, %v2733_v61  ;;  %v2737_v27 = vmul.f32 1.442695, %v2736_v45  ;;  %3609 = vmatpush3.bf16.msra.mxu1 %v3608_v50  ;;  %v2939_v24 = vld [vmem:[%s5136_s14 + $0x8] sm:$0xff]  ;;  %v2940_v51 = vld [vmem:[%s5136_s14 + $0x10] sm:$0xff] }
0x2722   :  { %3861 = vpow2.f32 %v2719_v19  ;;  %3610 = vmatprep.subr.bf16.mxu1 %v4054_v62  ;;  %v3620_v35 = vpack.c.bf16 %v2939_v24, %v2938_v63  ;;  %v2941_v46 = vld [vmem:[%s5136_s14 + $0x18] sm:$0xff] }
0x2723   :  { %3863 = vpow2.f32 %v2722_v23  ;;  %v3623_v47 = vpack.c.bf16 %v2941_v46, %v2940_v51 }
0x2724   :  { %3865 = vpow2.f32 %v2725_v40  ;;  %3621 = vmatpush3.bf16.msra.mxu0 %v3620_v35 }
0x2725   :  { %3867 = vpow2.f32 %v2728_v58  ;;  %3612 = vmatpush3.bf16.msra.mxu1 %v3611_v41  ;;  %3622 = vmatprep.subr.bf16.mxu0 %v4054_v62 }
0x2726   :  { %3869 = vpow2.f32 %v2731_v3  ;;  %3613 = vmatprep.subr.bf16.mxu1 %v4054_v62 }
0x2727   :  { %3871 = vpow2.f32 %v2734_v17 }
0x2728   :  { %3873 = vpow2.f32 %v2737_v27  ;;  %3624 = vmatpush3.bf16.msra.mxu0 %v3623_v47 }
0x2729   :  { %3615 = vmatpush3.bf16.msra.mxu1 %v3614_v55 }
0x272a   :  { %3616 = vmatprep.subr.bf16.mxu1 %v4054_v62 }
0x272b   :  { %v3860_v14 = vpop.eup %3859 }
0x272c   :  { %v3862_v26 = vpop.eup %3861 }
0x272d   :  { %v2739_v28 = vadd.f32 %v3862_v26, %v3860_v14  ;;  %v3864_v32 = vpop.eup %3863  ;;  %3618 = vmatpush3.bf16.msra.mxu1 %v3617_v30 }
0x272e   :  { %v3866_v36 = vpop.eup %3865  ;;  %3625 = vmatprep.subr.bf16.mxu1 %v4054_v62 }
0x272f   :  { %v2740_v18 = vadd.f32 %v3864_v32, %v2739_v28  ;;  %v3868_v10 = vpop.eup %3867 }
0x2730   :  { %v3870_v21 = vpop.eup %3869 }
0x2731   :  { %v2741_v22 = vadd.f32 %v3866_v36, %v2740_v18  ;;  %v3872_v56 = vpop.eup %3871 }
0x2732   :  { %v3874_v57 = vpop.eup %3873 }
0x2733   :  { %v2742_v29 = vadd.f32 %v3868_v10, %v2741_v22 }
0x2735   :  { %v2743_v11 = vadd.f32 %v3870_v21, %v2742_v29 }
0x2737   :  { %v2744_v8 = vadd.f32 %v3872_v56, %v2743_v11  ;;  %v3211_v11 = vld [vmem:[#allocation14] ss:$0 sm:$0xff] }
0x2739   :  { %v2745_v2 = vadd.f32 %v3874_v57, %v2744_v8 }
0x273b   :  { %3875 = vrcp.f32 %v2745_v2  ;;  %v3023_v2 = vld [vmem:[%s5138_s16] sm:$0xff] }
0x2745   :  { %v3876_v42 = vpop.eup %3875 }
0x2746   :  { %v2758_v31 = vmul.f32 %v3876_v42, %v3862_v26  ;;  %v2748_v34 = vmul.f32 %v3876_v42, %v3860_v14  ;;  %v2784_v25 = vmul.f32 %v3876_v42, %v3866_v36  ;;  %v2771_v7 = vmul.f32 %v3876_v42, %v3864_v32 }
0x2747   :  { %v2810_v4 = vmul.f32 %v3876_v42, %v3870_v21  ;;  %v2836_v52 = vmul.f32 %v3876_v42, %v3874_v57  ;;  %v2797_v38 = vmul.f32 %v3876_v42, %v3868_v10  ;;  %v2823_v49 = vmul.f32 %v3876_v42, %v3872_v56  ;;  %v3024_v42 = vld [vmem:[%s5138_s16 + $0x8] sm:$0xff] }
0x2748   :  { %2761 = vperm.xlu0 %3650, %v2758_v31   ;;  %2751 = vperm.xlu1 %3649, %v2748_v34   ;;  %2757 = vst.msk [vmem:[#allocation16] sm:$0x3] %vm2756_vm3, %v2748_v34  ;;  %v3213_v34 = vld [vmem:[%s5137_s15] ss:$0 sm:$0xff] }
0x274c   :  { %2792 = vrot.lane.b32.xlu0 %v2784_v25, %s4051_s8  ;;  %2774 = vperm.xlu1 %3649, %v2771_v7  }
0x2750   :  { %2818 = vrot.lane.b32.xlu0 %v2810_v4, %s4052_s2  ;;  %2787 = vperm.xlu1 %3649, %v2784_v25  }
0x2754   :  { %2844 = vrot.lane.b32.xlu0 %v2836_v52, %s4053_s5  ;;  %2800 = vperm.xlu1 %3649, %v2797_v38  }
0x2758   :  { %2813 = vperm.xlu1 %3649, %v2810_v4  }
0x275c   :  { %2826 = vperm.xlu1 %3649, %v2823_v49  }
0x2760   :  { %2839 = vperm.xlu1 %3649, %v2836_v52  }
0x2764   :  { %2766 = vrot.lane.b32.xlu1 %v2758_v31, %s4056_s22  ;;  %v3626_v31 = vpack.c.bf16 %v3024_v42, %v3023_v2 }
0x2768   :  { %2779 = vrot.lane.b32.xlu1 %v2771_v7, %s4057_s30 }
0x276c   :  { %2805 = vrot.lane.b32.xlu1 %v2797_v38, %s4058_s24 }
0x2770   :  { %2831 = vrot.lane.b32.xlu1 %v2823_v49, %s4059_s25 }
0x27c7   :  { %v2752_v54 = vpop.permute.xlu1 %2751  ;;  %v2762_v23 = vpop.permute.xlu0 %2761 }
0x27c8   :  { %v2764_v40 = vmul.f32 %v2762_v23, %v4997_v60  ;;  %v2754_v16 = vmul.f32 %v2752_v54, %v4993_v43 }
0x27ca   :  { %v2765_v3 = vadd.f32 %v2764_v40, %v2754_v16 }
0x27cb   :  { %v2775_v19 = vpop.permute.xlu1 %2774 }
0x27cc   :  { %v2777_v61 = vmul.f32 %v2775_v19, %v5001_v53 }
0x27ce   :  { %v2778_v27 = vadd.f32 %v2777_v61, %v2765_v3 }
0x27cf   :  { %v2788_v20 = vpop.permute.xlu1 %2787 }
0x27d0   :  { %v2790_v45 = vmul.f32 %v2788_v20, %v5005_v48  ;;  %v2793_v48 = vpop.permute.xlu0 %2792 }
0x27d2   :  { %v2791_v26 = vadd.f32 %v2790_v45, %v2778_v27 }
0x27d3   :  { %v2801_v58 = vpop.permute.xlu1 %2800 }
0x27d4   :  { %v2803_v14 = vmul.f32 %v2801_v58, %v5009_v13 }
0x27d6   :  { %v2804_v18 = vadd.f32 %v2803_v14, %v2791_v26 }
0x27d7   :  { %v2814_v17 = vpop.permute.xlu1 %2813 }
0x27d8   :  { %v2816_v28 = vmul.f32 %v2814_v17, %v5013_v44  ;;  %v2819_v44 = vpop.permute.xlu0 %2818 }
0x27da   :  { %v2817_v60 = vadd.f32 %v2816_v28, %v2804_v18 }
0x27db   :  { %v2827_v32 = vpop.permute.xlu1 %2826 }
0x27dc   :  { %v2829_v36 = vmul.f32 %v2827_v32, %v5017_v12  ;;  %v2845_v21 = vpop.permute.xlu0 %2844 }
0x27de   :  { %v2830_v43 = vadd.f32 %v2829_v36, %v2817_v60 }
0x27df   :  { %v2840_v22 = vpop.permute.xlu1 %2839 }
0x27e0   :  { %v2842_v10 = vmul.f32 %v2840_v22, %v5021_v9 }
0x27e2   :  { %v2843_v53 = vadd.f32 %v2842_v10, %v2830_v43 }
0x27e3   :  { %v2767_v29 = vpop.permute.xlu1 %2766 }
0x27e4   :  { %2770 = vst.msk [vmem:[#allocation16] sm:$0x3] %vm2769_vm5, %v2767_v29  ;;  %3295 = vmatmul.mubr.msk.f32.vlgmr.msra.gmra.mrb[20].mxu1 %vm379_vm1, %v2843_v53 }
0x27e5   :  { %3312 = vmatprep.mubr.msk.f32.mxu1 %vm4055_vm4, %v4048_v1  ;;  %3627 = vmatpush3.bf16.msra.mxu1 %v3626_v31 }
0x27e7   :  { %v2780_v13 = vpop.permute.xlu1 %2779 }
0x27e8   :  { %2783 = vst.msk [vmem:[#allocation16] sm:$0x3] %vm2782_vm6, %v2780_v13 }
0x27e9   :  { %2796 = vst.msk [vmem:[#allocation16] sm:$0x3] %vm2795_vm7, %v2793_v48 }
0x27eb   :  { %v2806_v12 = vpop.permute.xlu1 %2805 }
0x27ec   :  { %2809 = vst.msk [vmem:[#allocation16] sm:$0x3] %vm2808_vm8, %v2806_v12 }
0x27ed   :  { %2822 = vst.msk [vmem:[#allocation16] sm:$0x3] %vm2821_vm9, %v2819_v44 }
0x27ef   :  { %v2832_v9 = vpop.permute.xlu1 %2831 }
0x27f0   :  { %2835 = vst.msk [vmem:[#allocation16] sm:$0x3] %vm2834_vm10, %v2832_v9 }
0x27f1   :  { %2848 = vst.msk [vmem:[#allocation16] sm:$0x3] %vm2847_vm11, %v2845_v21 }
0x28b7   :  { %v2933_v56 = vpop.f32.mrb[20].mxu1 }
0x28b8   :  { %v2934_v8 = vadd.f32 %v3211_v11, %v2933_v56  ;;  %v3296_v1 = vpop.f32.mrb[21].mxu1 }
0x28ba   :  { %v2937_v57 = vmax.f32 %v2934_v8, 0.0 }
0x28bc   :  { %3306 = vmatmul.mubr.msk.f32.vlgmr.msra.gmra.mrb[52].mxu0 %vm2668_vm2, %v2937_v57 }
0x298f   :  { %v3018_v25 = vpop.f32.mrb[52].mxu0 }
0x2990   :  { %v3019_v7 = vadd.f32 %v3213_v34, %v3018_v25  ;;  %v3307_v4 = vpop.f32.mrb[53].mxu0 }
0x2992   :  { %v3022_v52 = vmax.f32 %v3019_v7, 0.0 }
0x2994   :  { %3313 = vmatmul.mubr.msk.f32.vlgmr.msra.gmra.mrb[22].mxu1 %vm150_vm0, %v3022_v52 }
0x2995   :  { %3998 = shalt.err (!%p3995_p2)
}
0x2996   :  { %s3999_s15 = scalar_lea.hbm %s5141_s19, 32 }
0x2997   :  { %p4000_p3 = scmp.ne.s32.totalorder %s5141_s19, %s3999_s15  ;;  %p4003_p4 = scmp.lt.u32.totalorder %s3999_s15, %s5141_s19 }
0x2999   :  { %p4005_p5 = pnand %p4003_p4, %p4000_p3 }
0x299b   :  { %4008 = shalt.err (!%p4005_p5)
}
0x299c   :  { %3126 = dma.vmem_to_hbm [thread:$0]  %s3124_s0, 32, %s5141_s19, [#allocation17]   ;;  %v3215_v38 = vld [vmem:[%s5139_s17] ss:$0 sm:$0xff]  ;;  %vm3105_vm12 = vcmask 9216  }
0x299d   :  { %s4061_s25 = smov [#allocation15]  }
0x299e   :  { %s3113_s3 = sshll.u32 %s4061_s25, 4  ;;  %s3114_s3 = int_to_ptr.vmem [resolvable:$true] %s3113_s3 }
0x299f   :  { %s4009_s12 = scalar_lea.vmem %s3114_s3, 32  ;;  %p4014_p7 = scmp.lt.s32.totalorder %s3114_s3, %s3114_s3 }
0x29a0   :  { %p4010_p6 = scmp.ne.s32.totalorder %s3114_s3, %s4009_s12  ;;  %p4015_p8 = scmp.lt.s32.totalorder %s4009_s12, %s4009_s12 }
0x29a2   :  { %p4016_p9 = por %p4015_p8, %p4014_p7 }
0x29a4   :  { %p4017_p10 = pnand %p4016_p9, %p4010_p6 }
0x2a67   :  { %v3101_v6 = vpop.f32.mrb[22].mxu1 }
0x2a68   :  { %v3102_v39 = vadd.f32 %v3215_v38, %v3101_v6  ;;  %v3314_v62 = vpop.f32.mrb[23].mxu1 }
0x2a6a   :  { %3106 = vst.msk [vmem:[#allocation15] sm:$0x3] %vm3105_vm12, %v3102_v39 }
0x2a6b   :  { %4020 = shalt.err (!%p4017_p10)
}
0x2a6c   :  { %s5155_s8 = sld [smem:[#allocation27_spill]] }
0x2a72   :  { %s4021_s2 = scalar_lea.hbm %s5155_s8, 32 }
0x2a73   :  { %p4022_p11 = scmp.ne.s32.totalorder %s5155_s8, %s4021_s2  ;;  %p4025_p12 = scmp.lt.u32.totalorder %s4021_s2, %s5155_s8 }
0x2a75   :  { %p4027_p13 = pnand %p4025_p12, %p4022_p11 }
0x2a77   :  { %4030 = shalt.err (!%p4027_p13)
}
0x2a78   :  { %3116 = dma.vmem_to_hbm [thread:$0]  %s3114_s3, 32, %s5155_s8, [#allocation8]  }
0x2a79   :  { %4037 = dma.done.wait [#allocation8], 32  }
0x2a7a   :  { %4038 = vsyncadd [#allocation8], 4294967264 }
0x2a7b   :  { %4039 = dma.done.wait [#allocation17], 32  }
0x2a7c   :  { %4040 = vsyncadd [#allocation17], 4294967264 }
0x2a7d   :  { %3133 = vsyncpa [#allocation7], 1 }
0x2a7e   :  { %3134 = vsyncpa [#allocation10], 1 }
0x2a7f   :  { %3135 = vsyncpa [#allocation13], 1 }
0x2a80   :  { %3136 = vsyncpa [#allocation8], 1 }
0x2a81   :  { %3137 = vsyncpa [#allocation17], 1 }

</bundles_post_ra>
